<compile_context>
chip_gen: v6e
topology: v6e:2x2x1
jax: 0.10.0
libtpu: 0.0.40
codegen_flags: <defaults>
</compile_context>

<pallas_src>
import numpy as np
import jax
import jax.numpy as jnp
from jax import lax
from jax.experimental import pallas as pl
from jax.experimental.pallas import tpu as pltpu

# Model dimensions implied by the module.
IN_C, H, W = 3, 7, 7
K = 3
C1, H1, W1 = 32, 5, 5
C2, H2, W2 = 64, 3, 3
HID, N_ACT = 32, 4
OUT_PAD = 128                      # lane-dense padded output width


def _round_up(x, m):
    return ((x + m - 1) // m) * m


def _conv_as_dense(w_oihw, h_in, w_in):
    """Dense matrix of a stride-1 valid KxK conv.

    Rows are NHWC-flat input features ((h*Win + w)*Cin + ci); columns are
    NHWC-flat output features ((oh*Wout + ow)*Cout + co)."""
    c_out, c_in, k, _ = w_oihw.shape
    h_out, w_out = h_in - k + 1, w_in - k + 1
    oh, ow, kh, kw, ci, co = np.meshgrid(
        np.arange(h_out), np.arange(w_out), np.arange(k), np.arange(k),
        np.arange(c_in), np.arange(c_out), indexing="ij")
    rows = (((oh + kh) * w_in + (ow + kw)) * c_in + ci).ravel()
    cols = ((oh * w_out + ow) * c_out + co).ravel()
    vals = jnp.broadcast_to(
        jnp.transpose(w_oihw, (2, 3, 1, 0))[None, None],     # (kh, kw, ci, co)
        (h_out, w_out, k, k, c_in, c_out)).ravel()
    dense = jnp.zeros((h_in * w_in * c_in, h_out * w_out * c_out),
                      dtype=w_oihw.dtype)
    return dense.at[rows, cols].set(vals)


def dots_kernel(x_ref, w1_ref, b1_ref, w2_ref, b2_ref,
                fw1_ref, fb1_ref, fw2_ref, fb2_ref, out_ref):
    """One batch tile: 4 back-to-back MXU matmuls; bias-add/ReLU in f32."""
    z1 = jnp.maximum(
        jnp.dot(x_ref[...], w1_ref[...], preferred_element_type=jnp.float32)
        + b1_ref[...], 0.0)                                    # (bt, 800)
    z2 = jnp.maximum(
        jnp.dot(z1.astype(w2_ref.dtype), w2_ref[...],
                preferred_element_type=jnp.float32) + b2_ref[...], 0.0)  # (bt, 576)
    h = jnp.maximum(
        jnp.dot(z2.astype(fw1_ref.dtype), fw1_ref[...],
                preferred_element_type=jnp.float32) + fb1_ref[...], 0.0)  # (bt, 32)
    out = jnp.dot(h.astype(fw2_ref.dtype), fw2_ref[...],
                  preferred_element_type=jnp.float32) + fb2_ref[...]      # (bt, 128)
    out_ref[...] = out.astype(out_ref.dtype)


def dots_forward(x_nchw, params, *, compute_dtype=jnp.bfloat16, b_tile=None):
    """x_nchw: (B, 3, 7, 7) float32. Returns (B, 4) float32."""
    B = x_nchw.shape[0]
    # NCHW -> NHWC -> (B, H*W*C): channel dim innermost (lane-dense).
    x2d = jnp.transpose(x_nchw, (0, 2, 3, 1)).reshape(B, H * W * IN_C)

    w1_pt, b1_pt, w2_pt, b2_pt, fw1_pt, fb1_pt, fw2_pt, fb2_pt = params

    # --- weight prep (all layout plumbing hoisted out of the kernel) -------
    w1d = _conv_as_dense(w1_pt, H, W)          # (147, 800)
    w2d = _conv_as_dense(w2_pt, H1, W1)        # (800, 576)
    # fc1: PyTorch flattens (c,h,w); our z2 is (h,w,c)-flat -> permute rows.
    fw1k = jnp.transpose(fw1_pt.reshape(HID, C2, H2, W2),
                         (2, 3, 1, 0)).reshape(H2 * W2 * C2, HID)
    # fc2 zero-padded to 128 output lanes for lane-dense stores.
    fw2k = jnp.zeros((HID, OUT_PAD), jnp.float32).at[:, :N_ACT].set(fw2_pt.T)
    # Biases tiled to the NHWC-flat feature layout; kept in f32.
    b1k = jnp.tile(b1_pt, H1 * W1).reshape(1, H1 * W1 * C1)
    b2k = jnp.tile(b2_pt, H2 * W2).reshape(1, H2 * W2 * C2)
    fb1k = fb1_pt.reshape(1, HID)
    fb2k = jnp.zeros((1, OUT_PAD), jnp.float32).at[:, :N_ACT].set(fb2_pt)

    # --- batch padding / tiling -------------------------------------------
    if b_tile is None:
        b_tile = 2048 if B >= 4096 else 1024   # bigger tiles amortize per-step cost
    # Cap the tile at ceil(B/2) (sublane-aligned) so the grid has >= 2 steps
    # whenever possible: required for ("parallel",) to shard the batch across
    # both v7x TensorCores; harmless on single-TC v5e/v6e.
    bt = min(b_tile, _round_up(max(1, (B + 1) // 2), 8))
    B_pad = _round_up(B, bt)
    if B_pad != B:
        x2d = jnp.pad(x2d, ((0, B_pad - B), (0, 0)))

    cdt = compute_dtype
    x2d = x2d.astype(cdt)
    w1d, w2d, fw1k, fw2k = (w1d.astype(cdt), w2d.astype(cdt),
                            fw1k.astype(cdt), fw2k.astype(cdt))

    args = (x2d, w1d, b1k, w2d, b2k, fw1k, fb1k, fw2k, fb2k)

    def _const_spec(shape, single_buffer):
        n = len(shape)
        idx = lambda i, _n=n: (0,) * _n
        if single_buffer:
            # Grid-invariant operand: one resident VMEM buffer is enough;
            # default double-buffering would allocate a dead second copy.
            return pl.BlockSpec(shape, idx, pipeline_mode=pl.Buffered(1))
        return pl.BlockSpec(shape, idx)

    def _build(single_buffer_weights):
        grid_spec = pltpu.PrefetchScalarGridSpec(
            num_scalar_prefetch=0,
            grid=(B_pad // bt,),
            in_specs=[pl.BlockSpec((bt, H * W * IN_C), lambda i: (i, 0))]
                     + [_const_spec(a.shape, single_buffer_weights)
                        for a in args[1:]],
            out_specs=pl.BlockSpec((bt, OUT_PAD), lambda i: (i, 0)),
        )
        return pl.pallas_call(
            dots_kernel,
            out_shape=jax.ShapeDtypeStruct((B_pad, OUT_PAD), cdt),
            grid_spec=grid_spec,
            compiler_params=pltpu.CompilerParams(
                dimension_semantics=("parallel",),
                # Only needed for very large tiles; 48 MiB stays within the
                # v7x 64 MiB physical VMEM and is comfortable on v5e/v6e.
                vmem_limit_bytes=(48 << 20) if bt >= 2048 else None),
        )

    try:
        out = _build(True)(*args)
    except Exception:
        # pl.Buffered(1) not supported by this JAX/libtpu combo -> fall back
        # to default double-buffered constant specs (correctness identical).
        out = _build(False)(*args)
    return out[:B, :N_ACT].astype(jnp.float32)


def dots_reference(x_nchw, params):
    """Plain-JAX reference with PyTorch (NCHW / OIHW) semantics."""
    w1, b1, w2, b2, fw1, fb1, fw2, fb2 = params
    dn = ('NCHW', 'OIHW', 'NCHW')
    z = lax.conv_general_dilated(x_nchw, w1, (1, 1), 'VALID', dimension_numbers=dn)
    z = jnp.maximum(z + b1.reshape(1, -1, 1, 1), 0.0)
    z = lax.conv_general_dilated(z, w2, (1, 1), 'VALID', dimension_numbers=dn)
    z = jnp.maximum(z + b2.reshape(1, -1, 1, 1), 0.0)
    z = z.reshape(z.shape[0], -1)                  # (B, 576), (c,h,w) order
    z = jnp.maximum(z @ fw1.T + fb1, 0.0)
    return z @ fw2.T + fb2


def init_params(key):
    """Deterministic parameters in PyTorch layouts (OIHW conv, (out,in) linear)."""
    ks = jax.random.split(key, 8)

    def u(k, shape, fan_in):
        b = float(fan_in) ** -0.5
        return jax.random.uniform(k, shape, jnp.float32, -b, b)

    w1 = u(ks[0], (C1, IN_C, K, K), IN_C * K * K)
    b1 = u(ks[1], (C1,), IN_C * K * K)
    w2 = u(ks[2], (C2, C1, K, K), C1 * K * K)
    b2 = u(ks[3], (C2,), C1 * K * K)
    fw1 = u(ks[4], (HID, C2 * H2 * W2), C2 * H2 * W2)
    fb1 = u(ks[5], (HID,), C2 * H2 * W2)
    fw2 = u(ks[6], (N_ACT, HID), HID)
    fb2 = u(ks[7], (N_ACT,), HID)
    return (w1, b1, w2, b2, fw1, fb1, fw2, fb2)


if __name__ == "__main__":
    # NOTE: policy_history / rewards buffers in __init__ are training-time
    # state and do not participate in forward(); intentionally omitted.
    key = jax.random.PRNGKey(0)
    pkey, xkey, xkey2, xkey3 = jax.random.split(key, 4)
    params = init_params(pkey)

    B = 2
    x = jax.random.normal(xkey, (B, IN_C, H, W), jnp.float32)   # NCHW (B,3,7,7)
    ref = dots_reference(x, params)

    # Default path: bf16 compute + bf16 padded output (MXU-native) -- loose tol.
    out = jax.block_until_ready(dots_forward(x, params))
    assert out.shape == (B, N_ACT)
    assert jnp.allclose(out, ref, atol=5e-2, rtol=5e-2), "bf16 kernel mismatch"

    # f32 debug path (tight check).
    out_f32 = jax.block_until_ready(
        dots_forward(x, params, compute_dtype=jnp.float32))
    assert jnp.allclose(out_f32, ref, atol=5e-3, rtol=5e-3), "f32 kernel mismatch"

    # Multi-step grid + batch padding path (B not a multiple of the tile).
    B2 = 50
    x2 = jax.random.normal(xkey2, (B2, IN_C, H, W), jnp.float32)
    ref2 = dots_reference(x2, params)
    out2 = jax.block_until_ready(
        dots_forward(x2, params, compute_dtype=jnp.float32, b_tile=16))
    assert out2.shape == (B2, N_ACT)
    assert jnp.allclose(out2, ref2, atol=5e-3, rtol=5e-3), "tiled kernel mismatch"

    # Default-arg path at a moderate batch: exercises the >=2-step grid cap
    # (two grid steps -> both v7x TensorCores active) with bf16 output.
    B3 = 512
    x3 = jax.random.normal(xkey3, (B3, IN_C, H, W), jnp.float32)
    ref3 = dots_reference(x3, params)
    out3 = jax.block_until_ready(dots_forward(x3, params))
    assert out3.shape == (B3, N_ACT)
    assert jnp.allclose(out3, ref3, atol=5e-2, rtol=5e-2), "default-path mismatch"

    print("KERNEL_OK")
</pallas_src>

<mosaic_0001>
module attributes {stable_mosaic.version = 11 : i64} {
  func.func @dots_kernel(%arg0: i32, %arg1: memref<8x147xbf16, #tpu.memory_space<vmem>>, %arg2: memref<147x800xbf16, #tpu.memory_space<vmem>>, %arg3: memref<1x800xf32, #tpu.memory_space<vmem>>, %arg4: memref<800x576xbf16, #tpu.memory_space<vmem>>, %arg5: memref<1x576xf32, #tpu.memory_space<vmem>>, %arg6: memref<576x32xbf16, #tpu.memory_space<vmem>>, %arg7: memref<1x32xf32, #tpu.memory_space<vmem>>, %arg8: memref<32x128xbf16, #tpu.memory_space<vmem>>, %arg9: memref<1x128xf32, #tpu.memory_space<vmem>>, %arg10: memref<8x128xbf16, #tpu.memory_space<vmem>>) attributes {dimension_semantics = [#tpu.dimension_semantics<parallel>], iteration_bounds = array<i64: 1>, scalar_prefetch = 0 : i64, scratch_operands = 0 : i64, tpu.core_type = #tpu.core_type<tc>, window_params = [{transform_indices = @transform_0, window_bounds = array<i64: 8, 147>}, {pipeline_mode = #tpu.pipeline_mode<synchronous>, transform_indices = @transform_1, window_bounds = array<i64: 147, 800>}, {pipeline_mode = #tpu.pipeline_mode<synchronous>, transform_indices = @transform_2, window_bounds = array<i64: 1, 800>}, {pipeline_mode = #tpu.pipeline_mode<synchronous>, transform_indices = @transform_3, window_bounds = array<i64: 800, 576>}, {pipeline_mode = #tpu.pipeline_mode<synchronous>, transform_indices = @transform_4, window_bounds = array<i64: 1, 576>}, {pipeline_mode = #tpu.pipeline_mode<synchronous>, transform_indices = @transform_5, window_bounds = array<i64: 576, 32>}, {pipeline_mode = #tpu.pipeline_mode<synchronous>, transform_indices = @transform_6, window_bounds = array<i64: 1, 32>}, {pipeline_mode = #tpu.pipeline_mode<synchronous>, transform_indices = @transform_7, window_bounds = array<i64: 32, 128>}, {pipeline_mode = #tpu.pipeline_mode<synchronous>, transform_indices = @transform_8, window_bounds = array<i64: 1, 128>}, {transform_indices = @transform_9, window_bounds = array<i64: 8, 128>}]} {
    %c0 = arith.constant 0 : index
    %c0_0 = arith.constant 0 : index
    %0 = vector.load %arg1[%c0, %c0_0] : memref<8x147xbf16, #tpu.memory_space<vmem>>, vector<8x147xbf16>
    %c0_1 = arith.constant 0 : index
    %c0_2 = arith.constant 0 : index
    %1 = vector.load %arg2[%c0_1, %c0_2] : memref<147x800xbf16, #tpu.memory_space<vmem>>, vector<147x800xbf16>
    %cst = arith.constant dense<0.000000e+00> : vector<8x800xf32>
    %2 = tpu.matmul %0, %1, %cst {dimension_numbers = #tpu.dot_dimension_numbers<[1], [0], [0], [1], [0, 0, 1, 1], [], []>} : vector<8x147xbf16>, vector<147x800xbf16>, vector<8x800xf32> -> vector<8x800xf32>
    %c0_3 = arith.constant 0 : index
    %c0_4 = arith.constant 0 : index
    %3 = vector.load %arg3[%c0_3, %c0_4] : memref<1x800xf32, #tpu.memory_space<vmem>>, vector<1x800xf32>
    %4 = vector.broadcast %3 : vector<1x800xf32> to vector<8x800xf32>
    %5 = arith.addf %2, %4 : vector<8x800xf32>
    %cst_5 = arith.constant 0.000000e+00 : f32
    %6 = vector.broadcast %cst_5 : f32 to vector<8x800xf32>
    %7 = arith.maximumf %5, %6 : vector<8x800xf32>
    %8 = arith.truncf %7 : vector<8x800xf32> to vector<8x800xbf16>
    %c0_6 = arith.constant 0 : index
    %c0_7 = arith.constant 0 : index
    %9 = vector.load %arg4[%c0_6, %c0_7] : memref<800x576xbf16, #tpu.memory_space<vmem>>, vector<800x576xbf16>
    %cst_8 = arith.constant dense<0.000000e+00> : vector<8x576xf32>
    %10 = tpu.matmul %8, %9, %cst_8 {dimension_numbers = #tpu.dot_dimension_numbers<[1], [0], [0], [1], [0, 0, 1, 1], [], []>} : vector<8x800xbf16>, vector<800x576xbf16>, vector<8x576xf32> -> vector<8x576xf32>
    %c0_9 = arith.constant 0 : index
    %c0_10 = arith.constant 0 : index
    %11 = vector.load %arg5[%c0_9, %c0_10] : memref<1x576xf32, #tpu.memory_space<vmem>>, vector<1x576xf32>
    %12 = vector.broadcast %11 : vector<1x576xf32> to vector<8x576xf32>
    %13 = arith.addf %10, %12 : vector<8x576xf32>
    %cst_11 = arith.constant 0.000000e+00 : f32
    %14 = vector.broadcast %cst_11 : f32 to vector<8x576xf32>
    %15 = arith.maximumf %13, %14 : vector<8x576xf32>
    %16 = arith.truncf %15 : vector<8x576xf32> to vector<8x576xbf16>
    %c0_12 = arith.constant 0 : index
    %c0_13 = arith.constant 0 : index
    %17 = vector.load %arg6[%c0_12, %c0_13] : memref<576x32xbf16, #tpu.memory_space<vmem>>, vector<576x32xbf16>
    %cst_14 = arith.constant dense<0.000000e+00> : vector<8x32xf32>
    %18 = tpu.matmul %16, %17, %cst_14 {dimension_numbers = #tpu.dot_dimension_numbers<[1], [0], [0], [1], [0, 0, 1, 1], [], []>} : vector<8x576xbf16>, vector<576x32xbf16>, vector<8x32xf32> -> vector<8x32xf32>
    %c0_15 = arith.constant 0 : index
    %c0_16 = arith.constant 0 : index
    %19 = vector.load %arg7[%c0_15, %c0_16] : memref<1x32xf32, #tpu.memory_space<vmem>>, vector<1x32xf32>
    %20 = vector.broadcast %19 : vector<1x32xf32> to vector<8x32xf32>
    %21 = arith.addf %18, %20 : vector<8x32xf32>
    %cst_17 = arith.constant 0.000000e+00 : f32
    %22 = vector.broadcast %cst_17 : f32 to vector<8x32xf32>
    %23 = arith.maximumf %21, %22 : vector<8x32xf32>
    %24 = arith.truncf %23 : vector<8x32xf32> to vector<8x32xbf16>
    %c0_18 = arith.constant 0 : index
    %c0_19 = arith.constant 0 : index
    %25 = vector.load %arg8[%c0_18, %c0_19] : memref<32x128xbf16, #tpu.memory_space<vmem>>, vector<32x128xbf16>
    %cst_20 = arith.constant dense<0.000000e+00> : vector<8x128xf32>
    %26 = tpu.matmul %24, %25, %cst_20 {dimension_numbers = #tpu.dot_dimension_numbers<[1], [0], [0], [1], [0, 0, 1, 1], [], []>} : vector<8x32xbf16>, vector<32x128xbf16>, vector<8x128xf32> -> vector<8x128xf32>
    %c0_21 = arith.constant 0 : index
    %c0_22 = arith.constant 0 : index
    %27 = vector.load %arg9[%c0_21, %c0_22] : memref<1x128xf32, #tpu.memory_space<vmem>>, vector<1x128xf32>
    %28 = vector.broadcast %27 : vector<1x128xf32> to vector<8x128xf32>
    %29 = arith.addf %26, %28 : vector<8x128xf32>
    %30 = arith.truncf %29 : vector<8x128xf32> to vector<8x128xbf16>
    %c0_23 = arith.constant 0 : index
    %c0_24 = arith.constant 0 : index
    %31 = vector.load %arg10[%c0_23, %c0_24] : memref<8x128xbf16, #tpu.memory_space<vmem>>, vector<8x128xbf16>
    tpu.vector_store %arg10[%c0_23, %c0_24], %30 {strides = array<i32>} : memref<8x128xbf16, #tpu.memory_space<vmem>>, vector<8x128xbf16>,
    return
  }
  func.func @transform_0(%arg0: i32) -> (i32, i32) {
    %c0_i32 = arith.constant 0 : i32
    %c0_i32_0 = arith.constant 0 : i32
    return %arg0, %c0_i32 : i32, i32
  }
  func.func @transform_1(%arg0: i32) -> (i32, i32) {
    %c0_i32 = arith.constant 0 : i32
    %c0_i32_0 = arith.constant 0 : i32
    %c0_i32_1 = arith.constant 0 : i32
    return %c0_i32, %c0_i32_0 : i32, i32
  }
  func.func @transform_2(%arg0: i32) -> (i32, i32) {
    %c0_i32 = arith.constant 0 : i32
    %c0_i32_0 = arith.constant 0 : i32
    %c0_i32_1 = arith.constant 0 : i32
    return %c0_i32, %c0_i32_0 : i32, i32
  }
  func.func @transform_3(%arg0: i32) -> (i32, i32) {
    %c0_i32 = arith.constant 0 : i32
    %c0_i32_0 = arith.constant 0 : i32
    %c0_i32_1 = arith.constant 0 : i32
    return %c0_i32, %c0_i32_0 : i32, i32
  }
  func.func @transform_4(%arg0: i32) -> (i32, i32) {
    %c0_i32 = arith.constant 0 : i32
    %c0_i32_0 = arith.constant 0 : i32
    %c0_i32_1 = arith.constant 0 : i32
    return %c0_i32, %c0_i32_0 : i32, i32
  }
  func.func @transform_5(%arg0: i32) -> (i32, i32) {
    %c0_i32 = arith.constant 0 : i32
    %c0_i32_0 = arith.constant 0 : i32
    %c0_i32_1 = arith.constant 0 : i32
    return %c0_i32, %c0_i32_0 : i32, i32
  }
  func.func @transform_6(%arg0: i32) -> (i32, i32) {
    %c0_i32 = arith.constant 0 : i32
    %c0_i32_0 = arith.constant 0 : i32
    %c0_i32_1 = arith.constant 0 : i32
    return %c0_i32, %c0_i32_0 : i32, i32
  }
  func.func @transform_7(%arg0: i32) -> (i32, i32) {
    %c0_i32 = arith.constant 0 : i32
    %c0_i32_0 = arith.constant 0 : i32
    %c0_i32_1 = arith.constant 0 : i32
    return %c0_i32, %c0_i32_0 : i32, i32
  }
  func.func @transform_8(%arg0: i32) -> (i32, i32) {
    %c0_i32 = arith.constant 0 : i32
    %c0_i32_0 = arith.constant 0 : i32
    %c0_i32_1 = arith.constant 0 : i32
    return %c0_i32, %c0_i32_0 : i32, i32
  }
  func.func @transform_9(%arg0: i32) -> (i32, i32) {
    %c0_i32 = arith.constant 0 : i32
    %c0_i32_0 = arith.constant 0 : i32
    return %arg0, %c0_i32 : i32, i32
  }
}

module attributes {stable_mosaic.version = 11 : i64} {
  func.func @dots_kernel(%arg0: i32, %arg1: memref<8x147xbf16, #tpu.memory_space<vmem>>, %arg2: memref<147x800xbf16, #tpu.memory_space<vmem>>, %arg3: memref<1x800xf32, #tpu.memory_space<vmem>>, %arg4: memref<800x576xbf16, #tpu.memory_space<vmem>>, %arg5: memref<1x576xf32, #tpu.memory_space<vmem>>, %arg6: memref<576x32xbf16, #tpu.memory_space<vmem>>, %arg7: memref<1x32xf32, #tpu.memory_space<vmem>>, %arg8: memref<32x128xbf16, #tpu.memory_space<vmem>>, %arg9: memref<1x128xf32, #tpu.memory_space<vmem>>, %arg10: memref<8x128xbf16, #tpu.memory_space<vmem>>) attributes {dimension_semantics = [#tpu.dimension_semantics<parallel>], iteration_bounds = array<i64: 1>, scalar_prefetch = 0 : i64, scratch_operands = 0 : i64, tpu.core_type = #tpu.core_type<tc>, window_params = [{transform_indices = @transform_0, window_bounds = array<i64: 8, 147>}, {pipeline_mode = #tpu.pipeline_mode<synchronous>, transform_indices = @transform_1, window_bounds = array<i64: 147, 800>}, {pipeline_mode = #tpu.pipeline_mode<synchronous>, transform_indices = @transform_2, window_bounds = array<i64: 1, 800>}, {pipeline_mode = #tpu.pipeline_mode<synchronous>, transform_indices = @transform_3, window_bounds = array<i64: 800, 576>}, {pipeline_mode = #tpu.pipeline_mode<synchronous>, transform_indices = @transform_4, window_bounds = array<i64: 1, 576>}, {pipeline_mode = #tpu.pipeline_mode<synchronous>, transform_indices = @transform_5, window_bounds = array<i64: 576, 32>}, {pipeline_mode = #tpu.pipeline_mode<synchronous>, transform_indices = @transform_6, window_bounds = array<i64: 1, 32>}, {pipeline_mode = #tpu.pipeline_mode<synchronous>, transform_indices = @transform_7, window_bounds = array<i64: 32, 128>}, {pipeline_mode = #tpu.pipeline_mode<synchronous>, transform_indices = @transform_8, window_bounds = array<i64: 1, 128>}, {transform_indices = @transform_9, window_bounds = array<i64: 8, 128>}]} {
    %c0 = arith.constant 0 : index
    %c0_0 = arith.constant 0 : index
    %0 = vector.load %arg1[%c0, %c0_0] : memref<8x147xbf16, #tpu.memory_space<vmem>>, vector<8x147xbf16>
    %c0_1 = arith.constant 0 : index
    %c0_2 = arith.constant 0 : index
    %1 = vector.load %arg2[%c0_1, %c0_2] : memref<147x800xbf16, #tpu.memory_space<vmem>>, vector<147x800xbf16>
    %cst = arith.constant dense<0.000000e+00> : vector<8x800xf32>
    %2 = tpu.matmul %0, %1, %cst {dimension_numbers = #tpu.dot_dimension_numbers<[1], [0], [0], [1], [0, 0, 1, 1], [], []>} : vector<8x147xbf16>, vector<147x800xbf16>, vector<8x800xf32> -> vector<8x800xf32>
    %c0_3 = arith.constant 0 : index
    %c0_4 = arith.constant 0 : index
    %3 = vector.load %arg3[%c0_3, %c0_4] : memref<1x800xf32, #tpu.memory_space<vmem>>, vector<1x800xf32>
    %4 = vector.broadcast %3 : vector<1x800xf32> to vector<8x800xf32>
    %5 = arith.addf %2, %4 : vector<8x800xf32>
    %cst_5 = arith.constant 0.000000e+00 : f32
    %6 = vector.broadcast %cst_5 : f32 to vector<8x800xf32>
    %7 = arith.maximumf %5, %6 : vector<8x800xf32>
    %8 = arith.truncf %7 : vector<8x800xf32> to vector<8x800xbf16>
    %c0_6 = arith.constant 0 : index
    %c0_7 = arith.constant 0 : index
    %9 = vector.load %arg4[%c0_6, %c0_7] : memref<800x576xbf16, #tpu.memory_space<vmem>>, vector<800x576xbf16>
    %cst_8 = arith.constant dense<0.000000e+00> : vector<8x576xf32>
    %10 = tpu.matmul %8, %9, %cst_8 {dimension_numbers = #tpu.dot_dimension_numbers<[1], [0], [0], [1], [0, 0, 1, 1], [], []>} : vector<8x800xbf16>, vector<800x576xbf16>, vector<8x576xf32> -> vector<8x576xf32>
    %c0_9 = arith.constant 0 : index
    %c0_10 = arith.constant 0 : index
    %11 = vector.load %arg5[%c0_9, %c0_10] : memref<1x576xf32, #tpu.memory_space<vmem>>, vector<1x576xf32>
    %12 = vector.broadcast %11 : vector<1x576xf32> to vector<8x576xf32>
    %13 = arith.addf %10, %12 : vector<8x576xf32>
    %cst_11 = arith.constant 0.000000e+00 : f32
    %14 = vector.broadcast %cst_11 : f32 to vector<8x576xf32>
    %15 = arith.maximumf %13, %14 : vector<8x576xf32>
    %16 = arith.truncf %15 : vector<8x576xf32> to vector<8x576xbf16>
    %c0_12 = arith.constant 0 : index
    %c0_13 = arith.constant 0 : index
    %17 = vector.load %arg6[%c0_12, %c0_13] : memref<576x32xbf16, #tpu.memory_space<vmem>>, vector<576x32xbf16>
    %cst_14 = arith.constant dense<0.000000e+00> : vector<8x32xf32>
    %18 = tpu.matmul %16, %17, %cst_14 {dimension_numbers = #tpu.dot_dimension_numbers<[1], [0], [0], [1], [0, 0, 1, 1], [], []>} : vector<8x576xbf16>, vector<576x32xbf16>, vector<8x32xf32> -> vector<8x32xf32>
    %c0_15 = arith.constant 0 : index
    %c0_16 = arith.constant 0 : index
    %19 = vector.load %arg7[%c0_15, %c0_16] : memref<1x32xf32, #tpu.memory_space<vmem>>, vector<1x32xf32>
    %20 = vector.broadcast %19 : vector<1x32xf32> to vector<8x32xf32>
    %21 = arith.addf %18, %20 : vector<8x32xf32>
    %cst_17 = arith.constant 0.000000e+00 : f32
    %22 = vector.broadcast %cst_17 : f32 to vector<8x32xf32>
    %23 = arith.maximumf %21, %22 : vector<8x32xf32>
    %24 = arith.truncf %23 : vector<8x32xf32> to vector<8x32xbf16>
    %c0_18 = arith.constant 0 : index
    %c0_19 = arith.constant 0 : index
    %25 = vector.load %arg8[%c0_18, %c0_19] : memref<32x128xbf16, #tpu.memory_space<vmem>>, vector<32x128xbf16>
    %cst_20 = arith.constant dense<0.000000e+00> : vector<8x128xf32>
    %26 = tpu.matmul %24, %25, %cst_20 {dimension_numbers = #tpu.dot_dimension_numbers<[1], [0], [0], [1], [0, 0, 1, 1], [], []>} : vector<8x32xbf16>, vector<32x128xbf16>, vector<8x128xf32> -> vector<8x128xf32>
    %c0_21 = arith.constant 0 : index
    %c0_22 = arith.constant 0 : index
    %27 = vector.load %arg9[%c0_21, %c0_22] : memref<1x128xf32, #tpu.memory_space<vmem>>, vector<1x128xf32>
    %28 = vector.broadcast %27 : vector<1x128xf32> to vector<8x128xf32>
    %29 = arith.addf %26, %28 : vector<8x128xf32>
    %30 = arith.truncf %29 : vector<8x128xf32> to vector<8x128xbf16>
    %c0_23 = arith.constant 0 : index
    %c0_24 = arith.constant 0 : index
    %31 = vector.load %arg10[%c0_23, %c0_24] : memref<8x128xbf16, #tpu.memory_space<vmem>>, vector<8x128xbf16>
    tpu.vector_store %arg10[%c0_23, %c0_24], %30 {strides = array<i32>} : memref<8x128xbf16, #tpu.memory_space<vmem>>, vector<8x128xbf16>,
    return
  }
  func.func @transform_0(%arg0: i32) -> (i32, i32) {
    %c0_i32 = arith.constant 0 : i32
    %c0_i32_0 = arith.constant 0 : i32
    return %arg0, %c0_i32 : i32, i32
  }
  func.func @transform_1(%arg0: i32) -> (i32, i32) {
    %c0_i32 = arith.constant 0 : i32
    %c0_i32_0 = arith.constant 0 : i32
    %c0_i32_1 = arith.constant 0 : i32
    return %c0_i32, %c0_i32_0 : i32, i32
  }
  func.func @transform_2(%arg0: i32) -> (i32, i32) {
    %c0_i32 = arith.constant 0 : i32
    %c0_i32_0 = arith.constant 0 : i32
    %c0_i32_1 = arith.constant 0 : i32
    return %c0_i32, %c0_i32_0 : i32, i32
  }
  func.func @transform_3(%arg0: i32) -> (i32, i32) {
    %c0_i32 = arith.constant 0 : i32
    %c0_i32_0 = arith.constant 0 : i32
    %c0_i32_1 = arith.constant 0 : i32
    return %c0_i32, %c0_i32_0 : i32, i32
  }
  func.func @transform_4(%arg0: i32) -> (i32, i32) {
    %c0_i32 = arith.constant 0 : i32
    %c0_i32_0 = arith.constant 0 : i32
    %c0_i32_1 = arith.constant 0 : i32
    return %c0_i32, %c0_i32_0 : i32, i32
  }
  func.func @transform_5(%arg0: i32) -> (i32, i32) {
    %c0_i32 = arith.constant 0 : i32
    %c0_i32_0 = arith.constant 0 : i32
    %c0_i32_1 = arith.constant 0 : i32
    return %c0_i32, %c0_i32_0 : i32, i32
  }
  func.func @transform_6(%arg0: i32) -> (i32, i32) {
    %c0_i32 = arith.constant 0 : i32
    %c0_i32_0 = arith.constant 0 : i32
    %c0_i32_1 = arith.constant 0 : i32
    return %c0_i32, %c0_i32_0 : i32, i32
  }
  func.func @transform_7(%arg0: i32) -> (i32, i32) {
    %c0_i32 = arith.constant 0 : i32
    %c0_i32_0 = arith.constant 0 : i32
    %c0_i32_1 = arith.constant 0 : i32
    return %c0_i32, %c0_i32_0 : i32, i32
  }
  func.func @transform_8(%arg0: i32) -> (i32, i32) {
    %c0_i32 = arith.constant 0 : i32
    %c0_i32_0 = arith.constant 0 : i32
    %c0_i32_1 = arith.constant 0 : i32
    return %c0_i32, %c0_i32_0 : i32, i32
  }
  func.func @transform_9(%arg0: i32) -> (i32, i32) {
    %c0_i32 = arith.constant 0 : i32
    %c0_i32_0 = arith.constant 0 : i32
    return %arg0, %c0_i32 : i32, i32
  }
}

</mosaic_0001>

<bundles_post_ra>
// kernel: tpu_custom_call.1
= control target key start
LH: loop header
LB: loop body
LE: loop exit
PB: predicated region body
PF: predicated region fallthrough
CT: control target
= control target key end

     0   :  { %14 = vsyncpa [#allocation3], 0  ;;  %s4788_s0 = inlined_call_operand.vmem [shape: bf16[8,147], index: 0, kind: input, shape index: {}]   ;;  %s4789_s1 = inlined_call_operand.hbm [shape: bf16[147,800], index: 1, kind: input, shape index: {}]   ;;  %s4790_s2 = inlined_call_operand.vmem [shape: f32[1,800], index: 2, kind: input, shape index: {}]   ;;  %s4791_s3 = inlined_call_operand.hbm [shape: bf16[800,576], index: 3, kind: input, shape index: {}]   ;;  %s4792_s4 = inlined_call_operand.vmem [shape: f32[1,576], index: 4, kind: input, shape index: {}]   ;;  %s4793_s5 = inlined_call_operand.vmem [shape: bf16[576,32], index: 5, kind: input, shape index: {}]   ;;  %s4794_s6 = inlined_call_operand.vmem [shape: f32[1,32], index: 6, kind: input, shape index: {}]   ;;  %s4795_s7 = inlined_call_operand.vmem [shape: bf16[32,128], index: 7, kind: input, shape index: {}]   ;;  %s4796_s8 = inlined_call_operand.vmem [shape: f32[1,128], index: 8, kind: input, shape index: {}]   ;;  %s4797_s9 = inlined_call_operand.hbm [shape: bf16[8,128], index: 9, kind: output, shape index: {}]  }
   0x1   :  { %15 = vsyncpa [#allocation6], 0 }
   0x2   :  { %16 = vsyncpa [#allocation4], 0  ;;  %s4448_s30 = smov [#allocation2]  }
   0x3   :  { %s24_s10 = sshll.u32 %s4448_s30, 4  ;;  %s25_s10 = int_to_ptr.vmem [resolvable:$true] %s24_s10 }
   0x4   :  { %s4390_s11 = scalar_lea.vmem %s25_s10, 8512  ;;  %p4395_p1 = scmp.lt.s32.totalorder %s25_s10, %s25_s10 }
   0x5   :  { %p4391_p0 = scmp.ne.s32.totalorder %s25_s10, %s4390_s11  ;;  %p4396_p2 = scmp.lt.s32.totalorder %s4390_s11, %s4390_s11 }
   0x7   :  { %p4397_p3 = por %p4396_p2, %p4395_p1 }
   0x9   :  { %p4398_p4 = pnand %p4397_p3, %p4391_p0 }
   0xb   :  { %4401 = shalt.err (!%p4398_p4)
}
   0xc   :  { %s4449_s12 = smov 448   ;;  %s4450_s13 = smov 28  }
   0xd   :  { %30 = dma.hbm_to_vmem [thread:$0]  %s4789_s1, 8512, %s25_s10, [#allocation3], %s4449_s12, %s4449_s12, %s4450_s13  }
   0xe   :  { %s4451_s16 = smov [#allocation5]  }
   0xf   :  { %s38_s17 = sshll.u32 %s4451_s16, 4  ;;  %s39_s17 = int_to_ptr.vmem [resolvable:$true] %s38_s17 }
  0x10   :  { %s4410_s18 = scalar_lea.vmem %s39_s17, 32000  ;;  %p4415_p6 = scmp.lt.s32.totalorder %s39_s17, %s39_s17 }
  0x11   :  { %p4411_p5 = scmp.ne.s32.totalorder %s39_s17, %s4410_s18  ;;  %p4416_p7 = scmp.lt.s32.totalorder %s4410_s18, %s4410_s18 }
  0x13   :  { %p4417_p8 = por %p4416_p7, %p4415_p6 }
  0x15   :  { %p4418_p9 = pnand %p4417_p8, %p4411_p5 }
  0x17   :  { %4421 = shalt.err (!%p4418_p9)
}
  0x18   :  { %s4452_s19 = smov 320   ;;  %s4453_s20 = smov 20  }
  0x19   :  { %44 = dma.hbm_to_vmem [thread:$0]  %s4791_s3, 32000, %s39_s17, [#allocation6], %s4452_s19, %s4452_s19, %s4453_s20  }
  0x1a   :  { %4442 = dma.done.wait [#allocation3], 8512  }
  0x1b   :  { %4443 = vsyncadd [#allocation3], 4294958784 }
  0x1c   :  { %4444 = dma.done.wait [#allocation6], 32000  }
  0x1d   :  { %4445 = vsyncadd [#allocation6], 4294935296  ;;  %v3895_v0 = vld [vmem:[#allocation2 + $0x18c] ss:$28 sps:$4 sm:$0xff]   ;;  %v3897_v1 = vld [vmem:[#allocation2 + $0x194] ss:$28 sps:$4 sm:$0xff]  }
  0x1e   :  { %553 = vmatprep.subr.bf16.mxu0 %v3895_v0  ;;  %v3899_v2 = vld [vmem:[#allocation2 + $0x188] ss:$28 sps:$4 sm:$0xff]   ;;  %v3900_v3 = vld [vmem:[#allocation2 + $0x190] ss:$28 sps:$4 sm:$0xff]   ;;  %594 = vmatprep.subr.bf16.mxu1 %v3897_v1  ;;  %v3903_v5 = vld [vmem:[#allocation2 + $0x15c] ss:$28 sps:$4 sm:$0xff]  }
  0x1f   :  { %v3901_v4 = vld [vmem:[#allocation2 + $0x154] ss:$28 sps:$4 sm:$0xff]   ;;  %554 = vmatpush1.bf16.msra.mxu0 %v3899_v2  ;;  %595 = vmatpush1.bf16.msra.mxu1 %v3900_v3  ;;  %v3907_v8 = vld [vmem:[#allocation2 + $0x11c] ss:$28 sps:$4 sm:$0xff]   ;;  %v3909_v9 = vld [vmem:[#allocation2 + $0x124] ss:$28 sps:$4 sm:$0xff]  }
  0x20   :  { %v3905_v6 = vld [vmem:[#allocation2 + $0x150] ss:$28 sps:$4 sm:$0xff]   ;;  %555 = vmatprep.subr.bf16.mxu0 %v3901_v4  ;;  %v3906_v7 = vld [vmem:[#allocation2 + $0x158] ss:$28 sps:$4 sm:$0xff]   ;;  %596 = vmatprep.subr.bf16.mxu1 %v3903_v5  ;;  %v3912_v11 = vld [vmem:[#allocation2 + $0x120] ss:$28 sps:$4 sm:$0xff]  }
  0x21   :  { %v3911_v10 = vld [vmem:[#allocation2 + $0x118] ss:$28 sps:$4 sm:$0xff]   ;;  %v3913_v12 = vld [vmem:[#allocation2 + $0xe4] ss:$28 sps:$4 sm:$0xff]   ;;  %v3915_v13 = vld [vmem:[#allocation2 + $0xec] ss:$28 sps:$4 sm:$0xff]  }
  0x22   :  { %v3917_v14 = vld [vmem:[#allocation2 + $0xe0] ss:$28 sps:$4 sm:$0xff]   ;;  %v3918_v15 = vld [vmem:[#allocation2 + $0xe8] ss:$28 sps:$4 sm:$0xff]   ;;  %v3921_v17 = vld [vmem:[#allocation2 + $0xb4] ss:$28 sps:$4 sm:$0xff]  }
  0x23   :  { %556 = vmatpush1.bf16.msra.mxu0 %v3905_v6  ;;  %597 = vmatpush1.bf16.msra.mxu1 %v3906_v7  ;;  %v3919_v16 = vld [vmem:[#allocation2 + $0xac] ss:$28 sps:$4 sm:$0xff]   ;;  %v3925_v20 = vld [vmem:[#allocation2 + $0x74] ss:$28 sps:$4 sm:$0xff]   ;;  %v3927_v21 = vld [vmem:[#allocation2 + $0x7c] ss:$28 sps:$4 sm:$0xff]  }
  0x24   :  { %557 = vmatprep.subr.bf16.mxu0 %v3907_v8  ;;  %598 = vmatprep.subr.bf16.mxu1 %v3909_v9  ;;  %v3923_v18 = vld [vmem:[#allocation2 + $0xa8] ss:$28 sps:$4 sm:$0xff]   ;;  %v3924_v19 = vld [vmem:[#allocation2 + $0xb0] ss:$28 sps:$4 sm:$0xff]   ;;  %vm528_vm0 = vcmask 1040384   ;;  %vm529_vm1 = vcmask 1041408  }
  0x25   :  { %v3929_v22 = vld [vmem:[#allocation2 + $0x70] ss:$28 sps:$4 sm:$0xff]   ;;  %v3930_v23 = vld [vmem:[#allocation2 + $0x78] ss:$28 sps:$4 sm:$0xff]   ;;  %v3933_v25 = vld [vmem:[#allocation2 + $0x44] ss:$28 sps:$4 sm:$0xff]  }
  0x26   :  { %v3931_v24 = vld [vmem:[#allocation2 + $0x3c] ss:$28 sps:$4 sm:$0xff]   ;;  %v136_v27 = vld [vmem:[#allocation2 + $0x200] sm:$0x33]  ;;  %v4454_v29 = vmov 65535   ;;  %vm524_vm2 = vcmask 154624  }
  0x27   :  { %558 = vmatpush1.bf16.msra.mxu0 %v3911_v10  ;;  %599 = vmatpush1.bf16.msra.mxu1 %v3912_v11  ;;  %v135_v26 = vld [vmem:[#allocation2 + $0x1f8] sm:$0x33]  ;;  %v530_v30 = vsel %vm528_vm0, 4294967295, %v4454_v29  ;;  %v3937_v32 = vld [vmem:[#allocation2 + $0x4] ss:$28 sps:$4 sm:$0xff]   ;;  %v3432_v36 = vcombine.high %v136_v27, %v136_v27  ;;  %v3431_v42 = vcombine.low %v136_v27, %v136_v27  ;;  %v4455_v55 = vmov 0  }
  0x28   :  { %559 = vmatprep.subr.bf16.mxu0 %v3913_v12  ;;  %600 = vmatprep.subr.bf16.mxu1 %v3915_v13  ;;  %v3935_v28 = vld [vmem:[#allocation2 + $0x38] ss:$28 sps:$4 sm:$0xff]   ;;  %v3936_v31 = vld [vmem:[#allocation2 + $0x40] ss:$28 sps:$4 sm:$0xff]   ;;  %v3939_v34 = vld [vmem:[#allocation2 + $0xc] ss:$28 sps:$4 sm:$0xff]   ;;  %v3430_v35 = vcombine.high %v135_v26, %v135_v26  ;;  %v3429_v41 = vcombine.low %v135_v26, %v135_v26 }
  0x29   :  { %v62_v33 = vld [vmem:[%s4788_s0] sm:$0xff]  ;;  %v4518_v38 = vsel %vm529_vm1, %v530_v30, 0  ;;  %v3949_v48 = vld [vmem:[#allocation2 + $0x1cc] ss:$28 sps:$4 sm:$0xff]   ;;  %v3962_v51 = vld [vmem:[#allocation2 + $0x19c] ss:$28 sps:$4 sm:$0xff]  }
  0x2a   :  { %v3365_v37 = vcombine.high %v62_v33, %v62_v33  ;;  %v3941_v39 = vld [vmem:[#allocation2] ss:$28 sps:$4 sm:$0xff]   ;;  %v3942_v40 = vld [vmem:[#allocation2 + $0x8] ss:$28 sps:$4 sm:$0xff]   ;;  %v536_v43 = vand.u32 %v3430_v35, %v4518_v38  ;;  %v542_v44 = vand.u32 %v3432_v36, %v4518_v38  ;;  %v533_v45 = vand.u32 %v3429_v41, %v4518_v38  ;;  %v3960_v54 = vld [vmem:[#allocation2 + $0x198] ss:$28 sps:$4 sm:$0xff]  }
  0x2b   :  { %560 = vmatpush1.bf16.msra.mxu0 %v3917_v14  ;;  %601 = vmatpush1.bf16.msra.mxu1 %v3918_v15  ;;  %v539_v46 = vand.u32 %v3431_v42, %v4518_v38  ;;  %v3947_v47 = vld [vmem:[#allocation2 + $0x1c4] ss:$28 sps:$4 sm:$0xff]   ;;  %v4526_v52 = vcombine.low %v62_v33, %v62_v33  ;;  %v3970_v59 = vld [vmem:[#allocation2 + $0x12c] ss:$28 sps:$4 sm:$0xff]   ;;  %v3974_v62 = vld [vmem:[#allocation2 + $0xf4] ss:$28 sps:$4 sm:$0xff]  }
  0x2c   :  { %561 = vmatprep.subr.bf16.mxu0 %v3919_v16  ;;  %602 = vmatprep.subr.bf16.mxu1 %v3921_v17  ;;  %v3951_v49 = vld [vmem:[#allocation2 + $0x1c0] ss:$28 sps:$4 sm:$0xff]   ;;  %v3952_v50 = vld [vmem:[#allocation2 + $0x1c8] ss:$28 sps:$4 sm:$0xff]   ;;  %v3957_v60 = vld [vmem:[#allocation2 + $0x130] ss:$28 sps:$4 sm:$0xff]  }
  0x2d   :  { %3436 = vmatprep.mubr.msk.bf16.mxu0 %vm524_vm2, %v3365_v37  ;;  %3437 = vmatprep.mubr.msk.bf16.mxu1 %vm524_vm2, %v3365_v37  ;;  %v3955_v53 = vld [vmem:[#allocation2 + $0x1a0] ss:$28 sps:$4 sm:$0xff]   ;;  %v3956_v57 = vld [vmem:[#allocation2 + $0x168] ss:$28 sps:$4 sm:$0xff]   ;;  %v3958_v63 = vld [vmem:[#allocation2 + $0xf8] ss:$28 sps:$4 sm:$0xff]  }
  0x2e   :  { %v3966_v56 = vld [vmem:[#allocation2 + $0x164] ss:$28 sps:$4 sm:$0xff]   ;;  %v3972_v0 = vld [vmem:[#allocation2 + $0xf0] ss:$28 sps:$4 sm:$0xff]   ;;  %v3978_v1 = vld [vmem:[#allocation2 + $0xbc] ss:$28 sps:$4 sm:$0xff]  }
  0x2f   :  { %562 = vmatpush1.bf16.msra.mxu0 %v3923_v18  ;;  %603 = vmatpush1.bf16.msra.mxu1 %v3924_v19  ;;  %v3964_v58 = vld [vmem:[#allocation2 + $0x160] ss:$28 sps:$4 sm:$0xff]   ;;  %v3968_v61 = vld [vmem:[#allocation2 + $0x128] ss:$28 sps:$4 sm:$0xff]   ;;  %v3976_v3 = vld [vmem:[#allocation2 + $0xb8] ss:$28 sps:$4 sm:$0xff]  }
  0x30   :  { %563 = vmatprep.subr.bf16.mxu0 %v3925_v20  ;;  %604 = vmatprep.subr.bf16.mxu1 %v3927_v21  ;;  %v3959_v2 = vld [vmem:[#allocation2 + $0xc0] ss:$28 sps:$4 sm:$0xff]   ;;  %v3963_v5 = vld [vmem:[#allocation2 + $0x88] ss:$28 sps:$4 sm:$0xff]   ;;  %v3967_v9 = vld [vmem:[#allocation2 + $0x50] ss:$28 sps:$4 sm:$0xff]  }
  0x31   :  { %v3982_v4 = vld [vmem:[#allocation2 + $0x84] ss:$28 sps:$4 sm:$0xff]   ;;  %v3985_v7 = vld [vmem:[#allocation2 + $0x4c] ss:$28 sps:$4 sm:$0xff]   ;;  %v3988_v11 = vld [vmem:[#allocation2 + $0x14] ss:$28 sps:$4 sm:$0xff]  }
  0x32   :  { %v3980_v6 = vld [vmem:[#allocation2 + $0x80] ss:$28 sps:$4 sm:$0xff]   ;;  %v137_v8 = vld [vmem:[#allocation2 + $0x208] sm:$0x33]  ;;  %v3971_v13 = vld [vmem:[#allocation2 + $0x18] ss:$28 sps:$4 sm:$0xff]  }
  0x33   :  { %564 = vmatpush1.bf16.msra.mxu0 %v3929_v22  ;;  %605 = vmatpush1.bf16.msra.mxu1 %v3930_v23  ;;  %v3983_v10 = vld [vmem:[#allocation2 + $0x48] ss:$28 sps:$4 sm:$0xff]   ;;  %v3434_v12 = vcombine.high %v137_v8, %v137_v8  ;;  %v3975_v14 = vld [vmem:[#allocation2 + $0x210] ss:$0 sps:$4 sm:$0x33]   ;;  %v3433_v16 = vcombine.low %v137_v8, %v137_v8  ;;  %vm2357_vm3 = vcmask 261120  }
  0x34   :  { %565 = vmatprep.subr.bf16.mxu0 %v3931_v24  ;;  %606 = vmatprep.subr.bf16.mxu1 %v3933_v25  ;;  %v3986_v15 = vld [vmem:[#allocation2 + $0x10] ss:$28 sps:$4 sm:$0xff]   ;;  %v551_v18 = vand.u32 %v3975_v14, %v4518_v38  ;;  %v3979_v21 = vld [vmem:[#allocation2 + $0x1d8] ss:$28 sps:$4 sm:$0xff]   ;;  %v4002_v27 = vld [vmem:[#allocation5 + $0xf4] ss:$20 sps:$4 sm:$0xff]  }
  0x35   :  { %v548_v17 = vand.u32 %v3434_v12, %v4518_v38  ;;  %v545_v19 = vand.u32 %v3433_v16, %v4518_v38  ;;  %v3993_v20 = vld [vmem:[#allocation2 + $0x1d4] ss:$28 sps:$4 sm:$0xff]   ;;  %v3994_v25 = vld [vmem:[#allocation5 + $0x118] ss:$20 sps:$4 sm:$0xff]   ;;  %v4000_v29 = vld [vmem:[#allocation5 + $0xf0] ss:$20 sps:$4 sm:$0xff]  }
  0x36   :  { %v3991_v22 = vld [vmem:[#allocation2 + $0x1d0] ss:$28 sps:$4 sm:$0xff]   ;;  %v4003_v30 = vld [vmem:[#allocation5 + $0x370] ss:$20 sps:$4 sm:$0xff]   ;;  %v4015_v38 = vld [vmem:[#allocation5 + $0x320] ss:$20 sps:$4 sm:$0xff]  }
  0x37   :  { %566 = vmatpush1.bf16.msra.mxu0 %v3935_v28  ;;  %607 = vmatpush1.bf16.msra.mxu1 %v3936_v31  ;;  %v3996_v23 = vld [vmem:[#allocation5 + $0x11c] ss:$20 sps:$4 sm:$0xff]   ;;  %v3997_v26 = vld [vmem:[#allocation5 + $0x398] ss:$20 sps:$4 sm:$0xff]   ;;  %v4005_v28 = vld [vmem:[#allocation5 + $0x374] ss:$20 sps:$4 sm:$0xff]  }
  0x38   :  { %567 = vmatprep.subr.bf16.mxu0 %v3937_v32  ;;  %608 = vmatprep.subr.bf16.mxu1 %v3939_v34  ;;  %v3999_v24 = vld [vmem:[#allocation5 + $0x39c] ss:$20 sps:$4 sm:$0xff]   ;;  %v4008_v31 = vld [vmem:[#allocation5 + $0xcc] ss:$20 sps:$4 sm:$0xff]   ;;  %v4014_v35 = vld [vmem:[#allocation5 + $0xa4] ss:$20 sps:$4 sm:$0xff]  }
  0x39   :  { %v4011_v32 = vld [vmem:[#allocation5 + $0x34c] ss:$20 sps:$4 sm:$0xff]   ;;  %v4006_v33 = vld [vmem:[#allocation5 + $0xc8] ss:$20 sps:$4 sm:$0xff]   ;;  %v4017_v36 = vld [vmem:[#allocation5 + $0x324] ss:$20 sps:$4 sm:$0xff]  }
  0x3a   :  { %v4009_v34 = vld [vmem:[#allocation5 + $0x348] ss:$20 sps:$4 sm:$0xff]   ;;  %v4018_v41 = vld [vmem:[#allocation5 + $0x78] ss:$20 sps:$4 sm:$0xff]   ;;  %v4072_v14 = vld [vmem:[#allocation5 + $0x190] ss:$20 sps:$4 sm:$0xff]  }
  0x3b   :  { %568 = vmatpush1.bf16.msra.mxu0 %v3941_v39  ;;  %609 = vmatpush1.bf16.msra.mxu1 %v3942_v40  ;;  %v4020_v39 = vld [vmem:[#allocation5 + $0x7c] ss:$20 sps:$4 sm:$0xff]   ;;  %v4021_v42 = vld [vmem:[#allocation5 + $0x2f8] ss:$20 sps:$4 sm:$0xff]   ;;  %v4074_v12 = vld [vmem:[#allocation5 + $0x194] ss:$20 sps:$4 sm:$0xff]  }
  0x3c   :  { %581 = vmatprep.subr.bf16.mxu0 %v536_v43  ;;  %622 = vmatprep.subr.bf16.mxu1 %v542_v44  ;;  %v4023_v40 = vld [vmem:[#allocation5 + $0x2fc] ss:$20 sps:$4 sm:$0xff]   ;;  %v4026_v43 = vld [vmem:[#allocation5 + $0x54] ss:$20 sps:$4 sm:$0xff]   ;;  %v4080_v16 = vld [vmem:[#allocation5 + $0x16c] ss:$20 sps:$4 sm:$0xff]  }
  0x3d   :  { %v4029_v44 = vld [vmem:[#allocation5 + $0x2d4] ss:$20 sps:$4 sm:$0xff]   ;;  %v4068_v8 = vld [vmem:[#allocation5 + $0x1bc] ss:$20 sps:$4 sm:$0xff]   ;;  %vm4457_vm4 = vmmov 0   ;;  %vm3154_vm5 = vcmask 523264  }
  0x3e   :  { %s4458_s27 = smov [#allocation7]  }
  0x3f   :  { %582 = vmatpush2.bf16.msra.mxu0 %v533_v45  ;;  %623 = vmatpush2.bf16.msra.mxu1 %v539_v46  ;;  %v4024_v45 = vld [vmem:[#allocation5 + $0x50] ss:$20 sps:$4 sm:$0xff]   ;;  %s3354_s28 = sshll.u32 %s4458_s27, 4  ;;  %s3355_s28 = int_to_ptr.vmem [resolvable:$true] %s3354_s28 }
  0x40   :  { %583 = vmatprep.subr.bf16.mxu0 %v3947_v47  ;;  %624 = vmatprep.subr.bf16.mxu1 %v3949_v48  ;;  %v4027_v46 = vld [vmem:[#allocation5 + $0x2d0] ss:$20 sps:$4 sm:$0xff]   ;;  %v4032_v47 = vld [vmem:[#allocation5 + $0x2c] ss:$20 sps:$4 sm:$0xff]   ;;  %p4427_p11 = scmp.lt.s32.totalorder %s3355_s28, %s3355_s28 }
  0x41   :  { %v4035_v48 = vld [vmem:[#allocation5 + $0x2ac] ss:$20 sps:$4 sm:$0xff]  }
  0x43   :  { %584 = vmatpush2.bf16.msra.mxu0 %v3951_v49  ;;  %625 = vmatpush2.bf16.msra.mxu1 %v3952_v50  ;;  %v4030_v49 = vld [vmem:[#allocation5 + $0x28] ss:$20 sps:$4 sm:$0xff]  }
  0x44   :  { %676 = vmatprep.subr.bf16.mxu1 %v4455_v55  ;;  %635 = vmatprep.subr.bf16.mxu0 %v3962_v51  ;;  %v4033_v50 = vld [vmem:[#allocation5 + $0x2a8] ss:$20 sps:$4 sm:$0xff]   ;;  %v4038_v51 = vld [vmem:[#allocation5 + $0x4] ss:$20 sps:$4 sm:$0xff]  }
  0x46   :  { %586 = vmatmul.mubr.bf16.vlgmr.msra.gmra.mxu0 %v4526_v52  ;;  %627 = vmatmul.mubr.bf16.vlgmr.msra.gmra.mxu1 %v4526_v52 }
  0x47   :  { %677 = vmatpush1.bf16.msra.mxu1 %v3955_v53  ;;  %636 = vmatpush1.bf16.msra.mxu0 %v3960_v54  ;;  %v4036_v53 = vld [vmem:[#allocation5] ss:$20 sps:$4 sm:$0xff]  }
  0x48   :  { %678 = vmatprep.subr.bf16.mxu1 %v4455_v55  ;;  %637 = vmatprep.subr.bf16.mxu0 %v3966_v56  ;;  %v4039_v54 = vld [vmem:[#allocation5 + $0x280] ss:$20 sps:$4 sm:$0xff]   ;;  %v4044_v56 = vld [vmem:[#allocation5 + $0x25c] ss:$20 sps:$4 sm:$0xff]  }
  0x49   :  { %3439 = vmatprep.mubr.msk.bf16.mxu1 %vm524_vm2, %v3365_v37  ;;  %3438 = vmatprep.mubr.msk.bf16.mxu0 %vm524_vm2, %v3365_v37  ;;  %v4012_v37 = vld [vmem:[#allocation5 + $0xa0] ss:$20 sps:$4 sm:$0xff]  }
  0x4b   :  { %679 = vmatpush1.bf16.msra.mxu1 %v3956_v57  ;;  %638 = vmatpush1.bf16.msra.mxu0 %v3964_v58  ;;  %v4047_v57 = vld [vmem:[#allocation5 + $0x4dc] ss:$20 sps:$4 sm:$0xff]   ;;  %v4042_v58 = vld [vmem:[#allocation5 + $0x258] ss:$20 sps:$4 sm:$0xff]  }
  0x4c   :  { %680 = vmatprep.subr.bf16.mxu1 %v4455_v55  ;;  %639 = vmatprep.subr.bf16.mxu0 %v3970_v59  ;;  %v4045_v59 = vld [vmem:[#allocation5 + $0x4d8] ss:$20 sps:$4 sm:$0xff]  }
  0x4f   :  { %681 = vmatpush1.bf16.msra.mxu1 %v3957_v60  ;;  %640 = vmatpush1.bf16.msra.mxu0 %v3968_v61  ;;  %v4050_v60 = vld [vmem:[#allocation5 + $0x234] ss:$20 sps:$4 sm:$0xff]  }
  0x50   :  { %682 = vmatprep.subr.bf16.mxu1 %v4455_v55  ;;  %641 = vmatprep.subr.bf16.mxu0 %v3974_v62  ;;  %v4053_v61 = vld [vmem:[#allocation5 + $0x4b4] ss:$20 sps:$4 sm:$0xff]   ;;  %v4048_v62 = vld [vmem:[#allocation5 + $0x230] ss:$20 sps:$4 sm:$0xff]  }
  0x53   :  { %683 = vmatpush1.bf16.msra.mxu1 %v3958_v63  ;;  %642 = vmatpush1.bf16.msra.mxu0 %v3972_v0  ;;  %v4051_v63 = vld [vmem:[#allocation5 + $0x4b0] ss:$20 sps:$4 sm:$0xff]   ;;  %v4056_v0 = vld [vmem:[#allocation5 + $0x20c] ss:$20 sps:$4 sm:$0xff]  }
  0x54   :  { %684 = vmatprep.subr.bf16.mxu1 %v4455_v55  ;;  %643 = vmatprep.subr.bf16.mxu0 %v3978_v1  ;;  %v4059_v1 = vld [vmem:[#allocation5 + $0x48c] ss:$20 sps:$4 sm:$0xff]  }
  0x57   :  { %685 = vmatpush1.bf16.msra.mxu1 %v3959_v2  ;;  %644 = vmatpush1.bf16.msra.mxu0 %v3976_v3  ;;  %v4054_v2 = vld [vmem:[#allocation5 + $0x208] ss:$20 sps:$4 sm:$0xff]  }
  0x58   :  { %686 = vmatprep.subr.bf16.mxu1 %v4455_v55  ;;  %645 = vmatprep.subr.bf16.mxu0 %v3982_v4  ;;  %v4057_v3 = vld [vmem:[#allocation5 + $0x488] ss:$20 sps:$4 sm:$0xff]   ;;  %v4062_v4 = vld [vmem:[#allocation5 + $0x1e4] ss:$20 sps:$4 sm:$0xff]  }
  0x5b   :  { %687 = vmatpush1.bf16.msra.mxu1 %v3963_v5  ;;  %646 = vmatpush1.bf16.msra.mxu0 %v3980_v6  ;;  %v4065_v5 = vld [vmem:[#allocation5 + $0x464] ss:$20 sps:$4 sm:$0xff]   ;;  %v4060_v6 = vld [vmem:[#allocation5 + $0x1e0] ss:$20 sps:$4 sm:$0xff]  }
  0x5c   :  { %688 = vmatprep.subr.bf16.mxu1 %v4455_v55  ;;  %647 = vmatprep.subr.bf16.mxu0 %v3985_v7  ;;  %v4063_v7 = vld [vmem:[#allocation5 + $0x460] ss:$20 sps:$4 sm:$0xff]  }
  0x5f   :  { %689 = vmatpush1.bf16.msra.mxu1 %v3967_v9  ;;  %648 = vmatpush1.bf16.msra.mxu0 %v3983_v10  ;;  %v4071_v9 = vld [vmem:[#allocation5 + $0x43c] ss:$20 sps:$4 sm:$0xff]   ;;  %v4066_v10 = vld [vmem:[#allocation5 + $0x1b8] ss:$20 sps:$4 sm:$0xff]  }
  0x60   :  { %690 = vmatprep.subr.bf16.mxu1 %v4455_v55  ;;  %649 = vmatprep.subr.bf16.mxu0 %v3988_v11  ;;  %v4069_v11 = vld [vmem:[#allocation5 + $0x438] ss:$20 sps:$4 sm:$0xff]  }
  0x63   :  { %691 = vmatpush1.bf16.msra.mxu1 %v3971_v13  ;;  %650 = vmatpush1.bf16.msra.mxu0 %v3986_v15  ;;  %v4077_v13 = vld [vmem:[#allocation5 + $0x414] ss:$20 sps:$4 sm:$0xff]   ;;  %v4075_v15 = vld [vmem:[#allocation5 + $0x410] ss:$20 sps:$4 sm:$0xff]  }
  0x64   :  { %704 = vmatprep.subr.bf16.mxu1 %v4455_v55  ;;  %663 = vmatprep.subr.bf16.mxu0 %v548_v17  ;;  %v4083_v17 = vld [vmem:[#allocation5 + $0x3ec] ss:$20 sps:$4 sm:$0xff]  }
  0x67   :  { %705 = vmatpush2.bf16.msra.mxu1 %v551_v18  ;;  %664 = vmatpush2.bf16.msra.mxu0 %v545_v19  ;;  %v4078_v18 = vld [vmem:[#allocation5 + $0x168] ss:$20 sps:$4 sm:$0xff]  }
  0x68   :  { %706 = vmatprep.subr.bf16.mxu1 %v4455_v55  ;;  %665 = vmatprep.subr.bf16.mxu0 %v3993_v20  ;;  %v4081_v19 = vld [vmem:[#allocation5 + $0x3e8] ss:$20 sps:$4 sm:$0xff]   ;;  %v4086_v20 = vld [vmem:[#allocation5 + $0x144] ss:$20 sps:$4 sm:$0xff]  }
  0x6b   :  { %707 = vmatpush2.bf16.msra.mxu1 %v3979_v21  ;;  %666 = vmatpush2.bf16.msra.mxu0 %v3991_v22  ;;  %v4089_v21 = vld [vmem:[#allocation5 + $0x3c4] ss:$20 sps:$4 sm:$0xff]   ;;  %v4084_v22 = vld [vmem:[#allocation5 + $0x140] ss:$20 sps:$4 sm:$0xff]  }
  0x6c   :  { %2361 = vmatprep.subr.bf16.mxu0 %v3996_v23  ;;  %2402 = vmatprep.subr.bf16.mxu1 %v3999_v24  ;;  %v4087_v23 = vld [vmem:[#allocation5 + $0x3c0] ss:$20 sps:$4 sm:$0xff]   ;;  %v4092_v24 = vld [vmem:[#allocation5 + $0x61c] ss:$20 sps:$4 sm:$0xff]  }
  0x6e   :  { %709 = vmatmul.mubr.bf16.vlgmr.msra.gmra.mxu1 %v4526_v52  ;;  %668 = vmatmul.mubr.bf16.vlgmr.msra.gmra.mxu0 %v4526_v52  ;;  %v4041_v52 = vld [vmem:[#allocation5 + $0x284] ss:$20 sps:$4 sm:$0xff]  }
  0x6f   :  { %2362 = vmatpush1.bf16.msra.mxu0 %v3994_v25  ;;  %2403 = vmatpush1.bf16.msra.mxu1 %v3997_v26  ;;  %v4116_v25 = vld [vmem:[#allocation5 + $0x7ac] ss:$20 sps:$4 sm:$0xff]   ;;  %v141_v26 = vlaneseq }
  0x70   :  { %2363 = vmatprep.subr.bf16.mxu0 %v4002_v27  ;;  %2404 = vmatprep.subr.bf16.mxu1 %v4005_v28 }
  0x71   :  { %v4547_v27 = vshrl.u32 %v141_v26, 7  ;;  %v4123_v26 = vld [vmem:[#allocation5 + $0x730] ss:$20 sps:$4 sm:$0xff]  }
  0x73   :  { %2364 = vmatpush1.bf16.msra.mxu0 %v4000_v29  ;;  %2405 = vmatpush1.bf16.msra.mxu1 %v4003_v30  ;;  %v143_v28 = vsub.s32 0, %v4547_v27  ;;  %v151_v29 = vsub.s32 2, %v4547_v27  ;;  %v4554_v30 = vld [vmem:[%s4790_s2] sm:$0x7f] }
  0x74   :  { %2365 = vmatprep.subr.bf16.mxu0 %v4008_v31  ;;  %2406 = vmatprep.subr.bf16.mxu1 %v4011_v32  ;;  %v147_v31 = vsub.s32 1, %v4547_v27  ;;  %v155_v32 = vsub.s32 3, %v4547_v27 }
  0x77   :  { %2366 = vmatpush1.bf16.msra.mxu0 %v4006_v33  ;;  %2407 = vmatpush1.bf16.msra.mxu1 %v4009_v34  ;;  %v144_v33 = vrot.slane %v4554_v30, %v143_v28  ;;  %v152_v34 = vrot.slane %v4554_v30, %v151_v29 }
  0x78   :  { %2367 = vmatprep.subr.bf16.mxu0 %v4014_v35  ;;  %2408 = vmatprep.subr.bf16.mxu1 %v4017_v36  ;;  %v148_v35 = vrot.slane %v4554_v30, %v147_v31  ;;  %v156_v36 = vrot.slane %v4554_v30, %v155_v32 }
  0x7b   :  { %2368 = vmatpush1.bf16.msra.mxu0 %v4012_v37  ;;  %2409 = vmatpush1.bf16.msra.mxu1 %v4015_v38 }
  0x7c   :  { %2369 = vmatprep.subr.bf16.mxu0 %v4020_v39  ;;  %2410 = vmatprep.subr.bf16.mxu1 %v4023_v40 }
  0x7f   :  { %2370 = vmatpush1.bf16.msra.mxu0 %v4018_v41  ;;  %2411 = vmatpush1.bf16.msra.mxu1 %v4021_v42 }
  0x80   :  { %2371 = vmatprep.subr.bf16.mxu0 %v4026_v43  ;;  %2412 = vmatprep.subr.bf16.mxu1 %v4029_v44 }
  0x83   :  { %2372 = vmatpush1.bf16.msra.mxu0 %v4024_v45  ;;  %2413 = vmatpush1.bf16.msra.mxu1 %v4027_v46 }
  0x84   :  { %2373 = vmatprep.subr.bf16.mxu0 %v4032_v47  ;;  %2414 = vmatprep.subr.bf16.mxu1 %v4035_v48 }
  0x87   :  { %2374 = vmatpush1.bf16.msra.mxu0 %v4030_v49  ;;  %2415 = vmatpush1.bf16.msra.mxu1 %v4033_v50 }
  0x88   :  { %2375 = vmatprep.subr.bf16.mxu0 %v4038_v51  ;;  %2416 = vmatprep.subr.bf16.mxu1 %v4041_v52 }
  0x8b   :  { %2376 = vmatpush1.bf16.msra.mxu0 %v4036_v53  ;;  %2417 = vmatpush1.bf16.msra.mxu1 %v4039_v54 }
  0x8c   :  { %2377 = vmatprep.subr.bf16.mxu0 %v4044_v56  ;;  %2418 = vmatprep.subr.bf16.mxu1 %v4047_v57  ;;  %v4090_v57 = vld [vmem:[#allocation5 + $0x618] ss:$20 sps:$4 sm:$0xff]  }
  0x8f   :  { %2378 = vmatpush2.bf16.msra.mxu0 %v4042_v58  ;;  %2419 = vmatpush2.bf16.msra.mxu1 %v4045_v59  ;;  %v4114_v58 = vld [vmem:[#allocation5 + $0x7a8] ss:$20 sps:$4 sm:$0xff]  }
  0x90   :  { %2379 = vmatprep.subr.bf16.mxu0 %v4050_v60  ;;  %2420 = vmatprep.subr.bf16.mxu1 %v4053_v61  ;;  %v4095_v60 = vld [vmem:[#allocation5 + $0x5f4] ss:$20 sps:$4 sm:$0xff]   ;;  %v4122_v61 = vld [vmem:[#allocation5 + $0x784] ss:$20 sps:$4 sm:$0xff]  }
  0x93   :  { %2380 = vmatpush2.bf16.msra.mxu0 %v4048_v62  ;;  %2421 = vmatpush2.bf16.msra.mxu1 %v4051_v63  ;;  %v4093_v62 = vld [vmem:[#allocation5 + $0x5f0] ss:$20 sps:$4 sm:$0xff]   ;;  %v4120_v63 = vld [vmem:[#allocation5 + $0x780] ss:$20 sps:$4 sm:$0xff]  }
  0x94   :  { %2381 = vmatprep.subr.bf16.mxu0 %v4056_v0  ;;  %2422 = vmatprep.subr.bf16.mxu1 %v4059_v1  ;;  %v4098_v0 = vld [vmem:[#allocation5 + $0x5cc] ss:$20 sps:$4 sm:$0xff]   ;;  %v4128_v1 = vld [vmem:[#allocation5 + $0x124] ss:$20 sps:$4 sm:$0xff]  }
  0x97   :  { %2382 = vmatpush2.bf16.msra.mxu0 %v4054_v2  ;;  %2423 = vmatpush2.bf16.msra.mxu1 %v4057_v3  ;;  %v4096_v2 = vld [vmem:[#allocation5 + $0x5c8] ss:$20 sps:$4 sm:$0xff]   ;;  %v4101_v3 = vld [vmem:[#allocation5 + $0x5a4] ss:$20 sps:$4 sm:$0xff]  }
  0x98   :  { %2383 = vmatprep.subr.bf16.mxu0 %v4062_v4  ;;  %2424 = vmatprep.subr.bf16.mxu1 %v4065_v5  ;;  %v4099_v4 = vld [vmem:[#allocation5 + $0x5a0] ss:$20 sps:$4 sm:$0xff]   ;;  %v4104_v5 = vld [vmem:[#allocation5 + $0x57c] ss:$20 sps:$4 sm:$0xff]  }
  0x9b   :  { %2384 = vmatpush2.bf16.msra.mxu0 %v4060_v6  ;;  %2425 = vmatpush2.bf16.msra.mxu1 %v4063_v7  ;;  %v4102_v6 = vld [vmem:[#allocation5 + $0x578] ss:$20 sps:$4 sm:$0xff]   ;;  %v4107_v7 = vld [vmem:[#allocation5 + $0x554] ss:$20 sps:$4 sm:$0xff]  }
  0x9c   :  { %2385 = vmatprep.subr.bf16.mxu0 %v4068_v8  ;;  %2426 = vmatprep.subr.bf16.mxu1 %v4071_v9  ;;  %v4105_v8 = vld [vmem:[#allocation5 + $0x550] ss:$20 sps:$4 sm:$0xff]   ;;  %v4110_v9 = vld [vmem:[#allocation5 + $0x52c] ss:$20 sps:$4 sm:$0xff]  }
  0x9f   :  { %2386 = vmatpush2.bf16.msra.mxu0 %v4066_v10  ;;  %2427 = vmatpush2.bf16.msra.mxu1 %v4069_v11  ;;  %v4108_v10 = vld [vmem:[#allocation5 + $0x528] ss:$20 sps:$4 sm:$0xff]   ;;  %v4113_v11 = vld [vmem:[#allocation5 + $0x504] ss:$20 sps:$4 sm:$0xff]  }
  0xa0   :  { %2387 = vmatprep.subr.bf16.mxu0 %v4074_v12  ;;  %2428 = vmatprep.subr.bf16.mxu1 %v4077_v13  ;;  %v167_v12 = vsub.s32 6, %v4547_v27  ;;  %v4111_v13 = vld [vmem:[#allocation5 + $0x500] ss:$20 sps:$4 sm:$0xff]  }
  0xa3   :  { %2388 = vmatpush2.bf16.msra.mxu0 %v4072_v14  ;;  %2429 = vmatpush2.bf16.msra.mxu1 %v4075_v15  ;;  %v163_v14 = vsub.s32 5, %v4547_v27  ;;  %v4119_v15 = vld [vmem:[#allocation5 + $0x75c] ss:$20 sps:$4 sm:$0xff]  }
  0xa4   :  { %2389 = vmatprep.subr.bf16.mxu0 %v4080_v16  ;;  %2430 = vmatprep.subr.bf16.mxu1 %v4083_v17  ;;  %v168_v16 = vrot.slane %v4554_v30, %v167_v12  ;;  %v4117_v17 = vld [vmem:[#allocation5 + $0x758] ss:$20 sps:$4 sm:$0xff]   ;;  %v4165_v12 = vld [vmem:[#allocation5 + $0x3a0] ss:$20 sps:$4 sm:$0xff]  }
  0xa7   :  { %2390 = vmatpush2.bf16.msra.mxu0 %v4078_v18  ;;  %2431 = vmatpush2.bf16.msra.mxu1 %v4081_v19  ;;  %v164_v18 = vrot.slane %v4554_v30, %v163_v14  ;;  %v4168_v14 = vld [vmem:[#allocation5 + $0x8] ss:$20 sps:$4 sm:$0xff]  }
  0xa8   :  { %2391 = vmatprep.subr.bf16.mxu0 %v4086_v20  ;;  %2432 = vmatprep.subr.bf16.mxu1 %v4089_v21  ;;  %v4125_v20 = vld [vmem:[#allocation5 + $0x734] ss:$20 sps:$4 sm:$0xff]  }
  0xab   :  { %2392 = vmatpush2.bf16.msra.mxu0 %v4084_v22  ;;  %2433 = vmatpush2.bf16.msra.mxu1 %v4087_v23 }
  0xac   :  { %2443 = vmatprep.subr.bf16.mxu0 %v4092_v24  ;;  %2496 = vmatprep.subr.bf16.mxu1 %v4116_v25 }
 0x106   :  { %v587_v37 = vpop.f32.mrf.mxu0  ;;  %v628_v38 = vpop.f32.mrf.mxu1 }
 0x107   :  { %v588_v39 = vadd.f32 %v587_v37, %v144_v33  ;;  %v629_v40 = vadd.f32 %v628_v38, %v152_v34  ;;  %v4131_v38 = vld [vmem:[#allocation5 + $0x70c] ss:$20 sps:$4 sm:$0xff]  }
 0x108   :  { %v589_v41 = vpop.f32.mrf.mxu0  ;;  %v630_v42 = vpop.f32.mrf.mxu1 }
 0x109   :  { %v718_v43 = vmax.f32 %v629_v40, 0.0  ;;  %v590_v44 = vadd.f32 %v589_v41, %v148_v35  ;;  %v631_v45 = vadd.f32 %v630_v42, %v156_v36  ;;  %v716_v46 = vmax.f32 %v588_v39, 0.0  ;;  %v4126_v35 = vld [vmem:[#allocation5 + $0x120] ss:$20 sps:$4 sm:$0xff]   ;;  %v4134_v39 = vld [vmem:[#allocation5 + $0xfc] ss:$20 sps:$4 sm:$0xff]  }
 0x10a   :  { %v591_v47 = vpop.f32.mrf.mxu0  ;;  %v632_v48 = vpop.f32.mrf.mxu1 }
 0x10b   :  { %v717_v49 = vmax.f32 %v590_v44, 0.0  ;;  %v719_v50 = vmax.f32 %v631_v45, 0.0  ;;  %v4570_v51 = vpack.c.bf16 %v718_v43, %v718_v43  ;;  %v4576_v59 = vpack.c.bf16 %v716_v46, %v716_v46  ;;  %v4129_v43 = vld [vmem:[#allocation5 + $0x708] ss:$20 sps:$4 sm:$0xff]   ;;  %v4132_v45 = vld [vmem:[#allocation5 + $0xf8] ss:$20 sps:$4 sm:$0xff]  }
 0x10c   :  { %v592_v52 = vpop.f32.mrf.mxu0  ;;  %v633_v53 = vpop.f32.mrf.mxu1  ;;  %v4137_v46 = vld [vmem:[#allocation5 + $0x6e4] ss:$20 sps:$4 sm:$0xff]   ;;  %v4140_v47 = vld [vmem:[#allocation5 + $0xd4] ss:$20 sps:$4 sm:$0xff]  }
 0x10d   :  { %v4572_v54 = vpack.c.bf16 %v717_v49, %v717_v49  ;;  %v4574_v56 = vpack.c.bf16 %v719_v50, %v719_v50  ;;  %v4135_v48 = vld [vmem:[#allocation5 + $0x6e0] ss:$20 sps:$4 sm:$0xff]   ;;  %v4138_v49 = vld [vmem:[#allocation5 + $0xd0] ss:$20 sps:$4 sm:$0xff]   ;;  %v4141_v53 = vld [vmem:[#allocation5 + $0x6b8] ss:$20 sps:$4 sm:$0xff]  }
 0x10e   :  { %v4143_v50 = vld [vmem:[#allocation5 + $0x6bc] ss:$20 sps:$4 sm:$0xff]   ;;  %v4146_v52 = vld [vmem:[#allocation5 + $0xac] ss:$20 sps:$4 sm:$0xff]  }
 0x10f   :  { %2393 = vmatprep.mubr.bf16.mxu0 %v4572_v54  ;;  %2434 = vmatprep.mubr.bf16.mxu1 %v4574_v56 }
 0x110   :  { %2394 = vmatmul.mubr.bf16.vlgmr.msra.gmra.mxu0 %v4576_v59  ;;  %2435 = vmatmul.mubr.bf16.vlgmr.msra.gmra.mxu1 %v4570_v51 }
 0x111   :  { %2444 = vmatpush1.bf16.msra.mxu0 %v4090_v57  ;;  %2497 = vmatpush1.bf16.msra.mxu1 %v4114_v58  ;;  %v159_v57 = vsub.s32 4, %v4547_v27  ;;  %v4144_v58 = vld [vmem:[#allocation5 + $0xa8] ss:$20 sps:$4 sm:$0xff]  }
 0x112   :  { %2445 = vmatprep.subr.bf16.mxu0 %v4095_v60  ;;  %2498 = vmatprep.subr.bf16.mxu1 %v4122_v61  ;;  %v4149_v60 = vld [vmem:[#allocation5 + $0x694] ss:$20 sps:$4 sm:$0xff]   ;;  %v4152_v61 = vld [vmem:[#allocation5 + $0x84] ss:$20 sps:$4 sm:$0xff]  }
 0x113   :  { %2516 = vmatprep.mubr.bf16.mxu1 %v4455_v55 }
 0x115   :  { %2446 = vmatpush1.bf16.msra.mxu0 %v4093_v62  ;;  %2499 = vmatpush1.bf16.msra.mxu1 %v4120_v63  ;;  %v4147_v62 = vld [vmem:[#allocation5 + $0x690] ss:$20 sps:$4 sm:$0xff]   ;;  %v160_v63 = vrot.slane %v4554_v30, %v159_v57 }
 0x116   :  { %2447 = vmatprep.subr.bf16.mxu0 %v4098_v0  ;;  %2525 = vmatprep.subr.bf16.mxu1 %v4128_v1  ;;  %v4150_v0 = vld [vmem:[#allocation5 + $0x80] ss:$20 sps:$4 sm:$0xff]   ;;  %v4162_v30 = vld [vmem:[#allocation5 + $0x30] ss:$20 sps:$4 sm:$0xff]  }
 0x117   :  { %v4155_v1 = vld [vmem:[#allocation5 + $0x66c] ss:$20 sps:$4 sm:$0xff]  }
 0x119   :  { %2448 = vmatpush1.bf16.msra.mxu0 %v4096_v2  ;;  %v4158_v2 = vld [vmem:[#allocation5 + $0x5c] ss:$20 sps:$4 sm:$0xff]  }
 0x11a   :  { %2449 = vmatprep.subr.bf16.mxu0 %v4101_v3  ;;  %v4153_v3 = vld [vmem:[#allocation5 + $0x668] ss:$20 sps:$4 sm:$0xff]  }
 0x11d   :  { %2450 = vmatpush1.bf16.msra.mxu0 %v4099_v4 }
 0x11e   :  { %2451 = vmatprep.subr.bf16.mxu0 %v4104_v5  ;;  %v4156_v5 = vld [vmem:[#allocation5 + $0x58] ss:$20 sps:$4 sm:$0xff]  }
 0x121   :  { %2452 = vmatpush1.bf16.msra.mxu0 %v4102_v6  ;;  %v4161_v6 = vld [vmem:[#allocation5 + $0x644] ss:$20 sps:$4 sm:$0xff]  }
 0x122   :  { %2453 = vmatprep.subr.bf16.mxu0 %v4107_v7  ;;  %v4164_v7 = vld [vmem:[#allocation5 + $0x34] ss:$20 sps:$4 sm:$0xff]  }
 0x125   :  { %2454 = vmatpush1.bf16.msra.mxu0 %v4105_v8  ;;  %v4159_v8 = vld [vmem:[#allocation5 + $0x640] ss:$20 sps:$4 sm:$0xff]  }
 0x126   :  { %2455 = vmatprep.subr.bf16.mxu0 %v4110_v9 }
 0x129   :  { %2456 = vmatpush1.bf16.msra.mxu0 %v4108_v10  ;;  %v4167_v10 = vld [vmem:[#allocation5 + $0x3a4] ss:$20 sps:$4 sm:$0xff]  }
 0x12a   :  { %2457 = vmatprep.subr.bf16.mxu0 %v4113_v11  ;;  %v4170_v11 = vld [vmem:[#allocation5 + $0xc] ss:$20 sps:$4 sm:$0xff]  }
 0x12d   :  { %2458 = vmatpush1.bf16.msra.mxu0 %v4111_v13 }
 0x12e   :  { %v710_v19 = vpop.f32.mrf.mxu1  ;;  %2459 = vmatprep.subr.bf16.mxu0 %v4119_v15  ;;  %v669_v21 = vpop.f32.mrf.mxu0  ;;  %v4173_v15 = vld [vmem:[#allocation5 + $0x37c] ss:$20 sps:$4 sm:$0xff]  }
 0x12f   :  { %v711_v22 = vadd.f32 %v710_v19, %v168_v16  ;;  %v670_v4 = vadd.f32 %v669_v21, %v160_v63  ;;  %v4176_v16 = vld [vmem:[#allocation5 + $0x264] ss:$20 sps:$4 sm:$0xff]   ;;  %v4179_v19 = vld [vmem:[#allocation5 + $0x354] ss:$20 sps:$4 sm:$0xff]  }
 0x130   :  { %v712_v23 = vpop.f32.mrf.mxu1  ;;  %v671_v24 = vpop.f32.mrf.mxu0  ;;  %v4177_v21 = vld [vmem:[#allocation5 + $0x350] ss:$20 sps:$4 sm:$0xff]   ;;  %v4219_v63 = vld [vmem:[#allocation5 + $0x4b8] ss:$20 sps:$4 sm:$0xff]  }
 0x131   :  { %v722_v25 = vmax.f32 %v711_v22, 0.0  ;;  %2460 = vmatpush2.bf16.msra.mxu0 %v4117_v17  ;;  %v672_v33 = vadd.f32 %v671_v24, %v164_v18  ;;  %v720_v9 = vmax.f32 %v670_v4, 0.0  ;;  %v4171_v17 = vld [vmem:[#allocation5 + $0x378] ss:$20 sps:$4 sm:$0xff]   ;;  %v4174_v18 = vld [vmem:[#allocation5 + $0x260] ss:$20 sps:$4 sm:$0xff]  }
 0x132   :  { %v713_v34 = vpop.f32.mrf.mxu1  ;;  %2461 = vmatprep.subr.bf16.mxu0 %v4125_v20  ;;  %v673_v36 = vpop.f32.mrf.mxu0  ;;  %v4182_v20 = vld [vmem:[#allocation5 + $0x23c] ss:$20 sps:$4 sm:$0xff]   ;;  %v4180_v22 = vld [vmem:[#allocation5 + $0x238] ss:$20 sps:$4 sm:$0xff]   ;;  %v4188_v24 = vld [vmem:[#allocation5 + $0x214] ss:$20 sps:$4 sm:$0xff]  }
 0x133   :  { %v4587_v37 = vpack.c.bf16 %v722_v25, %v722_v25  ;;  %v721_v40 = vmax.f32 %v672_v33, 0.0  ;;  %v4599_v13 = vpack.c.bf16 %v720_v9, %v720_v9  ;;  %v4185_v23 = vld [vmem:[#allocation5 + $0x32c] ss:$20 sps:$4 sm:$0xff]   ;;  %v4183_v25 = vld [vmem:[#allocation5 + $0x328] ss:$20 sps:$4 sm:$0xff]  }
 0x134   :  { %v714_v41 = vpop.f32.mrf.mxu1  ;;  %v674_v42 = vpop.f32.mrf.mxu0  ;;  %v4191_v33 = vld [vmem:[#allocation5 + $0x304] ss:$20 sps:$4 sm:$0xff]   ;;  %v4194_v34 = vld [vmem:[#allocation5 + $0x1ec] ss:$20 sps:$4 sm:$0xff]   ;;  %v4192_v36 = vld [vmem:[#allocation5 + $0x1e8] ss:$20 sps:$4 sm:$0xff]  }
 0x135   :  { %2462 = vmatpush2.bf16.msra.mxu0 %v4123_v26  ;;  %3690 = vmatmul.mubr.msk.bf16.vlgmr.msra.gmra.mxu1 %vm2357_vm3, %v4587_v37  ;;  %v4591_v44 = vpack.c.bf16 %v721_v40, %v721_v40  ;;  %v4186_v26 = vld [vmem:[#allocation5 + $0x210] ss:$20 sps:$4 sm:$0xff]   ;;  %v4195_v40 = vld [vmem:[#allocation5 + $0x2d8] ss:$20 sps:$4 sm:$0xff]   ;;  %v4198_v41 = vld [vmem:[#allocation5 + $0x1c0] ss:$20 sps:$4 sm:$0xff]  }
 0x136   :  { %2526 = vmatpush1.bf16.msra.mxu1 %v4126_v35  ;;  %2557 = vmatprep.mubr.bf16.mxu1 %v4572_v54  ;;  %v4189_v35 = vld [vmem:[#allocation5 + $0x300] ss:$20 sps:$4 sm:$0xff]   ;;  %v4228_v4 = vld [vmem:[#allocation5 + $0x5f8] ss:$20 sps:$4 sm:$0xff]  }
 0x137   :  { %2463 = vmatprep.subr.bf16.mxu0 %v4131_v38  ;;  %2527 = vmatprep.subr.bf16.mxu1 %v4134_v39  ;;  %v4197_v38 = vld [vmem:[#allocation5 + $0x2dc] ss:$20 sps:$4 sm:$0xff]   ;;  %v4200_v39 = vld [vmem:[#allocation5 + $0x1c4] ss:$20 sps:$4 sm:$0xff]   ;;  %v4203_v42 = vld [vmem:[#allocation5 + $0x2b4] ss:$20 sps:$4 sm:$0xff]  }
 0x138   :  { %2475 = vmatprep.mubr.bf16.mxu0 %v4591_v44  ;;  %v4239_v9 = vld [vmem:[#allocation5 + $0x444] ss:$20 sps:$4 sm:$0xff]  }
 0x139   :  { %2464 = vmatpush2.bf16.msra.mxu0 %v4129_v43  ;;  %v4206_v43 = vld [vmem:[#allocation5 + $0x19c] ss:$20 sps:$4 sm:$0xff]  }
 0x13a   :  { %2528 = vmatpush1.bf16.msra.mxu1 %v4132_v45  ;;  %2465 = vmatprep.subr.bf16.mxu0 %v4137_v46  ;;  %v4201_v45 = vld [vmem:[#allocation5 + $0x2b0] ss:$20 sps:$4 sm:$0xff]   ;;  %v4204_v46 = vld [vmem:[#allocation5 + $0x198] ss:$20 sps:$4 sm:$0xff]  }
 0x13b   :  { %2529 = vmatprep.subr.bf16.mxu1 %v4140_v47  ;;  %v4209_v47 = vld [vmem:[#allocation5 + $0x28c] ss:$20 sps:$4 sm:$0xff]  }
 0x13d   :  { %2466 = vmatpush2.bf16.msra.mxu0 %v4135_v48  ;;  %v4212_v48 = vld [vmem:[#allocation5 + $0x174] ss:$20 sps:$4 sm:$0xff]  }
 0x13e   :  { %2530 = vmatpush1.bf16.msra.mxu1 %v4138_v49  ;;  %2467 = vmatprep.subr.bf16.mxu0 %v4143_v50  ;;  %v4207_v49 = vld [vmem:[#allocation5 + $0x288] ss:$20 sps:$4 sm:$0xff]   ;;  %v4210_v50 = vld [vmem:[#allocation5 + $0x170] ss:$20 sps:$4 sm:$0xff]  }
 0x13f   :  { %2531 = vmatprep.subr.bf16.mxu1 %v4146_v52  ;;  %v4215_v52 = vld [vmem:[#allocation5 + $0x4e4] ss:$20 sps:$4 sm:$0xff]  }
 0x141   :  { %2468 = vmatpush2.bf16.msra.mxu0 %v4141_v53  ;;  %v4218_v53 = vld [vmem:[#allocation5 + $0x14c] ss:$20 sps:$4 sm:$0xff]  }
 0x142   :  { %2532 = vmatpush1.bf16.msra.mxu1 %v4144_v58  ;;  %2469 = vmatprep.subr.bf16.mxu0 %v4149_v60  ;;  %v4213_v58 = vld [vmem:[#allocation5 + $0x4e0] ss:$20 sps:$4 sm:$0xff]   ;;  %v4216_v60 = vld [vmem:[#allocation5 + $0x148] ss:$20 sps:$4 sm:$0xff]  }
 0x143   :  { %2533 = vmatprep.subr.bf16.mxu1 %v4152_v61  ;;  %v4221_v61 = vld [vmem:[#allocation5 + $0x4bc] ss:$20 sps:$4 sm:$0xff]  }
 0x145   :  { %2470 = vmatpush2.bf16.msra.mxu0 %v4147_v62  ;;  %v4224_v62 = vld [vmem:[#allocation5 + $0x624] ss:$20 sps:$4 sm:$0xff]  }
 0x146   :  { %2534 = vmatpush1.bf16.msra.mxu1 %v4150_v0  ;;  %2471 = vmatprep.subr.bf16.mxu0 %v4155_v1  ;;  %v4222_v0 = vld [vmem:[#allocation5 + $0x620] ss:$20 sps:$4 sm:$0xff]  }
 0x147   :  { %2535 = vmatprep.subr.bf16.mxu1 %v4158_v2  ;;  %v4227_v1 = vld [vmem:[#allocation5 + $0x494] ss:$20 sps:$4 sm:$0xff]   ;;  %v4230_v2 = vld [vmem:[#allocation5 + $0x5fc] ss:$20 sps:$4 sm:$0xff]  }
 0x149   :  { %2472 = vmatpush2.bf16.msra.mxu0 %v4153_v3  ;;  %v4225_v3 = vld [vmem:[#allocation5 + $0x490] ss:$20 sps:$4 sm:$0xff]  }
 0x14a   :  { %2536 = vmatpush1.bf16.msra.mxu1 %v4156_v5  ;;  %2473 = vmatprep.subr.bf16.mxu0 %v4161_v6  ;;  %v4233_v5 = vld [vmem:[#allocation5 + $0x46c] ss:$20 sps:$4 sm:$0xff]   ;;  %v4236_v6 = vld [vmem:[#allocation5 + $0x5d4] ss:$20 sps:$4 sm:$0xff]  }
 0x14b   :  { %2537 = vmatprep.subr.bf16.mxu1 %v4164_v7  ;;  %v4231_v7 = vld [vmem:[#allocation5 + $0x468] ss:$20 sps:$4 sm:$0xff]  }
 0x14d   :  { %2474 = vmatpush2.bf16.msra.mxu0 %v4159_v8  ;;  %v4234_v8 = vld [vmem:[#allocation5 + $0x5d0] ss:$20 sps:$4 sm:$0xff]  }
 0x14e   :  { %2538 = vmatpush1.bf16.msra.mxu1 %v4162_v30  ;;  %2566 = vmatprep.subr.bf16.mxu0 %v4167_v10  ;;  %v4242_v30 = vld [vmem:[#allocation5 + $0x5ac] ss:$20 sps:$4 sm:$0xff]  }
 0x14f   :  { %2539 = vmatprep.subr.bf16.mxu1 %v4170_v11  ;;  %v4237_v10 = vld [vmem:[#allocation5 + $0x440] ss:$20 sps:$4 sm:$0xff]   ;;  %v4240_v11 = vld [vmem:[#allocation5 + $0x5a8] ss:$20 sps:$4 sm:$0xff]  }
 0x150   :  { %2476 = vmatmul.mubr.bf16.vlgmr.msra.gmra.mxu0 %v4599_v13 }
 0x151   :  { %2567 = vmatpush1.bf16.msra.mxu0 %v4165_v12  ;;  %2598 = vmatprep.mubr.bf16.mxu0 %v4574_v56  ;;  %v4245_v12 = vld [vmem:[#allocation5 + $0x41c] ss:$20 sps:$4 sm:$0xff]  }
 0x152   :  { %2540 = vmatpush1.bf16.msra.mxu1 %v4168_v14  ;;  %2568 = vmatprep.subr.bf16.mxu0 %v4173_v15  ;;  %v4248_v14 = vld [vmem:[#allocation5 + $0x584] ss:$20 sps:$4 sm:$0xff]  }
 0x153   :  { %2541 = vmatprep.subr.bf16.mxu1 %v4176_v16  ;;  %v4243_v15 = vld [vmem:[#allocation5 + $0x418] ss:$20 sps:$4 sm:$0xff]   ;;  %v4246_v16 = vld [vmem:[#allocation5 + $0x580] ss:$20 sps:$4 sm:$0xff]  }
 0x155   :  { %2569 = vmatpush1.bf16.msra.mxu0 %v4171_v17  ;;  %v4251_v17 = vld [vmem:[#allocation5 + $0x3f4] ss:$20 sps:$4 sm:$0xff]  }
 0x156   :  { %2542 = vmatpush2.bf16.msra.mxu1 %v4174_v18  ;;  %2570 = vmatprep.subr.bf16.mxu0 %v4179_v19  ;;  %v4254_v18 = vld [vmem:[#allocation5 + $0x55c] ss:$20 sps:$4 sm:$0xff]  }
 0x157   :  { %2543 = vmatprep.subr.bf16.mxu1 %v4182_v20  ;;  %v4249_v19 = vld [vmem:[#allocation5 + $0x3f0] ss:$20 sps:$4 sm:$0xff]   ;;  %v4252_v20 = vld [vmem:[#allocation5 + $0x558] ss:$20 sps:$4 sm:$0xff]  }
 0x159   :  { %2571 = vmatpush1.bf16.msra.mxu0 %v4177_v21  ;;  %v4257_v21 = vld [vmem:[#allocation5 + $0x3cc] ss:$20 sps:$4 sm:$0xff]  }
 0x15a   :  { %2544 = vmatpush2.bf16.msra.mxu1 %v4180_v22  ;;  %2572 = vmatprep.subr.bf16.mxu0 %v4185_v23  ;;  %v4260_v22 = vld [vmem:[#allocation5 + $0x534] ss:$20 sps:$4 sm:$0xff]  }
 0x15b   :  { %2545 = vmatprep.subr.bf16.mxu1 %v4188_v24  ;;  %v4255_v23 = vld [vmem:[#allocation5 + $0x3c8] ss:$20 sps:$4 sm:$0xff]   ;;  %v4258_v24 = vld [vmem:[#allocation5 + $0x530] ss:$20 sps:$4 sm:$0xff]  }
 0x15d   :  { %2573 = vmatpush1.bf16.msra.mxu0 %v4183_v25  ;;  %v4263_v25 = vld [vmem:[#allocation5 + $0x7b4] ss:$20 sps:$4 sm:$0xff]  }
 0x15e   :  { %2546 = vmatpush2.bf16.msra.mxu1 %v4186_v26  ;;  %2574 = vmatprep.subr.bf16.mxu0 %v4191_v33  ;;  %v4266_v26 = vld [vmem:[#allocation5 + $0x50c] ss:$20 sps:$4 sm:$0xff]   ;;  %v4261_v33 = vld [vmem:[#allocation5 + $0x7b0] ss:$20 sps:$4 sm:$0xff]  }
 0x15f   :  { %2547 = vmatprep.subr.bf16.mxu1 %v4194_v34  ;;  %v4264_v34 = vld [vmem:[#allocation5 + $0x508] ss:$20 sps:$4 sm:$0xff]  }
 0x161   :  { %2575 = vmatpush1.bf16.msra.mxu0 %v4189_v35  ;;  %v4269_v35 = vld [vmem:[#allocation5 + $0x78c] ss:$20 sps:$4 sm:$0xff]  }
 0x162   :  { %2548 = vmatpush2.bf16.msra.mxu1 %v4192_v36  ;;  %2576 = vmatprep.subr.bf16.mxu0 %v4197_v38  ;;  %v4272_v36 = vld [vmem:[#allocation5 + $0x764] ss:$20 sps:$4 sm:$0xff]   ;;  %v4267_v38 = vld [vmem:[#allocation5 + $0x788] ss:$20 sps:$4 sm:$0xff]  }
 0x163   :  { %2549 = vmatprep.subr.bf16.mxu1 %v4200_v39  ;;  %v4270_v39 = vld [vmem:[#allocation5 + $0x760] ss:$20 sps:$4 sm:$0xff]  }
 0x165   :  { %2577 = vmatpush1.bf16.msra.mxu0 %v4195_v40  ;;  %v4273_v40 = vld [vmem:[#allocation5 + $0x268] ss:$20 sps:$4 sm:$0xff]  }
 0x166   :  { %2550 = vmatpush2.bf16.msra.mxu1 %v4198_v41  ;;  %2578 = vmatprep.subr.bf16.mxu0 %v4203_v42  ;;  %v4276_v41 = vld [vmem:[#allocation5 + $0x73c] ss:$20 sps:$4 sm:$0xff]  }
 0x167   :  { %2551 = vmatprep.subr.bf16.mxu1 %v4206_v43  ;;  %v4277_v42 = vld [vmem:[#allocation5 + $0x128] ss:$20 sps:$4 sm:$0xff]   ;;  %v4274_v43 = vld [vmem:[#allocation5 + $0x738] ss:$20 sps:$4 sm:$0xff]  }
 0x169   :  { %2579 = vmatpush1.bf16.msra.mxu0 %v4201_v45  ;;  %v4278_v45 = vld [vmem:[#allocation5 + $0x240] ss:$20 sps:$4 sm:$0xff]  }
 0x16a   :  { %2552 = vmatpush2.bf16.msra.mxu1 %v4204_v46  ;;  %2580 = vmatprep.subr.bf16.mxu0 %v4209_v47  ;;  %v4281_v46 = vld [vmem:[#allocation5 + $0x714] ss:$20 sps:$4 sm:$0xff]   ;;  %v4279_v47 = vld [vmem:[#allocation5 + $0x710] ss:$20 sps:$4 sm:$0xff]  }
 0x16b   :  { %2553 = vmatprep.subr.bf16.mxu1 %v4212_v48  ;;  %v4283_v48 = vld [vmem:[#allocation5 + $0x218] ss:$20 sps:$4 sm:$0xff]  }
 0x16d   :  { %2581 = vmatpush1.bf16.msra.mxu0 %v4207_v49  ;;  %v4286_v49 = vld [vmem:[#allocation5 + $0x6ec] ss:$20 sps:$4 sm:$0xff]  }
 0x16e   :  { %2554 = vmatpush2.bf16.msra.mxu1 %v4210_v50  ;;  %2582 = vmatprep.subr.bf16.mxu0 %v4215_v52  ;;  %v4287_v50 = vld [vmem:[#allocation5 + $0xd8] ss:$20 sps:$4 sm:$0xff]   ;;  %v4284_v52 = vld [vmem:[#allocation5 + $0x6e8] ss:$20 sps:$4 sm:$0xff]  }
 0x16f   :  { %2555 = vmatprep.subr.bf16.mxu1 %v4218_v53  ;;  %v4288_v53 = vld [vmem:[#allocation5 + $0x1f0] ss:$20 sps:$4 sm:$0xff]  }
 0x171   :  { %2583 = vmatpush2.bf16.msra.mxu0 %v4213_v58  ;;  %v4291_v58 = vld [vmem:[#allocation5 + $0x6c4] ss:$20 sps:$4 sm:$0xff]  }
 0x172   :  { %2556 = vmatpush2.bf16.msra.mxu1 %v4216_v60  ;;  %2584 = vmatprep.subr.bf16.mxu0 %v4221_v61  ;;  %v4292_v60 = vld [vmem:[#allocation5 + $0xb0] ss:$20 sps:$4 sm:$0xff]   ;;  %v4293_v61 = vld [vmem:[#allocation5 + $0x1c8] ss:$20 sps:$4 sm:$0xff]  }
 0x173   :  { %2607 = vmatprep.subr.bf16.mxu1 %v4224_v62  ;;  %v4296_v62 = vld [vmem:[#allocation5 + $0x69c] ss:$20 sps:$4 sm:$0xff]  }
 0x175   :  { %2558 = vmatmul.mubr.bf16.vlgmr.msra.gmra.mxu1 %v4576_v59  ;;  %2585 = vmatpush2.bf16.msra.mxu0 %v4219_v63  ;;  %v4297_v63 = vld [vmem:[#allocation5 + $0x88] ss:$20 sps:$4 sm:$0xff]  }
 0x176   :  { %2608 = vmatpush1.bf16.msra.mxu1 %v4222_v0  ;;  %2639 = vmatprep.mubr.bf16.mxu1 %v4591_v44  ;;  %v4294_v0 = vld [vmem:[#allocation5 + $0x698] ss:$20 sps:$4 sm:$0xff]  }
 0x177   :  { %2586 = vmatprep.subr.bf16.mxu0 %v4227_v1  ;;  %2609 = vmatprep.subr.bf16.mxu1 %v4230_v2  ;;  %v4298_v1 = vld [vmem:[#allocation5 + $0x1a0] ss:$20 sps:$4 sm:$0xff]  }
 0x178   :  { %v4301_v2 = vld [vmem:[#allocation5 + $0x674] ss:$20 sps:$4 sm:$0xff]  }
 0x179   :  { %2587 = vmatpush2.bf16.msra.mxu0 %v4225_v3  ;;  %v4302_v3 = vld [vmem:[#allocation5 + $0x60] ss:$20 sps:$4 sm:$0xff]  }
 0x17a   :  { %2610 = vmatpush1.bf16.msra.mxu1 %v4228_v4  ;;  %2588 = vmatprep.subr.bf16.mxu0 %v4233_v5  ;;  %v4299_v4 = vld [vmem:[#allocation5 + $0x670] ss:$20 sps:$4 sm:$0xff]   ;;  %v4303_v5 = vld [vmem:[#allocation5 + $0x178] ss:$20 sps:$4 sm:$0xff]  }
 0x17b   :  { %2611 = vmatprep.subr.bf16.mxu1 %v4236_v6  ;;  %v4306_v6 = vld [vmem:[#allocation5 + $0x64c] ss:$20 sps:$4 sm:$0xff]  }
 0x17d   :  { %2589 = vmatpush2.bf16.msra.mxu0 %v4231_v7  ;;  %v4307_v7 = vld [vmem:[#allocation5 + $0x38] ss:$20 sps:$4 sm:$0xff]  }
 0x17e   :  { %2612 = vmatpush1.bf16.msra.mxu1 %v4234_v8  ;;  %2590 = vmatprep.subr.bf16.mxu0 %v4239_v9  ;;  %v4304_v8 = vld [vmem:[#allocation5 + $0x648] ss:$20 sps:$4 sm:$0xff]   ;;  %v4308_v9 = vld [vmem:[#allocation5 + $0x150] ss:$20 sps:$4 sm:$0xff]  }
 0x17f   :  { %2613 = vmatprep.subr.bf16.mxu1 %v4242_v30  ;;  %v4310_v30 = vld [vmem:[#allocation5 + $0x4e8] ss:$20 sps:$4 sm:$0xff]  }
 0x181   :  { %2591 = vmatpush2.bf16.msra.mxu0 %v4237_v10  ;;  %v4309_v10 = vld [vmem:[#allocation5 + $0x10] ss:$20 sps:$4 sm:$0xff]  }
 0x182   :  { %2614 = vmatpush1.bf16.msra.mxu1 %v4240_v11  ;;  %2592 = vmatprep.subr.bf16.mxu0 %v4245_v12  ;;  %v4311_v11 = vld [vmem:[#allocation5 + $0x3a8] ss:$20 sps:$4 sm:$0xff]  }
 0x183   :  { %2615 = vmatprep.subr.bf16.mxu1 %v4248_v14  ;;  %v4312_v12 = vld [vmem:[#allocation5 + $0x768] ss:$20 sps:$4 sm:$0xff]   ;;  %v4313_v14 = vld [vmem:[#allocation5 + $0x4c0] ss:$20 sps:$4 sm:$0xff]  }
 0x185   :  { %2593 = vmatpush2.bf16.msra.mxu0 %v4243_v15  ;;  %v4314_v15 = vld [vmem:[#allocation5 + $0x628] ss:$20 sps:$4 sm:$0xff]  }
 0x186   :  { %2616 = vmatpush1.bf16.msra.mxu1 %v4246_v16  ;;  %2594 = vmatprep.subr.bf16.mxu0 %v4251_v17  ;;  %v4315_v16 = vld [vmem:[#allocation5 + $0x380] ss:$20 sps:$4 sm:$0xff]  }
 0x187   :  { %2617 = vmatprep.subr.bf16.mxu1 %v4254_v18  ;;  %v4316_v17 = vld [vmem:[#allocation5 + $0x740] ss:$20 sps:$4 sm:$0xff]   ;;  %v4317_v18 = vld [vmem:[#allocation5 + $0x498] ss:$20 sps:$4 sm:$0xff]  }
 0x189   :  { %2595 = vmatpush2.bf16.msra.mxu0 %v4249_v19  ;;  %v4318_v19 = vld [vmem:[#allocation5 + $0x600] ss:$20 sps:$4 sm:$0xff]  }
 0x18a   :  { %2618 = vmatpush1.bf16.msra.mxu1 %v4252_v20  ;;  %2596 = vmatprep.subr.bf16.mxu0 %v4257_v21  ;;  %v4319_v20 = vld [vmem:[#allocation5 + $0x358] ss:$20 sps:$4 sm:$0xff]  }
 0x18b   :  { %2619 = vmatprep.subr.bf16.mxu1 %v4260_v22  ;;  %v4320_v21 = vld [vmem:[#allocation5 + $0x718] ss:$20 sps:$4 sm:$0xff]   ;;  %v4321_v22 = vld [vmem:[#allocation5 + $0x470] ss:$20 sps:$4 sm:$0xff]  }
 0x18d   :  { %2597 = vmatpush2.bf16.msra.mxu0 %v4255_v23  ;;  %v4322_v23 = vld [vmem:[#allocation5 + $0x5d8] ss:$20 sps:$4 sm:$0xff]  }
 0x18e   :  { %2620 = vmatpush1.bf16.msra.mxu1 %v4258_v24  ;;  %2660 = vmatprep.subr.bf16.mxu0 %v4263_v25  ;;  %v4324_v24 = vld [vmem:[#allocation5 + $0x6f0] ss:$20 sps:$4 sm:$0xff]   ;;  %v4325_v25 = vld [vmem:[#allocation5 + $0x448] ss:$20 sps:$4 sm:$0xff]  }
 0x18f   :  { %2621 = vmatprep.subr.bf16.mxu1 %v4266_v26  ;;  %v4328_v26 = vld [vmem:[#allocation5 + $0x6c8] ss:$20 sps:$4 sm:$0xff]  }
 0x190   :  { %2599 = vmatmul.mubr.bf16.vlgmr.msra.gmra.mxu0 %v4570_v51 }
 0x191   :  { %2661 = vmatpush1.bf16.msra.mxu0 %v4261_v33  ;;  %2680 = vmatprep.mubr.bf16.mxu0 %v4455_v55  ;;  %v4282_v55 = vld [vmem:[#allocation5 + $0x100] ss:$20 sps:$4 sm:$0xff]  }
 0x192   :  { %2622 = vmatpush1.bf16.msra.mxu1 %v4264_v34  ;;  %2662 = vmatprep.subr.bf16.mxu0 %v4269_v35  ;;  %v4329_v33 = vld [vmem:[#allocation5 + $0x420] ss:$20 sps:$4 sm:$0xff]   ;;  %v4330_v34 = vld [vmem:[#allocation5 + $0x588] ss:$20 sps:$4 sm:$0xff]  }
 0x193   :  { %2623 = vmatprep.subr.bf16.mxu1 %v4272_v36  ;;  %v4331_v35 = vld [vmem:[#allocation5 + $0x2e0] ss:$20 sps:$4 sm:$0xff]  }
 0x194   :  { %v4332_v36 = vld [vmem:[#allocation5 + $0x6a0] ss:$20 sps:$4 sm:$0xff]  }
 0x195   :  { %2663 = vmatpush1.bf16.msra.mxu0 %v4267_v38  ;;  %v4333_v38 = vld [vmem:[#allocation5 + $0x3f8] ss:$20 sps:$4 sm:$0xff]  }
 0x196   :  { %2624 = vmatpush2.bf16.msra.mxu1 %v4270_v39  ;;  %3735 = vmatprep.subr.bf16.mxu0 %v4273_v40  ;;  %v4334_v39 = vld [vmem:[#allocation5 + $0x560] ss:$20 sps:$4 sm:$0xff]   ;;  %v4335_v40 = vld [vmem:[#allocation5 + $0x2b8] ss:$20 sps:$4 sm:$0xff]  }
 0x197   :  { %2625 = vmatprep.subr.bf16.mxu1 %v4276_v41  ;;  %v4336_v41 = vld [vmem:[#allocation5 + $0x678] ss:$20 sps:$4 sm:$0xff]  }
 0x198   :  { %3691 = vmatmul.mubr.msk.bf16.vlgmr.msra.gmra.mxu0 %vm2357_vm3, %v4587_v37 }
 0x199   :  { %3736 = vmatpush3.bf16.msra.mxu0 %v4277_v42  ;;  %2721 = vmatprep.mubr.bf16.mxu0 %v4572_v54  ;;  %v4289_v54 = vld [vmem:[#allocation5 + $0x6c0] ss:$20 sps:$4 sm:$0xff]   ;;  %v4337_v42 = vld [vmem:[#allocation5 + $0x3d0] ss:$20 sps:$4 sm:$0xff]  }
 0x19a   :  { %2626 = vmatpush2.bf16.msra.mxu1 %v4274_v43  ;;  %3737 = vmatprep.subr.bf16.mxu0 %v4278_v45  ;;  %v4338_v43 = vld [vmem:[#allocation5 + $0x538] ss:$20 sps:$4 sm:$0xff]   ;;  %v4339_v45 = vld [vmem:[#allocation5 + $0x290] ss:$20 sps:$4 sm:$0xff]  }
 0x19b   :  { %2627 = vmatprep.subr.bf16.mxu1 %v4281_v46  ;;  %v4340_v46 = vld [vmem:[#allocation5 + $0x650] ss:$20 sps:$4 sm:$0xff]  }
 0x19d   :  { %3738 = vmatpush3.bf16.msra.mxu0 %v4282_v55 }
 0x19e   :  { %2628 = vmatpush2.bf16.msra.mxu1 %v4279_v47  ;;  %3739 = vmatprep.subr.bf16.mxu0 %v4283_v48  ;;  %v4341_v48 = vld [vmem:[#allocation5 + $0x510] ss:$20 sps:$4 sm:$0xff]  }
 0x19f   :  { %2629 = vmatprep.subr.bf16.mxu1 %v4286_v49 }
 0x1a1   :  { %3740 = vmatpush3.bf16.msra.mxu0 %v4287_v50 }
 0x1a2   :  { %2630 = vmatpush2.bf16.msra.mxu1 %v4284_v52  ;;  %3741 = vmatprep.subr.bf16.mxu0 %v4288_v53  ;;  %v4342_v52 = vld [vmem:[#allocation5 + $0x7b8] ss:$20 sps:$4 sm:$0xff]   ;;  %v4456_v53 = vmov 0.0  }
 0x1a3   :  { %2631 = vmatprep.subr.bf16.mxu1 %v4291_v58 }
 0x1a5   :  { %3742 = vmatpush3.bf16.msra.mxu0 %v4292_v60 }
 0x1a6   :  { %2632 = vmatpush2.bf16.msra.mxu1 %v4289_v54  ;;  %3743 = vmatprep.subr.bf16.mxu0 %v4293_v61 }
 0x1a7   :  { %2633 = vmatprep.subr.bf16.mxu1 %v4296_v62  ;;  %v4343_v62 = vld [vmem:[#allocation5 + $0x790] ss:$20 sps:$4 sm:$0xff]  }
 0x1a9   :  { %3744 = vmatpush3.bf16.msra.mxu0 %v4297_v63  ;;  %v4344_v63 = vld [vmem:[%s4793_s5 + $0x78] sm:$0xff]  }
 0x1aa   :  { %2634 = vmatpush2.bf16.msra.mxu1 %v4294_v0  ;;  %3745 = vmatprep.subr.bf16.mxu0 %v4298_v1  ;;  %v4346_v0 = vld [vmem:[%s4793_s5 + $0x70] sm:$0xff]  }
 0x1ab   :  { %2635 = vmatprep.subr.bf16.mxu1 %v4301_v2  ;;  %v4347_v1 = vld [vmem:[%s4793_s5 + $0x30] sm:$0xff]   ;;  %v4361_v2 = vld [vmem:[%s4793_s5 + $0xb8] sm:$0xff]  }
 0x1ad   :  { %3746 = vmatpush3.bf16.msra.mxu0 %v4302_v3  ;;  %v4362_v3 = vld [vmem:[%s4793_s5 + $0xf0] sm:$0xff]  }
 0x1ae   :  { %2636 = vmatpush2.bf16.msra.mxu1 %v4299_v4  ;;  %3747 = vmatprep.subr.bf16.mxu0 %v4303_v5  ;;  %v4363_v4 = vld [vmem:[%s4793_s5 + $0xb0] sm:$0xff]   ;;  %v4349_v5 = vld [vmem:[%s4793_s5 + $0x28] sm:$0xff]  }
 0x1af   :  { %2637 = vmatprep.subr.bf16.mxu1 %v4306_v6  ;;  %v4364_v6 = vld [vmem:[%s4793_s5 + $0xe8] sm:$0xff]  }
 0x1b1   :  { %3748 = vmatpush3.bf16.msra.mxu0 %v4307_v7  ;;  %v4350_v7 = vld [vmem:[%s4793_s5 + $0x60] sm:$0xff]  }
 0x1b2   :  { %2638 = vmatpush2.bf16.msra.mxu1 %v4304_v8  ;;  %3749 = vmatprep.subr.bf16.mxu0 %v4308_v9  ;;  %v4365_v8 = vld [vmem:[%s4793_s5 + $0xa8] sm:$0xff]   ;;  %v4351_v9 = vld [vmem:[%s4793_s5 + $0x20] sm:$0xff]  }
 0x1b3   :  { %3757 = vmatprep.subr.bf16.mxu1 %v4310_v30  ;;  %v4366_v30 = vld [vmem:[%s4793_s5 + $0xe0] sm:$0xff]  }
 0x1b5   :  { %2640 = vmatmul.mubr.bf16.vlgmr.msra.gmra.mxu1 %v4599_v13  ;;  %3750 = vmatpush3.bf16.msra.mxu0 %v4309_v10  ;;  %v4352_v10 = vld [vmem:[%s4793_s5 + $0x58] sm:$0xff]  }
 0x1b6   :  { %3758 = vmatpush3.bf16.msra.mxu1 %v4311_v11  ;;  %2761 = vmatprep.mubr.bf16.mxu1 %v4574_v56  ;;  %v4323_v56 = vld [vmem:[#allocation5 + $0x330] ss:$20 sps:$4 sm:$0xff]  }
 0x1b7   :  { %3779 = vmatprep.subr.bf16.mxu0 %v4312_v12  ;;  %3759 = vmatprep.subr.bf16.mxu1 %v4313_v14  ;;  %v4367_v11 = vld [vmem:[%s4793_s5 + $0xa0] sm:$0xff]   ;;  %v4353_v12 = vld [vmem:[%s4793_s5 + $0x18] sm:$0xff]  }
 0x1b8   :  { %2722 = vmatmul.mubr.bf16.vlgmr.msra.gmra.mxu0 %v4576_v59  ;;  %v4326_v59 = vld [vmem:[#allocation5 + $0x5b0] ss:$20 sps:$4 sm:$0xff]  }
 0x1b9   :  { %3780 = vmatpush3.bf16.msra.mxu0 %v4314_v15  ;;  %2801 = vmatprep.mubr.bf16.mxu0 %v4591_v44  ;;  %v4327_v44 = vld [vmem:[#allocation5 + $0x308] ss:$20 sps:$4 sm:$0xff]  }
 0x1ba   :  { %3760 = vmatpush3.bf16.msra.mxu1 %v4315_v16  ;;  %3781 = vmatprep.subr.bf16.mxu0 %v4316_v17  ;;  %v4368_v14 = vld [vmem:[%s4793_s5 + $0xd8] sm:$0xff]   ;;  %v4354_v15 = vld [vmem:[%s4793_s5 + $0x50] sm:$0xff]  }
 0x1bb   :  { %3761 = vmatprep.subr.bf16.mxu1 %v4317_v18  ;;  %v4369_v16 = vld [vmem:[%s4793_s5 + $0x98] sm:$0xff]   ;;  %v4355_v17 = vld [vmem:[%s4793_s5 + $0x10] sm:$0xff]   ;;  %v4356_v18 = vld [vmem:[%s4793_s5 + $0x48] sm:$0xff]  }
 0x1bd   :  { %3782 = vmatpush3.bf16.msra.mxu0 %v4318_v19  ;;  %v4357_v19 = vld [vmem:[%s4793_s5 + $0x8] sm:$0xff]  }
 0x1be   :  { %3762 = vmatpush3.bf16.msra.mxu1 %v4319_v20  ;;  %3783 = vmatprep.subr.bf16.mxu0 %v4320_v21  ;;  %v4358_v20 = vld [vmem:[%s4793_s5 + $0x40] sm:$0xff]   ;;  %v4370_v21 = vld [vmem:[%s4793_s5 + $0xd0] sm:$0xff]  }
 0x1bf   :  { %3763 = vmatprep.subr.bf16.mxu1 %v4321_v22  ;;  %v4371_v22 = vld [vmem:[%s4793_s5 + $0x90] sm:$0xff]  }
 0x1c1   :  { %3784 = vmatpush3.bf16.msra.mxu0 %v4322_v23 }
 0x1c2   :  { %3764 = vmatpush3.bf16.msra.mxu1 %v4323_v56  ;;  %3785 = vmatprep.subr.bf16.mxu0 %v4324_v24  ;;  %v4359_v56 = vld [vmem:[%s4793_s5] sm:$0xff]  }
 0x1c3   :  { %3765 = vmatprep.subr.bf16.mxu1 %v4325_v25  ;;  %v4372_v25 = vld [vmem:[%s4793_s5 + $0xc8] sm:$0xff]  }
 0x1c5   :  { %3786 = vmatpush3.bf16.msra.mxu0 %v4326_v59  ;;  %v4373_v59 = vld [vmem:[%s4793_s5 + $0x88] sm:$0xff]  }
 0x1c6   :  { %3766 = vmatpush3.bf16.msra.mxu1 %v4327_v44  ;;  %3787 = vmatprep.subr.bf16.mxu0 %v4328_v26 }
 0x1c7   :  { %3767 = vmatprep.subr.bf16.mxu1 %v4329_v33  ;;  %v4374_v33 = vld [vmem:[%s4793_s5 + $0xc0] sm:$0xff]  }
 0x1c9   :  { %3788 = vmatpush3.bf16.msra.mxu0 %v4330_v34  ;;  %v4375_v34 = vld [vmem:[%s4793_s5 + $0x80] sm:$0xff]  }
 0x1ca   :  { %3768 = vmatpush3.bf16.msra.mxu1 %v4331_v35  ;;  %3789 = vmatprep.subr.bf16.mxu0 %v4332_v36  ;;  %v4730_v35 = vld [vmem:[%s4792_s4] sm:$0x1f] }
 0x1cb   :  { %3769 = vmatprep.subr.bf16.mxu1 %v4333_v38  ;;  %v1035_v36 = vrot.slane %v4730_v35, %v143_v28  ;;  %v1039_v38 = vrot.slane %v4730_v35, %v147_v31  ;;  %v4376_v31 = vld [vmem:[%s4793_s5 + $0x118] sm:$0xff]  }
 0x1cd   :  { %3790 = vmatpush3.bf16.msra.mxu0 %v4334_v39 }
 0x1ce   :  { %3770 = vmatpush3.bf16.msra.mxu1 %v4335_v40  ;;  %3791 = vmatprep.subr.bf16.mxu0 %v4336_v41 }
 0x1cf   :  { %3771 = vmatprep.subr.bf16.mxu1 %v4337_v42 }
 0x1d0   :  { %v4614_v55 = vpop.f32.mrf.mxu0  ;;  %v4616_v47 = vpop.f32.mrf.mxu1 }
 0x1d1   :  { %3792 = vmatpush3.bf16.msra.mxu0 %v4338_v43  ;;  %v2396_v39 = vadd.f32 %v4614_v55, %v1035_v36 }
 0x1d2   :  { %3772 = vmatpush3.bf16.msra.mxu1 %v4339_v45  ;;  %v4618_v49 = vpop.f32.mrf.mxu0  ;;  %v4620_v50 = vpop.f32.mrf.mxu1  ;;  %3793 = vmatprep.subr.bf16.mxu0 %v4340_v46 }
 0x1d3   :  { %3856 = vmatprep.subr.bf16.mxu1 %v4456_v53  ;;  %v2398_v40 = vadd.f32 %v4618_v49, %v1039_v38  ;;  %v2437_v41 = vadd.f32 %v4616_v47, %v2396_v39  ;;  %v4377_v47 = vld [vmem:[%s4793_s5 + $0x110] sm:$0xff]   ;;  %v4378_v49 = vld [vmem:[%s4793_s5 + $0x108] sm:$0xff]  }
 0x1d4   :  { %v2399_v58 = vpop.f32.mrf.mxu0  ;;  %v2440_v60 = vpop.f32.mrf.mxu1 }
 0x1d5   :  { %2762 = vmatmul.mubr.bf16.vlgmr.msra.gmra.mxu1 %v4570_v51  ;;  %3794 = vmatpush3.bf16.msra.mxu0 %v4341_v48  ;;  %v4345_v51 = vld [vmem:[%s4793_s5 + $0x38] sm:$0xff]   ;;  %v2439_v43 = vadd.f32 %v4620_v50, %v2398_v40  ;;  %v4379_v50 = vld [vmem:[%s4793_s5 + $0x100] sm:$0xff]  }
 0x1d6   :  { %3857 = vmatpush3.bf16.msra.mxu1 %v4342_v52  ;;  %v2400_v54 = vpop.f32.mrf.mxu0  ;;  %v2441_v61 = vpop.f32.mrf.mxu1  ;;  %3860 = vmatprep.mubr.msk.bf16.mxu1 %vm4457_vm4, %v4456_v53 }
 0x1d7   :  { %3858 = vmatprep.subr.bf16.mxu1 %v4456_v53 }
 0x1d8   :  { %2802 = vmatmul.mubr.bf16.vlgmr.msra.gmra.mxu0 %v4599_v13  ;;  %v4360_v13 = vld [vmem:[%s4793_s5 + $0xf8] sm:$0xff]  }
 0x1d9   :  { %3826 = vmatprep.subr.bf16.mxu0 %v4360_v13 }
 0x1da   :  { %3859 = vmatpush3.bf16.msra.mxu1 %v4343_v62  ;;  %3827 = vmatpush3.bf16.msra.mxu0 %v4361_v2 }
 0x1db   :  { %3804 = vmatprep.subr.bf16.mxu1 %v4344_v63  ;;  %3828 = vmatprep.subr.bf16.mxu0 %v4362_v3 }
 0x1dd   :  { %3861 = vmatmul.mubr.msk.bf16.vlgmr.msra.gmra.mxu1 %vm2357_vm3, %v4587_v37  ;;  %v4348_v37 = vld [vmem:[%s4793_s5 + $0x68] sm:$0xff]  }
 0x1de   :  { %3805 = vmatpush3.bf16.msra.mxu1 %v4345_v51  ;;  %3829 = vmatpush3.bf16.msra.mxu0 %v4363_v4 }
 0x1df   :  { %3806 = vmatprep.subr.bf16.mxu1 %v4346_v0  ;;  %3830 = vmatprep.subr.bf16.mxu0 %v4364_v6 }
 0x1e2   :  { %3807 = vmatpush3.bf16.msra.mxu1 %v4347_v1  ;;  %3831 = vmatpush3.bf16.msra.mxu0 %v4365_v8  ;;  %v1043_v8 = vrot.slane %v4730_v35, %v151_v29 }
 0x1e3   :  { %3808 = vmatprep.subr.bf16.mxu1 %v4348_v37  ;;  %3832 = vmatprep.subr.bf16.mxu0 %v4366_v30 }
 0x1e6   :  { %3809 = vmatpush3.bf16.msra.mxu1 %v4349_v5  ;;  %3833 = vmatpush3.bf16.msra.mxu0 %v4367_v11 }
 0x1e7   :  { %3810 = vmatprep.subr.bf16.mxu1 %v4350_v7  ;;  %3834 = vmatprep.subr.bf16.mxu0 %v4368_v14 }
 0x1ea   :  { %3811 = vmatpush3.bf16.msra.mxu1 %v4351_v9  ;;  %3835 = vmatpush3.bf16.msra.mxu0 %v4369_v16  ;;  %v1047_v9 = vrot.slane %v4730_v35, %v155_v32 }
 0x1eb   :  { %3812 = vmatprep.subr.bf16.mxu1 %v4352_v10  ;;  %3836 = vmatprep.subr.bf16.mxu0 %v4370_v21 }
 0x1ee   :  { %3813 = vmatpush3.bf16.msra.mxu1 %v4353_v12  ;;  %3837 = vmatpush3.bf16.msra.mxu0 %v4371_v22 }
 0x1ef   :  { %3814 = vmatprep.subr.bf16.mxu1 %v4354_v15  ;;  %3838 = vmatprep.subr.bf16.mxu0 %v4372_v25 }
 0x1f2   :  { %3815 = vmatpush3.bf16.msra.mxu1 %v4355_v17  ;;  %3839 = vmatpush3.bf16.msra.mxu0 %v4373_v59 }
 0x1f3   :  { %3816 = vmatprep.subr.bf16.mxu1 %v4356_v18  ;;  %3840 = vmatprep.subr.bf16.mxu0 %v4374_v33 }
 0x1f5   :  { %v2518_v23 = vpop.f32.mrf.mxu1 }
 0x1f6   :  { %3817 = vmatpush3.bf16.msra.mxu1 %v4357_v19  ;;  %3841 = vmatpush3.bf16.msra.mxu0 %v4375_v34 }
 0x1f7   :  { %v2520_v24 = vpop.f32.mrf.mxu1  ;;  %3818 = vmatprep.subr.bf16.mxu1 %v4358_v20 }
 0x1f9   :  { %v2522_v44 = vpop.f32.mrf.mxu1 }
 0x1fa   :  { %3819 = vmatpush3.bf16.msra.mxu1 %v4359_v56  ;;  %v1051_v44 = vrot.slane %v4730_v35, %v159_v57 }
 0x1fb   :  { %v2523_v26 = vpop.f32.mrf.mxu1  ;;  %3864 = vmatprep.subr.bf16.mxu1 %v4456_v53 }
 0x210   :  { %v2477_v42 = vpop.f32.mrf.mxu0 }
 0x211   :  { %v2478_v45 = vadd.f32 %v2477_v42, %v2437_v41 }
 0x212   :  { %v2479_v46 = vpop.f32.mrf.mxu0 }
 0x213   :  { %v2519_v48 = vadd.f32 %v2518_v23, %v2478_v45  ;;  %v2480_v52 = vadd.f32 %v2479_v46, %v2439_v43 }
 0x214   :  { %v2481_v58 = vpop.f32.mrf.mxu0 }
 0x215   :  { %v2521_v60 = vadd.f32 %v2520_v24, %v2480_v52  ;;  %v2849_v28 = vmax.f32 %v2519_v48, 0.0 }
 0x216   :  { %v2482_v54 = vpop.f32.mrf.mxu0 }
 0x217   :  { %v2850_v61 = vmax.f32 %v2521_v60, 0.0  ;;  %v2854_v55 = vpack.c.bf16 %v2849_v28, %v2849_v28 }
 0x219   :  { %v2855_v62 = vpack.c.bf16 %v2850_v61, %v2850_v61  ;;  %v4380_v61 = vld [vmem:[%s4795_s7 + $0x8] sm:$0xff]  }
 0x21b   :  { %3190 = vmatprep.mubr.bf16.mxu1 %v2855_v62 }
 0x21c   :  { %3191 = vmatmul.mubr.bf16.vlgmr.msra.gmra.mxu1 %v2854_v55 }
 0x21d   :  { %3865 = vmatpush3.bf16.msra.mxu1 %v4376_v31  ;;  %3872 = vmatprep.mubr.msk.bf16.mxu1 %vm4457_vm4, %v4456_v53 }
 0x21e   :  { %3866 = vmatprep.subr.bf16.mxu1 %v4456_v53 }
 0x221   :  { %3867 = vmatpush3.bf16.msra.mxu1 %v4377_v47 }
 0x222   :  { %3868 = vmatprep.subr.bf16.mxu1 %v4456_v53 }
 0x225   :  { %3869 = vmatpush3.bf16.msra.mxu1 %v4378_v49 }
 0x226   :  { %3870 = vmatprep.subr.bf16.mxu1 %v4456_v53 }
 0x229   :  { %3871 = vmatpush3.bf16.msra.mxu1 %v4379_v50  ;;  %v4381_v50 = vld [vmem:[%s4795_s7] sm:$0xff]  }
 0x22a   :  { %3876 = vmatprep.subr.bf16.mxu1 %v4456_v53 }
 0x235   :  { %v2559_v63 = vpop.f32.mrf.mxu1 }
 0x236   :  { %v2560_v30 = vadd.f32 %v2559_v63, %v1043_v8 }
 0x237   :  { %v2561_v51 = vpop.f32.mrf.mxu1 }
 0x238   :  { %v2562_v10 = vadd.f32 %v2561_v51, %v1047_v9 }
 0x239   :  { %v2563_v0 = vpop.f32.mrf.mxu1 }
 0x23b   :  { %v2564_v1 = vpop.f32.mrf.mxu1 }
 0x250   :  { %v2600_v13 = vpop.f32.mrf.mxu0 }
 0x251   :  { %v2601_v11 = vadd.f32 %v2600_v13, %v2560_v30  ;;  %v3693_v13 = vld [vmem:[%s4794_s6] ss:$0 sm:$0xff]  ;;  %s4422_s6 = scalar_lea.vmem %s3355_s28, 64 }
 0x252   :  { %v2602_v2 = vpop.f32.mrf.mxu0  ;;  %v3731_v30 = vld [vmem:[%s4796_s8] ss:$0 sm:$0xff]  ;;  %p4423_p10 = scmp.ne.s32.totalorder %s3355_s28, %s4422_s6  ;;  %p4428_p12 = scmp.lt.s32.totalorder %s4422_s6, %s4422_s6 }
 0x253   :  { %v2603_v14 = vadd.f32 %v2602_v2, %v2562_v10 }
 0x254   :  { %v2604_v3 = vpop.f32.mrf.mxu0  ;;  %p4429_p13 = por %p4428_p12, %p4427_p11 }
 0x256   :  { %v2605_v37 = vpop.f32.mrf.mxu0  ;;  %p4430_p0 = pnand %p4429_p13, %p4423_p10 }
 0x258   :  { %v2682_v4 = vpop.f32.mrf.mxu0 }
 0x25a   :  { %v2684_v5 = vpop.f32.mrf.mxu0 }
 0x25c   :  { %v2686_v6 = vpop.f32.mrf.mxu0 }
 0x25e   :  { %v2687_v7 = vpop.f32.mrf.mxu0 }
 0x275   :  { %v2641_v12 = vpop.f32.mrf.mxu1 }
 0x276   :  { %v2642_v15 = vadd.f32 %v2641_v12, %v2601_v11 }
 0x277   :  { %v2643_v16 = vpop.f32.mrf.mxu1 }
 0x278   :  { %v2683_v17 = vadd.f32 %v2682_v4, %v2642_v15  ;;  %v2644_v18 = vadd.f32 %v2643_v16, %v2603_v14  ;;  %v3751_v19 = vpop.f32.mrf.mxu0 }
 0x279   :  { %v2645_v20 = vpop.f32.mrf.mxu1 }
 0x27a   :  { %v2685_v21 = vadd.f32 %v2684_v5, %v2644_v18  ;;  %v3752_v22 = vpop.f32.mrf.mxu0  ;;  %v2851_v23 = vmax.f32 %v2683_v17, 0.0 }
 0x27b   :  { %v2646_v56 = vpop.f32.mrf.mxu1  ;;  %v3753_v26 = vadd.f32 %v3752_v22, %v3751_v19 }
 0x27c   :  { %v2852_v29 = vmax.f32 %v2685_v21, 0.0  ;;  %v3754_v24 = vpop.f32.mrf.mxu0  ;;  %v2856_v32 = vpack.c.bf16 %v2851_v23, %v2851_v23 }
 0x27d   :  { %v2724_v36 = vadd.f32 %v3753_v26, %v1051_v44 }
 0x27e   :  { %v2857_v25 = vpack.c.bf16 %v2852_v29, %v2852_v29  ;;  %v3755_v59 = vpop.f32.mrf.mxu0 }
 0x280   :  { %3230 = vmatprep.mubr.bf16.mxu0 %v2857_v25 }
 0x281   :  { %3231 = vmatmul.mubr.bf16.vlgmr.msra.gmra.mxu0 %v2856_v32 }
 0x295   :  { %v3773_v33 = vpop.f32.mrf.mxu1 }
 0x297   :  { %v3774_v34 = vpop.f32.mrf.mxu1 }
 0x298   :  { %v3775_v38 = vadd.f32 %v3774_v34, %v3773_v33  ;;  %v3795_v39 = vpop.f32.mrf.mxu0 }
 0x299   :  { %v3776_v40 = vpop.f32.mrf.mxu1 }
 0x29a   :  { %v2764_v41 = vadd.f32 %v3775_v38, %v2724_v36  ;;  %v3796_v42 = vpop.f32.mrf.mxu0 }
 0x29b   :  { %v3797_v43 = vadd.f32 %v3796_v42, %v3795_v39  ;;  %v3777_v45 = vpop.f32.mrf.mxu1 }
 0x29c   :  { %v3798_v46 = vpop.f32.mrf.mxu0 }
 0x29d   :  { %v2804_v48 = vadd.f32 %v3797_v43, %v2764_v41  ;;  %v2843_v52 = vpop.f32.mrf.mxu1 }
 0x29e   :  { %v3799_v58 = vpop.f32.mrf.mxu0 }
 0x29f   :  { %v2844_v60 = vadd.f32 %v2843_v52, %v2804_v48  ;;  %v3862_v28 = vpop.f32.mrf.mxu1 }
 0x2a1   :  { %v2853_v27 = vmax.f32 %v2844_v60, 0.0  ;;  %v2846_v54 = vpop.f32.mrf.mxu1 }
 0x2a3   :  { %v2858_v57 = vpack.c.bf16 %v2853_v27, %v2853_v27  ;;  %v3863_v35 = vpop.f32.mrf.mxu1 }
 0x2a5   :  { %3873 = vmatmul.mubr.msk.bf16.vlgmr.msra.gmra.mxu1 %vm3154_vm5, %v2858_v57 }
 0x2a6   :  { %3880 = vmatprep.mubr.msk.bf16.mxu1 %vm4457_vm4, %v4456_v53  ;;  %3877 = vmatpush3.bf16.msra.mxu1 %v4380_v61 }
 0x2a7   :  { %3878 = vmatprep.subr.bf16.mxu1 %v4456_v53 }
 0x2aa   :  { %3879 = vmatpush3.bf16.msra.mxu1 %v4381_v50 }
 0x2dc   :  { %v3820_v62 = vpop.f32.mrf.mxu1 }
 0x2de   :  { %v3821_v31 = vpop.f32.mrf.mxu1 }
 0x2df   :  { %v3822_v55 = vadd.f32 %v3821_v31, %v3820_v62 }
 0x2e0   :  { %v3823_v47 = vpop.f32.mrf.mxu1 }
 0x2e1   :  { %v3193_v53 = vadd.f32 %v3822_v55, %v3693_v13 }
 0x2e2   :  { %v3824_v49 = vpop.f32.mrf.mxu1 }
 0x341   :  { %v3842_v63 = vpop.f32.mrf.mxu0 }
 0x343   :  { %v3843_v51 = vpop.f32.mrf.mxu0 }
 0x344   :  { %v3844_v2 = vadd.f32 %v3843_v51, %v3842_v63 }
 0x345   :  { %v3845_v0 = vpop.f32.mrf.mxu0 }
 0x346   :  { %v3233_v3 = vadd.f32 %v3844_v2, %v3193_v53 }
 0x347   :  { %v3846_v1 = vpop.f32.mrf.mxu0 }
 0x365   :  { %v3272_v37 = vpop.f32.mrf.mxu1 }
 0x366   :  { %v3273_v4 = vadd.f32 %v3272_v37, %v3233_v3 }
 0x367   :  { %v3874_v5 = vpop.f32.mrf.mxu1 }
 0x368   :  { %v3278_v6 = vmax.f32 %v3273_v4, 0.0 }
 0x369   :  { %v3275_v7 = vpop.f32.mrf.mxu1 }
 0x36a   :  { %v3279_v8 = vpack.c.bf16 %v3278_v6, %v3278_v6 }
 0x36b   :  { %v3875_v9 = vpop.f32.mrf.mxu1 }
 0x36c   :  { %3881 = vmatmul.mubr.msk.bf16.vlgmr.msra.gmra.mxu1 %vm2357_vm3, %v3279_v8 }
 0x42c   :  { %v3340_v10 = vpop.f32.mrf.mxu1 }
 0x42d   :  { %v3341_v11 = vadd.f32 %v3731_v30, %v3340_v10 }
 0x42e   :  { %v3882_v12 = vpop.f32.mrf.mxu1 }
 0x42f   :  { %v3346_v14 = vpack.c.bf16 %v3341_v11, %v3341_v11 }
 0x430   :  { %v3343_v15 = vpop.f32.mrf.mxu1 }
 0x431   :  { %3347 = vst [vmem:[#allocation7] sm:$0xf] %v3346_v14 }
 0x432   :  { %v3883_v16 = vpop.f32.mrf.mxu1 }
 0x433   :  { %4433 = shalt.err (!%p4430_p0)
}
 0x434   :  { %3357 = dma.vmem_to_hbm [thread:$0]  %s3355_s28, 64, %s4797_s9, [#allocation4]  }
 0x435   :  { %4446 = dma.done.wait [#allocation4], 64  }
 0x436   :  { %4447 = vsyncadd [#allocation4], 4294967232 }
 0x437   :  { %3361 = vsyncpa [#allocation3], 1 }
 0x438   :  { %3362 = vsyncpa [#allocation6], 1 }
 0x439   :  { %3363 = vsyncpa [#allocation4], 1 }

// kernel: tpu_custom_call.1
= control target key start
LH: loop header
LB: loop body
LE: loop exit
PB: predicated region body
PF: predicated region fallthrough
CT: control target
= control target key end

     0   :  { %14 = vsyncpa [#allocation3], 0  ;;  %s4788_s0 = inlined_call_operand.vmem [shape: bf16[8,147], index: 0, kind: input, shape index: {}]   ;;  %s4789_s1 = inlined_call_operand.hbm [shape: bf16[147,800], index: 1, kind: input, shape index: {}]   ;;  %s4790_s2 = inlined_call_operand.vmem [shape: f32[1,800], index: 2, kind: input, shape index: {}]   ;;  %s4791_s3 = inlined_call_operand.hbm [shape: bf16[800,576], index: 3, kind: input, shape index: {}]   ;;  %s4792_s4 = inlined_call_operand.vmem [shape: f32[1,576], index: 4, kind: input, shape index: {}]   ;;  %s4793_s5 = inlined_call_operand.vmem [shape: bf16[576,32], index: 5, kind: input, shape index: {}]   ;;  %s4794_s6 = inlined_call_operand.vmem [shape: f32[1,32], index: 6, kind: input, shape index: {}]   ;;  %s4795_s7 = inlined_call_operand.vmem [shape: bf16[32,128], index: 7, kind: input, shape index: {}]   ;;  %s4796_s8 = inlined_call_operand.vmem [shape: f32[1,128], index: 8, kind: input, shape index: {}]   ;;  %s4797_s9 = inlined_call_operand.hbm [shape: bf16[8,128], index: 9, kind: output, shape index: {}]  }
   0x1   :  { %15 = vsyncpa [#allocation6], 0 }
   0x2   :  { %16 = vsyncpa [#allocation4], 0  ;;  %s4448_s30 = smov [#allocation2]  }
   0x3   :  { %s24_s10 = sshll.u32 %s4448_s30, 4  ;;  %s25_s10 = int_to_ptr.vmem [resolvable:$true] %s24_s10 }
   0x4   :  { %s4390_s11 = scalar_lea.vmem %s25_s10, 8512  ;;  %p4395_p1 = scmp.lt.s32.totalorder %s25_s10, %s25_s10 }
   0x5   :  { %p4391_p0 = scmp.ne.s32.totalorder %s25_s10, %s4390_s11  ;;  %p4396_p2 = scmp.lt.s32.totalorder %s4390_s11, %s4390_s11 }
   0x7   :  { %p4397_p3 = por %p4396_p2, %p4395_p1 }
   0x9   :  { %p4398_p4 = pnand %p4397_p3, %p4391_p0 }
   0xb   :  { %4401 = shalt.err (!%p4398_p4)
}
   0xc   :  { %s4449_s12 = smov 448   ;;  %s4450_s13 = smov 28  }
   0xd   :  { %30 = dma.hbm_to_vmem [thread:$0]  %s4789_s1, 8512, %s25_s10, [#allocation3], %s4449_s12, %s4449_s12, %s4450_s13  }
   0xe   :  { %s4451_s16 = smov [#allocation5]  }
   0xf   :  { %s38_s17 = sshll.u32 %s4451_s16, 4  ;;  %s39_s17 = int_to_ptr.vmem [resolvable:$true] %s38_s17 }
  0x10   :  { %s4410_s18 = scalar_lea.vmem %s39_s17, 32000  ;;  %p4415_p6 = scmp.lt.s32.totalorder %s39_s17, %s39_s17 }
  0x11   :  { %p4411_p5 = scmp.ne.s32.totalorder %s39_s17, %s4410_s18  ;;  %p4416_p7 = scmp.lt.s32.totalorder %s4410_s18, %s4410_s18 }
  0x13   :  { %p4417_p8 = por %p4416_p7, %p4415_p6 }
  0x15   :  { %p4418_p9 = pnand %p4417_p8, %p4411_p5 }
  0x17   :  { %4421 = shalt.err (!%p4418_p9)
}
  0x18   :  { %s4452_s19 = smov 320   ;;  %s4453_s20 = smov 20  }
  0x19   :  { %44 = dma.hbm_to_vmem [thread:$0]  %s4791_s3, 32000, %s39_s17, [#allocation6], %s4452_s19, %s4452_s19, %s4453_s20  }
  0x1a   :  { %4442 = dma.done.wait [#allocation3], 8512  }
  0x1b   :  { %4443 = vsyncadd [#allocation3], 4294958784 }
  0x1c   :  { %4444 = dma.done.wait [#allocation6], 32000  }
  0x1d   :  { %4445 = vsyncadd [#allocation6], 4294935296  ;;  %v3895_v0 = vld [vmem:[#allocation2 + $0x18c] ss:$28 sps:$4 sm:$0xff]   ;;  %v3897_v1 = vld [vmem:[#allocation2 + $0x194] ss:$28 sps:$4 sm:$0xff]  }
  0x1e   :  { %553 = vmatprep.subr.bf16.mxu0 %v3895_v0  ;;  %v3899_v2 = vld [vmem:[#allocation2 + $0x188] ss:$28 sps:$4 sm:$0xff]   ;;  %v3900_v3 = vld [vmem:[#allocation2 + $0x190] ss:$28 sps:$4 sm:$0xff]   ;;  %594 = vmatprep.subr.bf16.mxu1 %v3897_v1  ;;  %v3903_v5 = vld [vmem:[#allocation2 + $0x15c] ss:$28 sps:$4 sm:$0xff]  }
  0x1f   :  { %v3901_v4 = vld [vmem:[#allocation2 + $0x154] ss:$28 sps:$4 sm:$0xff]   ;;  %554 = vmatpush1.bf16.msra.mxu0 %v3899_v2  ;;  %595 = vmatpush1.bf16.msra.mxu1 %v3900_v3  ;;  %v3907_v8 = vld [vmem:[#allocation2 + $0x11c] ss:$28 sps:$4 sm:$0xff]   ;;  %v3909_v9 = vld [vmem:[#allocation2 + $0x124] ss:$28 sps:$4 sm:$0xff]  }
  0x20   :  { %v3905_v6 = vld [vmem:[#allocation2 + $0x150] ss:$28 sps:$4 sm:$0xff]   ;;  %555 = vmatprep.subr.bf16.mxu0 %v3901_v4  ;;  %v3906_v7 = vld [vmem:[#allocation2 + $0x158] ss:$28 sps:$4 sm:$0xff]   ;;  %596 = vmatprep.subr.bf16.mxu1 %v3903_v5  ;;  %v3912_v11 = vld [vmem:[#allocation2 + $0x120] ss:$28 sps:$4 sm:$0xff]  }
  0x21   :  { %v3911_v10 = vld [vmem:[#allocation2 + $0x118] ss:$28 sps:$4 sm:$0xff]   ;;  %v3913_v12 = vld [vmem:[#allocation2 + $0xe4] ss:$28 sps:$4 sm:$0xff]   ;;  %v3915_v13 = vld [vmem:[#allocation2 + $0xec] ss:$28 sps:$4 sm:$0xff]  }
  0x22   :  { %v3917_v14 = vld [vmem:[#allocation2 + $0xe0] ss:$28 sps:$4 sm:$0xff]   ;;  %v3918_v15 = vld [vmem:[#allocation2 + $0xe8] ss:$28 sps:$4 sm:$0xff]   ;;  %v3921_v17 = vld [vmem:[#allocation2 + $0xb4] ss:$28 sps:$4 sm:$0xff]  }
  0x23   :  { %556 = vmatpush1.bf16.msra.mxu0 %v3905_v6  ;;  %597 = vmatpush1.bf16.msra.mxu1 %v3906_v7  ;;  %v3919_v16 = vld [vmem:[#allocation2 + $0xac] ss:$28 sps:$4 sm:$0xff]   ;;  %v3925_v20 = vld [vmem:[#allocation2 + $0x74] ss:$28 sps:$4 sm:$0xff]   ;;  %v3927_v21 = vld [vmem:[#allocation2 + $0x7c] ss:$28 sps:$4 sm:$0xff]  }
  0x24   :  { %557 = vmatprep.subr.bf16.mxu0 %v3907_v8  ;;  %598 = vmatprep.subr.bf16.mxu1 %v3909_v9  ;;  %v3923_v18 = vld [vmem:[#allocation2 + $0xa8] ss:$28 sps:$4 sm:$0xff]   ;;  %v3924_v19 = vld [vmem:[#allocation2 + $0xb0] ss:$28 sps:$4 sm:$0xff]   ;;  %vm528_vm0 = vcmask 1040384   ;;  %vm529_vm1 = vcmask 1041408  }
  0x25   :  { %v3929_v22 = vld [vmem:[#allocation2 + $0x70] ss:$28 sps:$4 sm:$0xff]   ;;  %v3930_v23 = vld [vmem:[#allocation2 + $0x78] ss:$28 sps:$4 sm:$0xff]   ;;  %v3933_v25 = vld [vmem:[#allocation2 + $0x44] ss:$28 sps:$4 sm:$0xff]  }
  0x26   :  { %v3931_v24 = vld [vmem:[#allocation2 + $0x3c] ss:$28 sps:$4 sm:$0xff]   ;;  %v136_v27 = vld [vmem:[#allocation2 + $0x200] sm:$0x33]  ;;  %v4454_v29 = vmov 65535   ;;  %vm524_vm2 = vcmask 154624  }
  0x27   :  { %558 = vmatpush1.bf16.msra.mxu0 %v3911_v10  ;;  %599 = vmatpush1.bf16.msra.mxu1 %v3912_v11  ;;  %v135_v26 = vld [vmem:[#allocation2 + $0x1f8] sm:$0x33]  ;;  %v530_v30 = vsel %vm528_vm0, 4294967295, %v4454_v29  ;;  %v3937_v32 = vld [vmem:[#allocation2 + $0x4] ss:$28 sps:$4 sm:$0xff]   ;;  %v3432_v36 = vcombine.high %v136_v27, %v136_v27  ;;  %v3431_v42 = vcombine.low %v136_v27, %v136_v27  ;;  %v4455_v55 = vmov 0  }
  0x28   :  { %559 = vmatprep.subr.bf16.mxu0 %v3913_v12  ;;  %600 = vmatprep.subr.bf16.mxu1 %v3915_v13  ;;  %v3935_v28 = vld [vmem:[#allocation2 + $0x38] ss:$28 sps:$4 sm:$0xff]   ;;  %v3936_v31 = vld [vmem:[#allocation2 + $0x40] ss:$28 sps:$4 sm:$0xff]   ;;  %v3939_v34 = vld [vmem:[#allocation2 + $0xc] ss:$28 sps:$4 sm:$0xff]   ;;  %v3430_v35 = vcombine.high %v135_v26, %v135_v26  ;;  %v3429_v41 = vcombine.low %v135_v26, %v135_v26 }
  0x29   :  { %v62_v33 = vld [vmem:[%s4788_s0] sm:$0xff]  ;;  %v4518_v38 = vsel %vm529_vm1, %v530_v30, 0  ;;  %v3949_v48 = vld [vmem:[#allocation2 + $0x1cc] ss:$28 sps:$4 sm:$0xff]   ;;  %v3962_v51 = vld [vmem:[#allocation2 + $0x19c] ss:$28 sps:$4 sm:$0xff]  }
  0x2a   :  { %v3365_v37 = vcombine.high %v62_v33, %v62_v33  ;;  %v3941_v39 = vld [vmem:[#allocation2] ss:$28 sps:$4 sm:$0xff]   ;;  %v3942_v40 = vld [vmem:[#allocation2 + $0x8] ss:$28 sps:$4 sm:$0xff]   ;;  %v536_v43 = vand.u32 %v3430_v35, %v4518_v38  ;;  %v542_v44 = vand.u32 %v3432_v36, %v4518_v38  ;;  %v533_v45 = vand.u32 %v3429_v41, %v4518_v38  ;;  %v3960_v54 = vld [vmem:[#allocation2 + $0x198] ss:$28 sps:$4 sm:$0xff]  }
  0x2b   :  { %560 = vmatpush1.bf16.msra.mxu0 %v3917_v14  ;;  %601 = vmatpush1.bf16.msra.mxu1 %v3918_v15  ;;  %v539_v46 = vand.u32 %v3431_v42, %v4518_v38  ;;  %v3947_v47 = vld [vmem:[#allocation2 + $0x1c4] ss:$28 sps:$4 sm:$0xff]   ;;  %v4526_v52 = vcombine.low %v62_v33, %v62_v33  ;;  %v3970_v59 = vld [vmem:[#allocation2 + $0x12c] ss:$28 sps:$4 sm:$0xff]   ;;  %v3974_v62 = vld [vmem:[#allocation2 + $0xf4] ss:$28 sps:$4 sm:$0xff]  }
  0x2c   :  { %561 = vmatprep.subr.bf16.mxu0 %v3919_v16  ;;  %602 = vmatprep.subr.bf16.mxu1 %v3921_v17  ;;  %v3951_v49 = vld [vmem:[#allocation2 + $0x1c0] ss:$28 sps:$4 sm:$0xff]   ;;  %v3952_v50 = vld [vmem:[#allocation2 + $0x1c8] ss:$28 sps:$4 sm:$0xff]   ;;  %v3957_v60 = vld [vmem:[#allocation2 + $0x130] ss:$28 sps:$4 sm:$0xff]  }
  0x2d   :  { %3436 = vmatprep.mubr.msk.bf16.mxu0 %vm524_vm2, %v3365_v37  ;;  %3437 = vmatprep.mubr.msk.bf16.mxu1 %vm524_vm2, %v3365_v37  ;;  %v3955_v53 = vld [vmem:[#allocation2 + $0x1a0] ss:$28 sps:$4 sm:$0xff]   ;;  %v3956_v57 = vld [vmem:[#allocation2 + $0x168] ss:$28 sps:$4 sm:$0xff]   ;;  %v3958_v63 = vld [vmem:[#allocation2 + $0xf8] ss:$28 sps:$4 sm:$0xff]  }
  0x2e   :  { %v3966_v56 = vld [vmem:[#allocation2 + $0x164] ss:$28 sps:$4 sm:$0xff]   ;;  %v3972_v0 = vld [vmem:[#allocation2 + $0xf0] ss:$28 sps:$4 sm:$0xff]   ;;  %v3978_v1 = vld [vmem:[#allocation2 + $0xbc] ss:$28 sps:$4 sm:$0xff]  }
  0x2f   :  { %562 = vmatpush1.bf16.msra.mxu0 %v3923_v18  ;;  %603 = vmatpush1.bf16.msra.mxu1 %v3924_v19  ;;  %v3964_v58 = vld [vmem:[#allocation2 + $0x160] ss:$28 sps:$4 sm:$0xff]   ;;  %v3968_v61 = vld [vmem:[#allocation2 + $0x128] ss:$28 sps:$4 sm:$0xff]   ;;  %v3976_v3 = vld [vmem:[#allocation2 + $0xb8] ss:$28 sps:$4 sm:$0xff]  }
  0x30   :  { %563 = vmatprep.subr.bf16.mxu0 %v3925_v20  ;;  %604 = vmatprep.subr.bf16.mxu1 %v3927_v21  ;;  %v3959_v2 = vld [vmem:[#allocation2 + $0xc0] ss:$28 sps:$4 sm:$0xff]   ;;  %v3963_v5 = vld [vmem:[#allocation2 + $0x88] ss:$28 sps:$4 sm:$0xff]   ;;  %v3967_v9 = vld [vmem:[#allocation2 + $0x50] ss:$28 sps:$4 sm:$0xff]  }
  0x31   :  { %v3982_v4 = vld [vmem:[#allocation2 + $0x84] ss:$28 sps:$4 sm:$0xff]   ;;  %v3985_v7 = vld [vmem:[#allocation2 + $0x4c] ss:$28 sps:$4 sm:$0xff]   ;;  %v3988_v11 = vld [vmem:[#allocation2 + $0x14] ss:$28 sps:$4 sm:$0xff]  }
  0x32   :  { %v3980_v6 = vld [vmem:[#allocation2 + $0x80] ss:$28 sps:$4 sm:$0xff]   ;;  %v137_v8 = vld [vmem:[#allocation2 + $0x208] sm:$0x33]  ;;  %v3971_v13 = vld [vmem:[#allocation2 + $0x18] ss:$28 sps:$4 sm:$0xff]  }
  0x33   :  { %564 = vmatpush1.bf16.msra.mxu0 %v3929_v22  ;;  %605 = vmatpush1.bf16.msra.mxu1 %v3930_v23  ;;  %v3983_v10 = vld [vmem:[#allocation2 + $0x48] ss:$28 sps:$4 sm:$0xff]   ;;  %v3434_v12 = vcombine.high %v137_v8, %v137_v8  ;;  %v3975_v14 = vld [vmem:[#allocation2 + $0x210] ss:$0 sps:$4 sm:$0x33]   ;;  %v3433_v16 = vcombine.low %v137_v8, %v137_v8  ;;  %vm2357_vm3 = vcmask 261120  }
  0x34   :  { %565 = vmatprep.subr.bf16.mxu0 %v3931_v24  ;;  %606 = vmatprep.subr.bf16.mxu1 %v3933_v25  ;;  %v3986_v15 = vld [vmem:[#allocation2 + $0x10] ss:$28 sps:$4 sm:$0xff]   ;;  %v551_v18 = vand.u32 %v3975_v14, %v4518_v38  ;;  %v3979_v21 = vld [vmem:[#allocation2 + $0x1d8] ss:$28 sps:$4 sm:$0xff]   ;;  %v4002_v27 = vld [vmem:[#allocation5 + $0xf4] ss:$20 sps:$4 sm:$0xff]  }
  0x35   :  { %v548_v17 = vand.u32 %v3434_v12, %v4518_v38  ;;  %v545_v19 = vand.u32 %v3433_v16, %v4518_v38  ;;  %v3993_v20 = vld [vmem:[#allocation2 + $0x1d4] ss:$28 sps:$4 sm:$0xff]   ;;  %v3994_v25 = vld [vmem:[#allocation5 + $0x118] ss:$20 sps:$4 sm:$0xff]   ;;  %v4000_v29 = vld [vmem:[#allocation5 + $0xf0] ss:$20 sps:$4 sm:$0xff]  }
  0x36   :  { %v3991_v22 = vld [vmem:[#allocation2 + $0x1d0] ss:$28 sps:$4 sm:$0xff]   ;;  %v4003_v30 = vld [vmem:[#allocation5 + $0x370] ss:$20 sps:$4 sm:$0xff]   ;;  %v4015_v38 = vld [vmem:[#allocation5 + $0x320] ss:$20 sps:$4 sm:$0xff]  }
  0x37   :  { %566 = vmatpush1.bf16.msra.mxu0 %v3935_v28  ;;  %607 = vmatpush1.bf16.msra.mxu1 %v3936_v31  ;;  %v3996_v23 = vld [vmem:[#allocation5 + $0x11c] ss:$20 sps:$4 sm:$0xff]   ;;  %v3997_v26 = vld [vmem:[#allocation5 + $0x398] ss:$20 sps:$4 sm:$0xff]   ;;  %v4005_v28 = vld [vmem:[#allocation5 + $0x374] ss:$20 sps:$4 sm:$0xff]  }
  0x38   :  { %567 = vmatprep.subr.bf16.mxu0 %v3937_v32  ;;  %608 = vmatprep.subr.bf16.mxu1 %v3939_v34  ;;  %v3999_v24 = vld [vmem:[#allocation5 + $0x39c] ss:$20 sps:$4 sm:$0xff]   ;;  %v4008_v31 = vld [vmem:[#allocation5 + $0xcc] ss:$20 sps:$4 sm:$0xff]   ;;  %v4014_v35 = vld [vmem:[#allocation5 + $0xa4] ss:$20 sps:$4 sm:$0xff]  }
  0x39   :  { %v4011_v32 = vld [vmem:[#allocation5 + $0x34c] ss:$20 sps:$4 sm:$0xff]   ;;  %v4006_v33 = vld [vmem:[#allocation5 + $0xc8] ss:$20 sps:$4 sm:$0xff]   ;;  %v4017_v36 = vld [vmem:[#allocation5 + $0x324] ss:$20 sps:$4 sm:$0xff]  }
  0x3a   :  { %v4009_v34 = vld [vmem:[#allocation5 + $0x348] ss:$20 sps:$4 sm:$0xff]   ;;  %v4018_v41 = vld [vmem:[#allocation5 + $0x78] ss:$20 sps:$4 sm:$0xff]   ;;  %v4072_v14 = vld [vmem:[#allocation5 + $0x190] ss:$20 sps:$4 sm:$0xff]  }
  0x3b   :  { %568 = vmatpush1.bf16.msra.mxu0 %v3941_v39  ;;  %609 = vmatpush1.bf16.msra.mxu1 %v3942_v40  ;;  %v4020_v39 = vld [vmem:[#allocation5 + $0x7c] ss:$20 sps:$4 sm:$0xff]   ;;  %v4021_v42 = vld [vmem:[#allocation5 + $0x2f8] ss:$20 sps:$4 sm:$0xff]   ;;  %v4074_v12 = vld [vmem:[#allocation5 + $0x194] ss:$20 sps:$4 sm:$0xff]  }
  0x3c   :  { %581 = vmatprep.subr.bf16.mxu0 %v536_v43  ;;  %622 = vmatprep.subr.bf16.mxu1 %v542_v44  ;;  %v4023_v40 = vld [vmem:[#allocation5 + $0x2fc] ss:$20 sps:$4 sm:$0xff]   ;;  %v4026_v43 = vld [vmem:[#allocation5 + $0x54] ss:$20 sps:$4 sm:$0xff]   ;;  %v4080_v16 = vld [vmem:[#allocation5 + $0x16c] ss:$20 sps:$4 sm:$0xff]  }
  0x3d   :  { %v4029_v44 = vld [vmem:[#allocation5 + $0x2d4] ss:$20 sps:$4 sm:$0xff]   ;;  %v4068_v8 = vld [vmem:[#allocation5 + $0x1bc] ss:$20 sps:$4 sm:$0xff]   ;;  %vm4457_vm4 = vmmov 0   ;;  %vm3154_vm5 = vcmask 523264  }
  0x3e   :  { %s4458_s27 = smov [#allocation7]  }
  0x3f   :  { %582 = vmatpush2.bf16.msra.mxu0 %v533_v45  ;;  %623 = vmatpush2.bf16.msra.mxu1 %v539_v46  ;;  %v4024_v45 = vld [vmem:[#allocation5 + $0x50] ss:$20 sps:$4 sm:$0xff]   ;;  %s3354_s28 = sshll.u32 %s4458_s27, 4  ;;  %s3355_s28 = int_to_ptr.vmem [resolvable:$true] %s3354_s28 }
  0x40   :  { %583 = vmatprep.subr.bf16.mxu0 %v3947_v47  ;;  %624 = vmatprep.subr.bf16.mxu1 %v3949_v48  ;;  %v4027_v46 = vld [vmem:[#allocation5 + $0x2d0] ss:$20 sps:$4 sm:$0xff]   ;;  %v4032_v47 = vld [vmem:[#allocation5 + $0x2c] ss:$20 sps:$4 sm:$0xff]   ;;  %p4427_p11 = scmp.lt.s32.totalorder %s3355_s28, %s3355_s28 }
  0x41   :  { %v4035_v48 = vld [vmem:[#allocation5 + $0x2ac] ss:$20 sps:$4 sm:$0xff]  }
  0x43   :  { %584 = vmatpush2.bf16.msra.mxu0 %v3951_v49  ;;  %625 = vmatpush2.bf16.msra.mxu1 %v3952_v50  ;;  %v4030_v49 = vld [vmem:[#allocation5 + $0x28] ss:$20 sps:$4 sm:$0xff]  }
  0x44   :  { %676 = vmatprep.subr.bf16.mxu1 %v4455_v55  ;;  %635 = vmatprep.subr.bf16.mxu0 %v3962_v51  ;;  %v4033_v50 = vld [vmem:[#allocation5 + $0x2a8] ss:$20 sps:$4 sm:$0xff]   ;;  %v4038_v51 = vld [vmem:[#allocation5 + $0x4] ss:$20 sps:$4 sm:$0xff]  }
  0x46   :  { %586 = vmatmul.mubr.bf16.vlgmr.msra.gmra.mxu0 %v4526_v52  ;;  %627 = vmatmul.mubr.bf16.vlgmr.msra.gmra.mxu1 %v4526_v52 }
  0x47   :  { %677 = vmatpush1.bf16.msra.mxu1 %v3955_v53  ;;  %636 = vmatpush1.bf16.msra.mxu0 %v3960_v54  ;;  %v4036_v53 = vld [vmem:[#allocation5] ss:$20 sps:$4 sm:$0xff]  }
  0x48   :  { %678 = vmatprep.subr.bf16.mxu1 %v4455_v55  ;;  %637 = vmatprep.subr.bf16.mxu0 %v3966_v56  ;;  %v4039_v54 = vld [vmem:[#allocation5 + $0x280] ss:$20 sps:$4 sm:$0xff]   ;;  %v4044_v56 = vld [vmem:[#allocation5 + $0x25c] ss:$20 sps:$4 sm:$0xff]  }
  0x49   :  { %3439 = vmatprep.mubr.msk.bf16.mxu1 %vm524_vm2, %v3365_v37  ;;  %3438 = vmatprep.mubr.msk.bf16.mxu0 %vm524_vm2, %v3365_v37  ;;  %v4012_v37 = vld [vmem:[#allocation5 + $0xa0] ss:$20 sps:$4 sm:$0xff]  }
  0x4b   :  { %679 = vmatpush1.bf16.msra.mxu1 %v3956_v57  ;;  %638 = vmatpush1.bf16.msra.mxu0 %v3964_v58  ;;  %v4047_v57 = vld [vmem:[#allocation5 + $0x4dc] ss:$20 sps:$4 sm:$0xff]   ;;  %v4042_v58 = vld [vmem:[#allocation5 + $0x258] ss:$20 sps:$4 sm:$0xff]  }
  0x4c   :  { %680 = vmatprep.subr.bf16.mxu1 %v4455_v55  ;;  %639 = vmatprep.subr.bf16.mxu0 %v3970_v59  ;;  %v4045_v59 = vld [vmem:[#allocation5 + $0x4d8] ss:$20 sps:$4 sm:$0xff]  }
  0x4f   :  { %681 = vmatpush1.bf16.msra.mxu1 %v3957_v60  ;;  %640 = vmatpush1.bf16.msra.mxu0 %v3968_v61  ;;  %v4050_v60 = vld [vmem:[#allocation5 + $0x234] ss:$20 sps:$4 sm:$0xff]  }
  0x50   :  { %682 = vmatprep.subr.bf16.mxu1 %v4455_v55  ;;  %641 = vmatprep.subr.bf16.mxu0 %v3974_v62  ;;  %v4053_v61 = vld [vmem:[#allocation5 + $0x4b4] ss:$20 sps:$4 sm:$0xff]   ;;  %v4048_v62 = vld [vmem:[#allocation5 + $0x230] ss:$20 sps:$4 sm:$0xff]  }
  0x53   :  { %683 = vmatpush1.bf16.msra.mxu1 %v3958_v63  ;;  %642 = vmatpush1.bf16.msra.mxu0 %v3972_v0  ;;  %v4051_v63 = vld [vmem:[#allocation5 + $0x4b0] ss:$20 sps:$4 sm:$0xff]   ;;  %v4056_v0 = vld [vmem:[#allocation5 + $0x20c] ss:$20 sps:$4 sm:$0xff]  }
  0x54   :  { %684 = vmatprep.subr.bf16.mxu1 %v4455_v55  ;;  %643 = vmatprep.subr.bf16.mxu0 %v3978_v1  ;;  %v4059_v1 = vld [vmem:[#allocation5 + $0x48c] ss:$20 sps:$4 sm:$0xff]  }
  0x57   :  { %685 = vmatpush1.bf16.msra.mxu1 %v3959_v2  ;;  %644 = vmatpush1.bf16.msra.mxu0 %v3976_v3  ;;  %v4054_v2 = vld [vmem:[#allocation5 + $0x208] ss:$20 sps:$4 sm:$0xff]  }
  0x58   :  { %686 = vmatprep.subr.bf16.mxu1 %v4455_v55  ;;  %645 = vmatprep.subr.bf16.mxu0 %v3982_v4  ;;  %v4057_v3 = vld [vmem:[#allocation5 + $0x488] ss:$20 sps:$4 sm:$0xff]   ;;  %v4062_v4 = vld [vmem:[#allocation5 + $0x1e4] ss:$20 sps:$4 sm:$0xff]  }
  0x5b   :  { %687 = vmatpush1.bf16.msra.mxu1 %v3963_v5  ;;  %646 = vmatpush1.bf16.msra.mxu0 %v3980_v6  ;;  %v4065_v5 = vld [vmem:[#allocation5 + $0x464] ss:$20 sps:$4 sm:$0xff]   ;;  %v4060_v6 = vld [vmem:[#allocation5 + $0x1e0] ss:$20 sps:$4 sm:$0xff]  }
  0x5c   :  { %688 = vmatprep.subr.bf16.mxu1 %v4455_v55  ;;  %647 = vmatprep.subr.bf16.mxu0 %v3985_v7  ;;  %v4063_v7 = vld [vmem:[#allocation5 + $0x460] ss:$20 sps:$4 sm:$0xff]  }
  0x5f   :  { %689 = vmatpush1.bf16.msra.mxu1 %v3967_v9  ;;  %648 = vmatpush1.bf16.msra.mxu0 %v3983_v10  ;;  %v4071_v9 = vld [vmem:[#allocation5 + $0x43c] ss:$20 sps:$4 sm:$0xff]   ;;  %v4066_v10 = vld [vmem:[#allocation5 + $0x1b8] ss:$20 sps:$4 sm:$0xff]  }
  0x60   :  { %690 = vmatprep.subr.bf16.mxu1 %v4455_v55  ;;  %649 = vmatprep.subr.bf16.mxu0 %v3988_v11  ;;  %v4069_v11 = vld [vmem:[#allocation5 + $0x438] ss:$20 sps:$4 sm:$0xff]  }
  0x63   :  { %691 = vmatpush1.bf16.msra.mxu1 %v3971_v13  ;;  %650 = vmatpush1.bf16.msra.mxu0 %v3986_v15  ;;  %v4077_v13 = vld [vmem:[#allocation5 + $0x414] ss:$20 sps:$4 sm:$0xff]   ;;  %v4075_v15 = vld [vmem:[#allocation5 + $0x410] ss:$20 sps:$4 sm:$0xff]  }
  0x64   :  { %704 = vmatprep.subr.bf16.mxu1 %v4455_v55  ;;  %663 = vmatprep.subr.bf16.mxu0 %v548_v17  ;;  %v4083_v17 = vld [vmem:[#allocation5 + $0x3ec] ss:$20 sps:$4 sm:$0xff]  }
  0x67   :  { %705 = vmatpush2.bf16.msra.mxu1 %v551_v18  ;;  %664 = vmatpush2.bf16.msra.mxu0 %v545_v19  ;;  %v4078_v18 = vld [vmem:[#allocation5 + $0x168] ss:$20 sps:$4 sm:$0xff]  }
  0x68   :  { %706 = vmatprep.subr.bf16.mxu1 %v4455_v55  ;;  %665 = vmatprep.subr.bf16.mxu0 %v3993_v20  ;;  %v4081_v19 = vld [vmem:[#allocation5 + $0x3e8] ss:$20 sps:$4 sm:$0xff]   ;;  %v4086_v20 = vld [vmem:[#allocation5 + $0x144] ss:$20 sps:$4 sm:$0xff]  }
  0x6b   :  { %707 = vmatpush2.bf16.msra.mxu1 %v3979_v21  ;;  %666 = vmatpush2.bf16.msra.mxu0 %v3991_v22  ;;  %v4089_v21 = vld [vmem:[#allocation5 + $0x3c4] ss:$20 sps:$4 sm:$0xff]   ;;  %v4084_v22 = vld [vmem:[#allocation5 + $0x140] ss:$20 sps:$4 sm:$0xff]  }
  0x6c   :  { %2361 = vmatprep.subr.bf16.mxu0 %v3996_v23  ;;  %2402 = vmatprep.subr.bf16.mxu1 %v3999_v24  ;;  %v4087_v23 = vld [vmem:[#allocation5 + $0x3c0] ss:$20 sps:$4 sm:$0xff]   ;;  %v4092_v24 = vld [vmem:[#allocation5 + $0x61c] ss:$20 sps:$4 sm:$0xff]  }
  0x6e   :  { %709 = vmatmul.mubr.bf16.vlgmr.msra.gmra.mxu1 %v4526_v52  ;;  %668 = vmatmul.mubr.bf16.vlgmr.msra.gmra.mxu0 %v4526_v52  ;;  %v4041_v52 = vld [vmem:[#allocation5 + $0x284] ss:$20 sps:$4 sm:$0xff]  }
  0x6f   :  { %2362 = vmatpush1.bf16.msra.mxu0 %v3994_v25  ;;  %2403 = vmatpush1.bf16.msra.mxu1 %v3997_v26  ;;  %v4116_v25 = vld [vmem:[#allocation5 + $0x7ac] ss:$20 sps:$4 sm:$0xff]   ;;  %v141_v26 = vlaneseq }
  0x70   :  { %2363 = vmatprep.subr.bf16.mxu0 %v4002_v27  ;;  %2404 = vmatprep.subr.bf16.mxu1 %v4005_v28 }
  0x71   :  { %v4547_v27 = vshrl.u32 %v141_v26, 7  ;;  %v4123_v26 = vld [vmem:[#allocation5 + $0x730] ss:$20 sps:$4 sm:$0xff]  }
  0x73   :  { %2364 = vmatpush1.bf16.msra.mxu0 %v4000_v29  ;;  %2405 = vmatpush1.bf16.msra.mxu1 %v4003_v30  ;;  %v143_v28 = vsub.s32 0, %v4547_v27  ;;  %v151_v29 = vsub.s32 2, %v4547_v27  ;;  %v4554_v30 = vld [vmem:[%s4790_s2] sm:$0x7f] }
  0x74   :  { %2365 = vmatprep.subr.bf16.mxu0 %v4008_v31  ;;  %2406 = vmatprep.subr.bf16.mxu1 %v4011_v32  ;;  %v147_v31 = vsub.s32 1, %v4547_v27  ;;  %v155_v32 = vsub.s32 3, %v4547_v27 }
  0x77   :  { %2366 = vmatpush1.bf16.msra.mxu0 %v4006_v33  ;;  %2407 = vmatpush1.bf16.msra.mxu1 %v4009_v34  ;;  %v144_v33 = vrot.slane %v4554_v30, %v143_v28  ;;  %v152_v34 = vrot.slane %v4554_v30, %v151_v29 }
  0x78   :  { %2367 = vmatprep.subr.bf16.mxu0 %v4014_v35  ;;  %2408 = vmatprep.subr.bf16.mxu1 %v4017_v36  ;;  %v148_v35 = vrot.slane %v4554_v30, %v147_v31  ;;  %v156_v36 = vrot.slane %v4554_v30, %v155_v32 }
  0x7b   :  { %2368 = vmatpush1.bf16.msra.mxu0 %v4012_v37  ;;  %2409 = vmatpush1.bf16.msra.mxu1 %v4015_v38 }
  0x7c   :  { %2369 = vmatprep.subr.bf16.mxu0 %v4020_v39  ;;  %2410 = vmatprep.subr.bf16.mxu1 %v4023_v40 }
  0x7f   :  { %2370 = vmatpush1.bf16.msra.mxu0 %v4018_v41  ;;  %2411 = vmatpush1.bf16.msra.mxu1 %v4021_v42 }
  0x80   :  { %2371 = vmatprep.subr.bf16.mxu0 %v4026_v43  ;;  %2412 = vmatprep.subr.bf16.mxu1 %v4029_v44 }
  0x83   :  { %2372 = vmatpush1.bf16.msra.mxu0 %v4024_v45  ;;  %2413 = vmatpush1.bf16.msra.mxu1 %v4027_v46 }
  0x84   :  { %2373 = vmatprep.subr.bf16.mxu0 %v4032_v47  ;;  %2414 = vmatprep.subr.bf16.mxu1 %v4035_v48 }
  0x87   :  { %2374 = vmatpush1.bf16.msra.mxu0 %v4030_v49  ;;  %2415 = vmatpush1.bf16.msra.mxu1 %v4033_v50 }
  0x88   :  { %2375 = vmatprep.subr.bf16.mxu0 %v4038_v51  ;;  %2416 = vmatprep.subr.bf16.mxu1 %v4041_v52 }
  0x8b   :  { %2376 = vmatpush1.bf16.msra.mxu0 %v4036_v53  ;;  %2417 = vmatpush1.bf16.msra.mxu1 %v4039_v54 }
  0x8c   :  { %2377 = vmatprep.subr.bf16.mxu0 %v4044_v56  ;;  %2418 = vmatprep.subr.bf16.mxu1 %v4047_v57  ;;  %v4090_v57 = vld [vmem:[#allocation5 + $0x618] ss:$20 sps:$4 sm:$0xff]  }
  0x8f   :  { %2378 = vmatpush2.bf16.msra.mxu0 %v4042_v58  ;;  %2419 = vmatpush2.bf16.msra.mxu1 %v4045_v59  ;;  %v4114_v58 = vld [vmem:[#allocation5 + $0x7a8] ss:$20 sps:$4 sm:$0xff]  }
  0x90   :  { %2379 = vmatprep.subr.bf16.mxu0 %v4050_v60  ;;  %2420 = vmatprep.subr.bf16.mxu1 %v4053_v61  ;;  %v4095_v60 = vld [vmem:[#allocation5 + $0x5f4] ss:$20 sps:$4 sm:$0xff]   ;;  %v4122_v61 = vld [vmem:[#allocation5 + $0x784] ss:$20 sps:$4 sm:$0xff]  }
  0x93   :  { %2380 = vmatpush2.bf16.msra.mxu0 %v4048_v62  ;;  %2421 = vmatpush2.bf16.msra.mxu1 %v4051_v63  ;;  %v4093_v62 = vld [vmem:[#allocation5 + $0x5f0] ss:$20 sps:$4 sm:$0xff]   ;;  %v4120_v63 = vld [vmem:[#allocation5 + $0x780] ss:$20 sps:$4 sm:$0xff]  }
  0x94   :  { %2381 = vmatprep.subr.bf16.mxu0 %v4056_v0  ;;  %2422 = vmatprep.subr.bf16.mxu1 %v4059_v1  ;;  %v4098_v0 = vld [vmem:[#allocation5 + $0x5cc] ss:$20 sps:$4 sm:$0xff]   ;;  %v4128_v1 = vld [vmem:[#allocation5 + $0x124] ss:$20 sps:$4 sm:$0xff]  }
  0x97   :  { %2382 = vmatpush2.bf16.msra.mxu0 %v4054_v2  ;;  %2423 = vmatpush2.bf16.msra.mxu1 %v4057_v3  ;;  %v4096_v2 = vld [vmem:[#allocation5 + $0x5c8] ss:$20 sps:$4 sm:$0xff]   ;;  %v4101_v3 = vld [vmem:[#allocation5 + $0x5a4] ss:$20 sps:$4 sm:$0xff]  }
  0x98   :  { %2383 = vmatprep.subr.bf16.mxu0 %v4062_v4  ;;  %2424 = vmatprep.subr.bf16.mxu1 %v4065_v5  ;;  %v4099_v4 = vld [vmem:[#allocation5 + $0x5a0] ss:$20 sps:$4 sm:$0xff]   ;;  %v4104_v5 = vld [vmem:[#allocation5 + $0x57c] ss:$20 sps:$4 sm:$0xff]  }
  0x9b   :  { %2384 = vmatpush2.bf16.msra.mxu0 %v4060_v6  ;;  %2425 = vmatpush2.bf16.msra.mxu1 %v4063_v7  ;;  %v4102_v6 = vld [vmem:[#allocation5 + $0x578] ss:$20 sps:$4 sm:$0xff]   ;;  %v4107_v7 = vld [vmem:[#allocation5 + $0x554] ss:$20 sps:$4 sm:$0xff]  }
  0x9c   :  { %2385 = vmatprep.subr.bf16.mxu0 %v4068_v8  ;;  %2426 = vmatprep.subr.bf16.mxu1 %v4071_v9  ;;  %v4105_v8 = vld [vmem:[#allocation5 + $0x550] ss:$20 sps:$4 sm:$0xff]   ;;  %v4110_v9 = vld [vmem:[#allocation5 + $0x52c] ss:$20 sps:$4 sm:$0xff]  }
  0x9f   :  { %2386 = vmatpush2.bf16.msra.mxu0 %v4066_v10  ;;  %2427 = vmatpush2.bf16.msra.mxu1 %v4069_v11  ;;  %v4108_v10 = vld [vmem:[#allocation5 + $0x528] ss:$20 sps:$4 sm:$0xff]   ;;  %v4113_v11 = vld [vmem:[#allocation5 + $0x504] ss:$20 sps:$4 sm:$0xff]  }
  0xa0   :  { %2387 = vmatprep.subr.bf16.mxu0 %v4074_v12  ;;  %2428 = vmatprep.subr.bf16.mxu1 %v4077_v13  ;;  %v167_v12 = vsub.s32 6, %v4547_v27  ;;  %v4111_v13 = vld [vmem:[#allocation5 + $0x500] ss:$20 sps:$4 sm:$0xff]  }
  0xa3   :  { %2388 = vmatpush2.bf16.msra.mxu0 %v4072_v14  ;;  %2429 = vmatpush2.bf16.msra.mxu1 %v4075_v15  ;;  %v163_v14 = vsub.s32 5, %v4547_v27  ;;  %v4119_v15 = vld [vmem:[#allocation5 + $0x75c] ss:$20 sps:$4 sm:$0xff]  }
  0xa4   :  { %2389 = vmatprep.subr.bf16.mxu0 %v4080_v16  ;;  %2430 = vmatprep.subr.bf16.mxu1 %v4083_v17  ;;  %v168_v16 = vrot.slane %v4554_v30, %v167_v12  ;;  %v4117_v17 = vld [vmem:[#allocation5 + $0x758] ss:$20 sps:$4 sm:$0xff]   ;;  %v4165_v12 = vld [vmem:[#allocation5 + $0x3a0] ss:$20 sps:$4 sm:$0xff]  }
  0xa7   :  { %2390 = vmatpush2.bf16.msra.mxu0 %v4078_v18  ;;  %2431 = vmatpush2.bf16.msra.mxu1 %v4081_v19  ;;  %v164_v18 = vrot.slane %v4554_v30, %v163_v14  ;;  %v4168_v14 = vld [vmem:[#allocation5 + $0x8] ss:$20 sps:$4 sm:$0xff]  }
  0xa8   :  { %2391 = vmatprep.subr.bf16.mxu0 %v4086_v20  ;;  %2432 = vmatprep.subr.bf16.mxu1 %v4089_v21  ;;  %v4125_v20 = vld [vmem:[#allocation5 + $0x734] ss:$20 sps:$4 sm:$0xff]  }
  0xab   :  { %2392 = vmatpush2.bf16.msra.mxu0 %v4084_v22  ;;  %2433 = vmatpush2.bf16.msra.mxu1 %v4087_v23 }
  0xac   :  { %2443 = vmatprep.subr.bf16.mxu0 %v4092_v24  ;;  %2496 = vmatprep.subr.bf16.mxu1 %v4116_v25 }
 0x106   :  { %v587_v37 = vpop.f32.mrf.mxu0  ;;  %v628_v38 = vpop.f32.mrf.mxu1 }
 0x107   :  { %v588_v39 = vadd.f32 %v587_v37, %v144_v33  ;;  %v629_v40 = vadd.f32 %v628_v38, %v152_v34  ;;  %v4131_v38 = vld [vmem:[#allocation5 + $0x70c] ss:$20 sps:$4 sm:$0xff]  }
 0x108   :  { %v589_v41 = vpop.f32.mrf.mxu0  ;;  %v630_v42 = vpop.f32.mrf.mxu1 }
 0x109   :  { %v718_v43 = vmax.f32 %v629_v40, 0.0  ;;  %v590_v44 = vadd.f32 %v589_v41, %v148_v35  ;;  %v631_v45 = vadd.f32 %v630_v42, %v156_v36  ;;  %v716_v46 = vmax.f32 %v588_v39, 0.0  ;;  %v4126_v35 = vld [vmem:[#allocation5 + $0x120] ss:$20 sps:$4 sm:$0xff]   ;;  %v4134_v39 = vld [vmem:[#allocation5 + $0xfc] ss:$20 sps:$4 sm:$0xff]  }
 0x10a   :  { %v591_v47 = vpop.f32.mrf.mxu0  ;;  %v632_v48 = vpop.f32.mrf.mxu1 }
 0x10b   :  { %v717_v49 = vmax.f32 %v590_v44, 0.0  ;;  %v719_v50 = vmax.f32 %v631_v45, 0.0  ;;  %v4570_v51 = vpack.c.bf16 %v718_v43, %v718_v43  ;;  %v4576_v59 = vpack.c.bf16 %v716_v46, %v716_v46  ;;  %v4129_v43 = vld [vmem:[#allocation5 + $0x708] ss:$20 sps:$4 sm:$0xff]   ;;  %v4132_v45 = vld [vmem:[#allocation5 + $0xf8] ss:$20 sps:$4 sm:$0xff]  }
 0x10c   :  { %v592_v52 = vpop.f32.mrf.mxu0  ;;  %v633_v53 = vpop.f32.mrf.mxu1  ;;  %v4137_v46 = vld [vmem:[#allocation5 + $0x6e4] ss:$20 sps:$4 sm:$0xff]   ;;  %v4140_v47 = vld [vmem:[#allocation5 + $0xd4] ss:$20 sps:$4 sm:$0xff]  }
 0x10d   :  { %v4572_v54 = vpack.c.bf16 %v717_v49, %v717_v49  ;;  %v4574_v56 = vpack.c.bf16 %v719_v50, %v719_v50  ;;  %v4135_v48 = vld [vmem:[#allocation5 + $0x6e0] ss:$20 sps:$4 sm:$0xff]   ;;  %v4138_v49 = vld [vmem:[#allocation5 + $0xd0] ss:$20 sps:$4 sm:$0xff]   ;;  %v4141_v53 = vld [vmem:[#allocation5 + $0x6b8] ss:$20 sps:$4 sm:$0xff]  }
 0x10e   :  { %v4143_v50 = vld [vmem:[#allocation5 + $0x6bc] ss:$20 sps:$4 sm:$0xff]   ;;  %v4146_v52 = vld [vmem:[#allocation5 + $0xac] ss:$20 sps:$4 sm:$0xff]  }
 0x10f   :  { %2393 = vmatprep.mubr.bf16.mxu0 %v4572_v54  ;;  %2434 = vmatprep.mubr.bf16.mxu1 %v4574_v56 }
 0x110   :  { %2394 = vmatmul.mubr.bf16.vlgmr.msra.gmra.mxu0 %v4576_v59  ;;  %2435 = vmatmul.mubr.bf16.vlgmr.msra.gmra.mxu1 %v4570_v51 }
 0x111   :  { %2444 = vmatpush1.bf16.msra.mxu0 %v4090_v57  ;;  %2497 = vmatpush1.bf16.msra.mxu1 %v4114_v58  ;;  %v159_v57 = vsub.s32 4, %v4547_v27  ;;  %v4144_v58 = vld [vmem:[#allocation5 + $0xa8] ss:$20 sps:$4 sm:$0xff]  }
 0x112   :  { %2445 = vmatprep.subr.bf16.mxu0 %v4095_v60  ;;  %2498 = vmatprep.subr.bf16.mxu1 %v4122_v61  ;;  %v4149_v60 = vld [vmem:[#allocation5 + $0x694] ss:$20 sps:$4 sm:$0xff]   ;;  %v4152_v61 = vld [vmem:[#allocation5 + $0x84] ss:$20 sps:$4 sm:$0xff]  }
 0x113   :  { %2516 = vmatprep.mubr.bf16.mxu1 %v4455_v55 }
 0x115   :  { %2446 = vmatpush1.bf16.msra.mxu0 %v4093_v62  ;;  %2499 = vmatpush1.bf16.msra.mxu1 %v4120_v63  ;;  %v4147_v62 = vld [vmem:[#allocation5 + $0x690] ss:$20 sps:$4 sm:$0xff]   ;;  %v160_v63 = vrot.slane %v4554_v30, %v159_v57 }
 0x116   :  { %2447 = vmatprep.subr.bf16.mxu0 %v4098_v0  ;;  %2525 = vmatprep.subr.bf16.mxu1 %v4128_v1  ;;  %v4150_v0 = vld [vmem:[#allocation5 + $0x80] ss:$20 sps:$4 sm:$0xff]   ;;  %v4162_v30 = vld [vmem:[#allocation5 + $0x30] ss:$20 sps:$4 sm:$0xff]  }
 0x117   :  { %v4155_v1 = vld [vmem:[#allocation5 + $0x66c] ss:$20 sps:$4 sm:$0xff]  }
 0x119   :  { %2448 = vmatpush1.bf16.msra.mxu0 %v4096_v2  ;;  %v4158_v2 = vld [vmem:[#allocation5 + $0x5c] ss:$20 sps:$4 sm:$0xff]  }
 0x11a   :  { %2449 = vmatprep.subr.bf16.mxu0 %v4101_v3  ;;  %v4153_v3 = vld [vmem:[#allocation5 + $0x668] ss:$20 sps:$4 sm:$0xff]  }
 0x11d   :  { %2450 = vmatpush1.bf16.msra.mxu0 %v4099_v4 }
 0x11e   :  { %2451 = vmatprep.subr.bf16.mxu0 %v4104_v5  ;;  %v4156_v5 = vld [vmem:[#allocation5 + $0x58] ss:$20 sps:$4 sm:$0xff]  }
 0x121   :  { %2452 = vmatpush1.bf16.msra.mxu0 %v4102_v6  ;;  %v4161_v6 = vld [vmem:[#allocation5 + $0x644] ss:$20 sps:$4 sm:$0xff]  }
 0x122   :  { %2453 = vmatprep.subr.bf16.mxu0 %v4107_v7  ;;  %v4164_v7 = vld [vmem:[#allocation5 + $0x34] ss:$20 sps:$4 sm:$0xff]  }
 0x125   :  { %2454 = vmatpush1.bf16.msra.mxu0 %v4105_v8  ;;  %v4159_v8 = vld [vmem:[#allocation5 + $0x640] ss:$20 sps:$4 sm:$0xff]  }
 0x126   :  { %2455 = vmatprep.subr.bf16.mxu0 %v4110_v9 }
 0x129   :  { %2456 = vmatpush1.bf16.msra.mxu0 %v4108_v10  ;;  %v4167_v10 = vld [vmem:[#allocation5 + $0x3a4] ss:$20 sps:$4 sm:$0xff]  }
 0x12a   :  { %2457 = vmatprep.subr.bf16.mxu0 %v4113_v11  ;;  %v4170_v11 = vld [vmem:[#allocation5 + $0xc] ss:$20 sps:$4 sm:$0xff]  }
 0x12d   :  { %2458 = vmatpush1.bf16.msra.mxu0 %v4111_v13 }
 0x12e   :  { %v710_v19 = vpop.f32.mrf.mxu1  ;;  %2459 = vmatprep.subr.bf16.mxu0 %v4119_v15  ;;  %v669_v21 = vpop.f32.mrf.mxu0  ;;  %v4173_v15 = vld [vmem:[#allocation5 + $0x37c] ss:$20 sps:$4 sm:$0xff]  }
 0x12f   :  { %v711_v22 = vadd.f32 %v710_v19, %v168_v16  ;;  %v670_v4 = vadd.f32 %v669_v21, %v160_v63  ;;  %v4176_v16 = vld [vmem:[#allocation5 + $0x264] ss:$20 sps:$4 sm:$0xff]   ;;  %v4179_v19 = vld [vmem:[#allocation5 + $0x354] ss:$20 sps:$4 sm:$0xff]  }
 0x130   :  { %v712_v23 = vpop.f32.mrf.mxu1  ;;  %v671_v24 = vpop.f32.mrf.mxu0  ;;  %v4177_v21 = vld [vmem:[#allocation5 + $0x350] ss:$20 sps:$4 sm:$0xff]   ;;  %v4219_v63 = vld [vmem:[#allocation5 + $0x4b8] ss:$20 sps:$4 sm:$0xff]  }
 0x131   :  { %v722_v25 = vmax.f32 %v711_v22, 0.0  ;;  %2460 = vmatpush2.bf16.msra.mxu0 %v4117_v17  ;;  %v672_v33 = vadd.f32 %v671_v24, %v164_v18  ;;  %v720_v9 = vmax.f32 %v670_v4, 0.0  ;;  %v4171_v17 = vld [vmem:[#allocation5 + $0x378] ss:$20 sps:$4 sm:$0xff]   ;;  %v4174_v18 = vld [vmem:[#allocation5 + $0x260] ss:$20 sps:$4 sm:$0xff]  }
 0x132   :  { %v713_v34 = vpop.f32.mrf.mxu1  ;;  %2461 = vmatprep.subr.bf16.mxu0 %v4125_v20  ;;  %v673_v36 = vpop.f32.mrf.mxu0  ;;  %v4182_v20 = vld [vmem:[#allocation5 + $0x23c] ss:$20 sps:$4 sm:$0xff]   ;;  %v4180_v22 = vld [vmem:[#allocation5 + $0x238] ss:$20 sps:$4 sm:$0xff]   ;;  %v4188_v24 = vld [vmem:[#allocation5 + $0x214] ss:$20 sps:$4 sm:$0xff]  }
 0x133   :  { %v4587_v37 = vpack.c.bf16 %v722_v25, %v722_v25  ;;  %v721_v40 = vmax.f32 %v672_v33, 0.0  ;;  %v4599_v13 = vpack.c.bf16 %v720_v9, %v720_v9  ;;  %v4185_v23 = vld [vmem:[#allocation5 + $0x32c] ss:$20 sps:$4 sm:$0xff]   ;;  %v4183_v25 = vld [vmem:[#allocation5 + $0x328] ss:$20 sps:$4 sm:$0xff]  }
 0x134   :  { %v714_v41 = vpop.f32.mrf.mxu1  ;;  %v674_v42 = vpop.f32.mrf.mxu0  ;;  %v4191_v33 = vld [vmem:[#allocation5 + $0x304] ss:$20 sps:$4 sm:$0xff]   ;;  %v4194_v34 = vld [vmem:[#allocation5 + $0x1ec] ss:$20 sps:$4 sm:$0xff]   ;;  %v4192_v36 = vld [vmem:[#allocation5 + $0x1e8] ss:$20 sps:$4 sm:$0xff]  }
 0x135   :  { %2462 = vmatpush2.bf16.msra.mxu0 %v4123_v26  ;;  %3690 = vmatmul.mubr.msk.bf16.vlgmr.msra.gmra.mxu1 %vm2357_vm3, %v4587_v37  ;;  %v4591_v44 = vpack.c.bf16 %v721_v40, %v721_v40  ;;  %v4186_v26 = vld [vmem:[#allocation5 + $0x210] ss:$20 sps:$4 sm:$0xff]   ;;  %v4195_v40 = vld [vmem:[#allocation5 + $0x2d8] ss:$20 sps:$4 sm:$0xff]   ;;  %v4198_v41 = vld [vmem:[#allocation5 + $0x1c0] ss:$20 sps:$4 sm:$0xff]  }
 0x136   :  { %2526 = vmatpush1.bf16.msra.mxu1 %v4126_v35  ;;  %2557 = vmatprep.mubr.bf16.mxu1 %v4572_v54  ;;  %v4189_v35 = vld [vmem:[#allocation5 + $0x300] ss:$20 sps:$4 sm:$0xff]   ;;  %v4228_v4 = vld [vmem:[#allocation5 + $0x5f8] ss:$20 sps:$4 sm:$0xff]  }
 0x137   :  { %2463 = vmatprep.subr.bf16.mxu0 %v4131_v38  ;;  %2527 = vmatprep.subr.bf16.mxu1 %v4134_v39  ;;  %v4197_v38 = vld [vmem:[#allocation5 + $0x2dc] ss:$20 sps:$4 sm:$0xff]   ;;  %v4200_v39 = vld [vmem:[#allocation5 + $0x1c4] ss:$20 sps:$4 sm:$0xff]   ;;  %v4203_v42 = vld [vmem:[#allocation5 + $0x2b4] ss:$20 sps:$4 sm:$0xff]  }
 0x138   :  { %2475 = vmatprep.mubr.bf16.mxu0 %v4591_v44  ;;  %v4239_v9 = vld [vmem:[#allocation5 + $0x444] ss:$20 sps:$4 sm:$0xff]  }
 0x139   :  { %2464 = vmatpush2.bf16.msra.mxu0 %v4129_v43  ;;  %v4206_v43 = vld [vmem:[#allocation5 + $0x19c] ss:$20 sps:$4 sm:$0xff]  }
 0x13a   :  { %2528 = vmatpush1.bf16.msra.mxu1 %v4132_v45  ;;  %2465 = vmatprep.subr.bf16.mxu0 %v4137_v46  ;;  %v4201_v45 = vld [vmem:[#allocation5 + $0x2b0] ss:$20 sps:$4 sm:$0xff]   ;;  %v4204_v46 = vld [vmem:[#allocation5 + $0x198] ss:$20 sps:$4 sm:$0xff]  }
 0x13b   :  { %2529 = vmatprep.subr.bf16.mxu1 %v4140_v47  ;;  %v4209_v47 = vld [vmem:[#allocation5 + $0x28c] ss:$20 sps:$4 sm:$0xff]  }
 0x13d   :  { %2466 = vmatpush2.bf16.msra.mxu0 %v4135_v48  ;;  %v4212_v48 = vld [vmem:[#allocation5 + $0x174] ss:$20 sps:$4 sm:$0xff]  }
 0x13e   :  { %2530 = vmatpush1.bf16.msra.mxu1 %v4138_v49  ;;  %2467 = vmatprep.subr.bf16.mxu0 %v4143_v50  ;;  %v4207_v49 = vld [vmem:[#allocation5 + $0x288] ss:$20 sps:$4 sm:$0xff]   ;;  %v4210_v50 = vld [vmem:[#allocation5 + $0x170] ss:$20 sps:$4 sm:$0xff]  }
 0x13f   :  { %2531 = vmatprep.subr.bf16.mxu1 %v4146_v52  ;;  %v4215_v52 = vld [vmem:[#allocation5 + $0x4e4] ss:$20 sps:$4 sm:$0xff]  }
 0x141   :  { %2468 = vmatpush2.bf16.msra.mxu0 %v4141_v53  ;;  %v4218_v53 = vld [vmem:[#allocation5 + $0x14c] ss:$20 sps:$4 sm:$0xff]  }
 0x142   :  { %2532 = vmatpush1.bf16.msra.mxu1 %v4144_v58  ;;  %2469 = vmatprep.subr.bf16.mxu0 %v4149_v60  ;;  %v4213_v58 = vld [vmem:[#allocation5 + $0x4e0] ss:$20 sps:$4 sm:$0xff]   ;;  %v4216_v60 = vld [vmem:[#allocation5 + $0x148] ss:$20 sps:$4 sm:$0xff]  }
 0x143   :  { %2533 = vmatprep.subr.bf16.mxu1 %v4152_v61  ;;  %v4221_v61 = vld [vmem:[#allocation5 + $0x4bc] ss:$20 sps:$4 sm:$0xff]  }
 0x145   :  { %2470 = vmatpush2.bf16.msra.mxu0 %v4147_v62  ;;  %v4224_v62 = vld [vmem:[#allocation5 + $0x624] ss:$20 sps:$4 sm:$0xff]  }
 0x146   :  { %2534 = vmatpush1.bf16.msra.mxu1 %v4150_v0  ;;  %2471 = vmatprep.subr.bf16.mxu0 %v4155_v1  ;;  %v4222_v0 = vld [vmem:[#allocation5 + $0x620] ss:$20 sps:$4 sm:$0xff]  }
 0x147   :  { %2535 = vmatprep.subr.bf16.mxu1 %v4158_v2  ;;  %v4227_v1 = vld [vmem:[#allocation5 + $0x494] ss:$20 sps:$4 sm:$0xff]   ;;  %v4230_v2 = vld [vmem:[#allocation5 + $0x5fc] ss:$20 sps:$4 sm:$0xff]  }
 0x149   :  { %2472 = vmatpush2.bf16.msra.mxu0 %v4153_v3  ;;  %v4225_v3 = vld [vmem:[#allocation5 + $0x490] ss:$20 sps:$4 sm:$0xff]  }
 0x14a   :  { %2536 = vmatpush1.bf16.msra.mxu1 %v4156_v5  ;;  %2473 = vmatprep.subr.bf16.mxu0 %v4161_v6  ;;  %v4233_v5 = vld [vmem:[#allocation5 + $0x46c] ss:$20 sps:$4 sm:$0xff]   ;;  %v4236_v6 = vld [vmem:[#allocation5 + $0x5d4] ss:$20 sps:$4 sm:$0xff]  }
 0x14b   :  { %2537 = vmatprep.subr.bf16.mxu1 %v4164_v7  ;;  %v4231_v7 = vld [vmem:[#allocation5 + $0x468] ss:$20 sps:$4 sm:$0xff]  }
 0x14d   :  { %2474 = vmatpush2.bf16.msra.mxu0 %v4159_v8  ;;  %v4234_v8 = vld [vmem:[#allocation5 + $0x5d0] ss:$20 sps:$4 sm:$0xff]  }
 0x14e   :  { %2538 = vmatpush1.bf16.msra.mxu1 %v4162_v30  ;;  %2566 = vmatprep.subr.bf16.mxu0 %v4167_v10  ;;  %v4242_v30 = vld [vmem:[#allocation5 + $0x5ac] ss:$20 sps:$4 sm:$0xff]  }
 0x14f   :  { %2539 = vmatprep.subr.bf16.mxu1 %v4170_v11  ;;  %v4237_v10 = vld [vmem:[#allocation5 + $0x440] ss:$20 sps:$4 sm:$0xff]   ;;  %v4240_v11 = vld [vmem:[#allocation5 + $0x5a8] ss:$20 sps:$4 sm:$0xff]  }
 0x150   :  { %2476 = vmatmul.mubr.bf16.vlgmr.msra.gmra.mxu0 %v4599_v13 }
 0x151   :  { %2567 = vmatpush1.bf16.msra.mxu0 %v4165_v12  ;;  %2598 = vmatprep.mubr.bf16.mxu0 %v4574_v56  ;;  %v4245_v12 = vld [vmem:[#allocation5 + $0x41c] ss:$20 sps:$4 sm:$0xff]  }
 0x152   :  { %2540 = vmatpush1.bf16.msra.mxu1 %v4168_v14  ;;  %2568 = vmatprep.subr.bf16.mxu0 %v4173_v15  ;;  %v4248_v14 = vld [vmem:[#allocation5 + $0x584] ss:$20 sps:$4 sm:$0xff]  }
 0x153   :  { %2541 = vmatprep.subr.bf16.mxu1 %v4176_v16  ;;  %v4243_v15 = vld [vmem:[#allocation5 + $0x418] ss:$20 sps:$4 sm:$0xff]   ;;  %v4246_v16 = vld [vmem:[#allocation5 + $0x580] ss:$20 sps:$4 sm:$0xff]  }
 0x155   :  { %2569 = vmatpush1.bf16.msra.mxu0 %v4171_v17  ;;  %v4251_v17 = vld [vmem:[#allocation5 + $0x3f4] ss:$20 sps:$4 sm:$0xff]  }
 0x156   :  { %2542 = vmatpush2.bf16.msra.mxu1 %v4174_v18  ;;  %2570 = vmatprep.subr.bf16.mxu0 %v4179_v19  ;;  %v4254_v18 = vld [vmem:[#allocation5 + $0x55c] ss:$20 sps:$4 sm:$0xff]  }
 0x157   :  { %2543 = vmatprep.subr.bf16.mxu1 %v4182_v20  ;;  %v4249_v19 = vld [vmem:[#allocation5 + $0x3f0] ss:$20 sps:$4 sm:$0xff]   ;;  %v4252_v20 = vld [vmem:[#allocation5 + $0x558] ss:$20 sps:$4 sm:$0xff]  }
 0x159   :  { %2571 = vmatpush1.bf16.msra.mxu0 %v4177_v21  ;;  %v4257_v21 = vld [vmem:[#allocation5 + $0x3cc] ss:$20 sps:$4 sm:$0xff]  }
 0x15a   :  { %2544 = vmatpush2.bf16.msra.mxu1 %v4180_v22  ;;  %2572 = vmatprep.subr.bf16.mxu0 %v4185_v23  ;;  %v4260_v22 = vld [vmem:[#allocation5 + $0x534] ss:$20 sps:$4 sm:$0xff]  }
 0x15b   :  { %2545 = vmatprep.subr.bf16.mxu1 %v4188_v24  ;;  %v4255_v23 = vld [vmem:[#allocation5 + $0x3c8] ss:$20 sps:$4 sm:$0xff]   ;;  %v4258_v24 = vld [vmem:[#allocation5 + $0x530] ss:$20 sps:$4 sm:$0xff]  }
 0x15d   :  { %2573 = vmatpush1.bf16.msra.mxu0 %v4183_v25  ;;  %v4263_v25 = vld [vmem:[#allocation5 + $0x7b4] ss:$20 sps:$4 sm:$0xff]  }
 0x15e   :  { %2546 = vmatpush2.bf16.msra.mxu1 %v4186_v26  ;;  %2574 = vmatprep.subr.bf16.mxu0 %v4191_v33  ;;  %v4266_v26 = vld [vmem:[#allocation5 + $0x50c] ss:$20 sps:$4 sm:$0xff]   ;;  %v4261_v33 = vld [vmem:[#allocation5 + $0x7b0] ss:$20 sps:$4 sm:$0xff]  }
 0x15f   :  { %2547 = vmatprep.subr.bf16.mxu1 %v4194_v34  ;;  %v4264_v34 = vld [vmem:[#allocation5 + $0x508] ss:$20 sps:$4 sm:$0xff]  }
 0x161   :  { %2575 = vmatpush1.bf16.msra.mxu0 %v4189_v35  ;;  %v4269_v35 = vld [vmem:[#allocation5 + $0x78c] ss:$20 sps:$4 sm:$0xff]  }
 0x162   :  { %2548 = vmatpush2.bf16.msra.mxu1 %v4192_v36  ;;  %2576 = vmatprep.subr.bf16.mxu0 %v4197_v38  ;;  %v4272_v36 = vld [vmem:[#allocation5 + $0x764] ss:$20 sps:$4 sm:$0xff]   ;;  %v4267_v38 = vld [vmem:[#allocation5 + $0x788] ss:$20 sps:$4 sm:$0xff]  }
 0x163   :  { %2549 = vmatprep.subr.bf16.mxu1 %v4200_v39  ;;  %v4270_v39 = vld [vmem:[#allocation5 + $0x760] ss:$20 sps:$4 sm:$0xff]  }
 0x165   :  { %2577 = vmatpush1.bf16.msra.mxu0 %v4195_v40  ;;  %v4273_v40 = vld [vmem:[#allocation5 + $0x268] ss:$20 sps:$4 sm:$0xff]  }
 0x166   :  { %2550 = vmatpush2.bf16.msra.mxu1 %v4198_v41  ;;  %2578 = vmatprep.subr.bf16.mxu0 %v4203_v42  ;;  %v4276_v41 = vld [vmem:[#allocation5 + $0x73c] ss:$20 sps:$4 sm:$0xff]  }
 0x167   :  { %2551 = vmatprep.subr.bf16.mxu1 %v4206_v43  ;;  %v4277_v42 = vld [vmem:[#allocation5 + $0x128] ss:$20 sps:$4 sm:$0xff]   ;;  %v4274_v43 = vld [vmem:[#allocation5 + $0x738] ss:$20 sps:$4 sm:$0xff]  }
 0x169   :  { %2579 = vmatpush1.bf16.msra.mxu0 %v4201_v45  ;;  %v4278_v45 = vld [vmem:[#allocation5 + $0x240] ss:$20 sps:$4 sm:$0xff]  }
 0x16a   :  { %2552 = vmatpush2.bf16.msra.mxu1 %v4204_v46  ;;  %2580 = vmatprep.subr.bf16.mxu0 %v4209_v47  ;;  %v4281_v46 = vld [vmem:[#allocation5 + $0x714] ss:$20 sps:$4 sm:$0xff]   ;;  %v4279_v47 = vld [vmem:[#allocation5 + $0x710] ss:$20 sps:$4 sm:$0xff]  }
 0x16b   :  { %2553 = vmatprep.subr.bf16.mxu1 %v4212_v48  ;;  %v4283_v48 = vld [vmem:[#allocation5 + $0x218] ss:$20 sps:$4 sm:$0xff]  }
 0x16d   :  { %2581 = vmatpush1.bf16.msra.mxu0 %v4207_v49  ;;  %v4286_v49 = vld [vmem:[#allocation5 + $0x6ec] ss:$20 sps:$4 sm:$0xff]  }
 0x16e   :  { %2554 = vmatpush2.bf16.msra.mxu1 %v4210_v50  ;;  %2582 = vmatprep.subr.bf16.mxu0 %v4215_v52  ;;  %v4287_v50 = vld [vmem:[#allocation5 + $0xd8] ss:$20 sps:$4 sm:$0xff]   ;;  %v4284_v52 = vld [vmem:[#allocation5 + $0x6e8] ss:$20 sps:$4 sm:$0xff]  }
 0x16f   :  { %2555 = vmatprep.subr.bf16.mxu1 %v4218_v53  ;;  %v4288_v53 = vld [vmem:[#allocation5 + $0x1f0] ss:$20 sps:$4 sm:$0xff]  }
 0x171   :  { %2583 = vmatpush2.bf16.msra.mxu0 %v4213_v58  ;;  %v4291_v58 = vld [vmem:[#allocation5 + $0x6c4] ss:$20 sps:$4 sm:$0xff]  }
 0x172   :  { %2556 = vmatpush2.bf16.msra.mxu1 %v4216_v60  ;;  %2584 = vmatprep.subr.bf16.mxu0 %v4221_v61  ;;  %v4292_v60 = vld [vmem:[#allocation5 + $0xb0] ss:$20 sps:$4 sm:$0xff]   ;;  %v4293_v61 = vld [vmem:[#allocation5 + $0x1c8] ss:$20 sps:$4 sm:$0xff]  }
 0x173   :  { %2607 = vmatprep.subr.bf16.mxu1 %v4224_v62  ;;  %v4296_v62 = vld [vmem:[#allocation5 + $0x69c] ss:$20 sps:$4 sm:$0xff]  }
 0x175   :  { %2558 = vmatmul.mubr.bf16.vlgmr.msra.gmra.mxu1 %v4576_v59  ;;  %2585 = vmatpush2.bf16.msra.mxu0 %v4219_v63  ;;  %v4297_v63 = vld [vmem:[#allocation5 + $0x88] ss:$20 sps:$4 sm:$0xff]  }
 0x176   :  { %2608 = vmatpush1.bf16.msra.mxu1 %v4222_v0  ;;  %2639 = vmatprep.mubr.bf16.mxu1 %v4591_v44  ;;  %v4294_v0 = vld [vmem:[#allocation5 + $0x698] ss:$20 sps:$4 sm:$0xff]  }
 0x177   :  { %2586 = vmatprep.subr.bf16.mxu0 %v4227_v1  ;;  %2609 = vmatprep.subr.bf16.mxu1 %v4230_v2  ;;  %v4298_v1 = vld [vmem:[#allocation5 + $0x1a0] ss:$20 sps:$4 sm:$0xff]  }
 0x178   :  { %v4301_v2 = vld [vmem:[#allocation5 + $0x674] ss:$20 sps:$4 sm:$0xff]  }
 0x179   :  { %2587 = vmatpush2.bf16.msra.mxu0 %v4225_v3  ;;  %v4302_v3 = vld [vmem:[#allocation5 + $0x60] ss:$20 sps:$4 sm:$0xff]  }
 0x17a   :  { %2610 = vmatpush1.bf16.msra.mxu1 %v4228_v4  ;;  %2588 = vmatprep.subr.bf16.mxu0 %v4233_v5  ;;  %v4299_v4 = vld [vmem:[#allocation5 + $0x670] ss:$20 sps:$4 sm:$0xff]   ;;  %v4303_v5 = vld [vmem:[#allocation5 + $0x178] ss:$20 sps:$4 sm:$0xff]  }
 0x17b   :  { %2611 = vmatprep.subr.bf16.mxu1 %v4236_v6  ;;  %v4306_v6 = vld [vmem:[#allocation5 + $0x64c] ss:$20 sps:$4 sm:$0xff]  }
 0x17d   :  { %2589 = vmatpush2.bf16.msra.mxu0 %v4231_v7  ;;  %v4307_v7 = vld [vmem:[#allocation5 + $0x38] ss:$20 sps:$4 sm:$0xff]  }
 0x17e   :  { %2612 = vmatpush1.bf16.msra.mxu1 %v4234_v8  ;;  %2590 = vmatprep.subr.bf16.mxu0 %v4239_v9  ;;  %v4304_v8 = vld [vmem:[#allocation5 + $0x648] ss:$20 sps:$4 sm:$0xff]   ;;  %v4308_v9 = vld [vmem:[#allocation5 + $0x150] ss:$20 sps:$4 sm:$0xff]  }
 0x17f   :  { %2613 = vmatprep.subr.bf16.mxu1 %v4242_v30  ;;  %v4310_v30 = vld [vmem:[#allocation5 + $0x4e8] ss:$20 sps:$4 sm:$0xff]  }
 0x181   :  { %2591 = vmatpush2.bf16.msra.mxu0 %v4237_v10  ;;  %v4309_v10 = vld [vmem:[#allocation5 + $0x10] ss:$20 sps:$4 sm:$0xff]  }
 0x182   :  { %2614 = vmatpush1.bf16.msra.mxu1 %v4240_v11  ;;  %2592 = vmatprep.subr.bf16.mxu0 %v4245_v12  ;;  %v4311_v11 = vld [vmem:[#allocation5 + $0x3a8] ss:$20 sps:$4 sm:$0xff]  }
 0x183   :  { %2615 = vmatprep.subr.bf16.mxu1 %v4248_v14  ;;  %v4312_v12 = vld [vmem:[#allocation5 + $0x768] ss:$20 sps:$4 sm:$0xff]   ;;  %v4313_v14 = vld [vmem:[#allocation5 + $0x4c0] ss:$20 sps:$4 sm:$0xff]  }
 0x185   :  { %2593 = vmatpush2.bf16.msra.mxu0 %v4243_v15  ;;  %v4314_v15 = vld [vmem:[#allocation5 + $0x628] ss:$20 sps:$4 sm:$0xff]  }
 0x186   :  { %2616 = vmatpush1.bf16.msra.mxu1 %v4246_v16  ;;  %2594 = vmatprep.subr.bf16.mxu0 %v4251_v17  ;;  %v4315_v16 = vld [vmem:[#allocation5 + $0x380] ss:$20 sps:$4 sm:$0xff]  }
 0x187   :  { %2617 = vmatprep.subr.bf16.mxu1 %v4254_v18  ;;  %v4316_v17 = vld [vmem:[#allocation5 + $0x740] ss:$20 sps:$4 sm:$0xff]   ;;  %v4317_v18 = vld [vmem:[#allocation5 + $0x498] ss:$20 sps:$4 sm:$0xff]  }
 0x189   :  { %2595 = vmatpush2.bf16.msra.mxu0 %v4249_v19  ;;  %v4318_v19 = vld [vmem:[#allocation5 + $0x600] ss:$20 sps:$4 sm:$0xff]  }
 0x18a   :  { %2618 = vmatpush1.bf16.msra.mxu1 %v4252_v20  ;;  %2596 = vmatprep.subr.bf16.mxu0 %v4257_v21  ;;  %v4319_v20 = vld [vmem:[#allocation5 + $0x358] ss:$20 sps:$4 sm:$0xff]  }
 0x18b   :  { %2619 = vmatprep.subr.bf16.mxu1 %v4260_v22  ;;  %v4320_v21 = vld [vmem:[#allocation5 + $0x718] ss:$20 sps:$4 sm:$0xff]   ;;  %v4321_v22 = vld [vmem:[#allocation5 + $0x470] ss:$20 sps:$4 sm:$0xff]  }
 0x18d   :  { %2597 = vmatpush2.bf16.msra.mxu0 %v4255_v23  ;;  %v4322_v23 = vld [vmem:[#allocation5 + $0x5d8] ss:$20 sps:$4 sm:$0xff]  }
 0x18e   :  { %2620 = vmatpush1.bf16.msra.mxu1 %v4258_v24  ;;  %2660 = vmatprep.subr.bf16.mxu0 %v4263_v25  ;;  %v4324_v24 = vld [vmem:[#allocation5 + $0x6f0] ss:$20 sps:$4 sm:$0xff]   ;;  %v4325_v25 = vld [vmem:[#allocation5 + $0x448] ss:$20 sps:$4 sm:$0xff]  }
 0x18f   :  { %2621 = vmatprep.subr.bf16.mxu1 %v4266_v26  ;;  %v4328_v26 = vld [vmem:[#allocation5 + $0x6c8] ss:$20 sps:$4 sm:$0xff]  }
 0x190   :  { %2599 = vmatmul.mubr.bf16.vlgmr.msra.gmra.mxu0 %v4570_v51 }
 0x191   :  { %2661 = vmatpush1.bf16.msra.mxu0 %v4261_v33  ;;  %2680 = vmatprep.mubr.bf16.mxu0 %v4455_v55  ;;  %v4282_v55 = vld [vmem:[#allocation5 + $0x100] ss:$20 sps:$4 sm:$0xff]  }
 0x192   :  { %2622 = vmatpush1.bf16.msra.mxu1 %v4264_v34  ;;  %2662 = vmatprep.subr.bf16.mxu0 %v4269_v35  ;;  %v4329_v33 = vld [vmem:[#allocation5 + $0x420] ss:$20 sps:$4 sm:$0xff]   ;;  %v4330_v34 = vld [vmem:[#allocation5 + $0x588] ss:$20 sps:$4 sm:$0xff]  }
 0x193   :  { %2623 = vmatprep.subr.bf16.mxu1 %v4272_v36  ;;  %v4331_v35 = vld [vmem:[#allocation5 + $0x2e0] ss:$20 sps:$4 sm:$0xff]  }
 0x194   :  { %v4332_v36 = vld [vmem:[#allocation5 + $0x6a0] ss:$20 sps:$4 sm:$0xff]  }
 0x195   :  { %2663 = vmatpush1.bf16.msra.mxu0 %v4267_v38  ;;  %v4333_v38 = vld [vmem:[#allocation5 + $0x3f8] ss:$20 sps:$4 sm:$0xff]  }
 0x196   :  { %2624 = vmatpush2.bf16.msra.mxu1 %v4270_v39  ;;  %3735 = vmatprep.subr.bf16.mxu0 %v4273_v40  ;;  %v4334_v39 = vld [vmem:[#allocation5 + $0x560] ss:$20 sps:$4 sm:$0xff]   ;;  %v4335_v40 = vld [vmem:[#allocation5 + $0x2b8] ss:$20 sps:$4 sm:$0xff]  }
 0x197   :  { %2625 = vmatprep.subr.bf16.mxu1 %v4276_v41  ;;  %v4336_v41 = vld [vmem:[#allocation5 + $0x678] ss:$20 sps:$4 sm:$0xff]  }
 0x198   :  { %3691 = vmatmul.mubr.msk.bf16.vlgmr.msra.gmra.mxu0 %vm2357_vm3, %v4587_v37 }
 0x199   :  { %3736 = vmatpush3.bf16.msra.mxu0 %v4277_v42  ;;  %2721 = vmatprep.mubr.bf16.mxu0 %v4572_v54  ;;  %v4289_v54 = vld [vmem:[#allocation5 + $0x6c0] ss:$20 sps:$4 sm:$0xff]   ;;  %v4337_v42 = vld [vmem:[#allocation5 + $0x3d0] ss:$20 sps:$4 sm:$0xff]  }
 0x19a   :  { %2626 = vmatpush2.bf16.msra.mxu1 %v4274_v43  ;;  %3737 = vmatprep.subr.bf16.mxu0 %v4278_v45  ;;  %v4338_v43 = vld [vmem:[#allocation5 + $0x538] ss:$20 sps:$4 sm:$0xff]   ;;  %v4339_v45 = vld [vmem:[#allocation5 + $0x290] ss:$20 sps:$4 sm:$0xff]  }
 0x19b   :  { %2627 = vmatprep.subr.bf16.mxu1 %v4281_v46  ;;  %v4340_v46 = vld [vmem:[#allocation5 + $0x650] ss:$20 sps:$4 sm:$0xff]  }
 0x19d   :  { %3738 = vmatpush3.bf16.msra.mxu0 %v4282_v55 }
 0x19e   :  { %2628 = vmatpush2.bf16.msra.mxu1 %v4279_v47  ;;  %3739 = vmatprep.subr.bf16.mxu0 %v4283_v48  ;;  %v4341_v48 = vld [vmem:[#allocation5 + $0x510] ss:$20 sps:$4 sm:$0xff]  }
 0x19f   :  { %2629 = vmatprep.subr.bf16.mxu1 %v4286_v49 }
 0x1a1   :  { %3740 = vmatpush3.bf16.msra.mxu0 %v4287_v50 }
 0x1a2   :  { %2630 = vmatpush2.bf16.msra.mxu1 %v4284_v52  ;;  %3741 = vmatprep.subr.bf16.mxu0 %v4288_v53  ;;  %v4342_v52 = vld [vmem:[#allocation5 + $0x7b8] ss:$20 sps:$4 sm:$0xff]   ;;  %v4456_v53 = vmov 0.0  }
 0x1a3   :  { %2631 = vmatprep.subr.bf16.mxu1 %v4291_v58 }
 0x1a5   :  { %3742 = vmatpush3.bf16.msra.mxu0 %v4292_v60 }
 0x1a6   :  { %2632 = vmatpush2.bf16.msra.mxu1 %v4289_v54  ;;  %3743 = vmatprep.subr.bf16.mxu0 %v4293_v61 }
 0x1a7   :  { %2633 = vmatprep.subr.bf16.mxu1 %v4296_v62  ;;  %v4343_v62 = vld [vmem:[#allocation5 + $0x790] ss:$20 sps:$4 sm:$0xff]  }
 0x1a9   :  { %3744 = vmatpush3.bf16.msra.mxu0 %v4297_v63  ;;  %v4344_v63 = vld [vmem:[%s4793_s5 + $0x78] sm:$0xff]  }
 0x1aa   :  { %2634 = vmatpush2.bf16.msra.mxu1 %v4294_v0  ;;  %3745 = vmatprep.subr.bf16.mxu0 %v4298_v1  ;;  %v4346_v0 = vld [vmem:[%s4793_s5 + $0x70] sm:$0xff]  }
 0x1ab   :  { %2635 = vmatprep.subr.bf16.mxu1 %v4301_v2  ;;  %v4347_v1 = vld [vmem:[%s4793_s5 + $0x30] sm:$0xff]   ;;  %v4361_v2 = vld [vmem:[%s4793_s5 + $0xb8] sm:$0xff]  }
 0x1ad   :  { %3746 = vmatpush3.bf16.msra.mxu0 %v4302_v3  ;;  %v4362_v3 = vld [vmem:[%s4793_s5 + $0xf0] sm:$0xff]  }
 0x1ae   :  { %2636 = vmatpush2.bf16.msra.mxu1 %v4299_v4  ;;  %3747 = vmatprep.subr.bf16.mxu0 %v4303_v5  ;;  %v4363_v4 = vld [vmem:[%s4793_s5 + $0xb0] sm:$0xff]   ;;  %v4349_v5 = vld [vmem:[%s4793_s5 + $0x28] sm:$0xff]  }
 0x1af   :  { %2637 = vmatprep.subr.bf16.mxu1 %v4306_v6  ;;  %v4364_v6 = vld [vmem:[%s4793_s5 + $0xe8] sm:$0xff]  }
 0x1b1   :  { %3748 = vmatpush3.bf16.msra.mxu0 %v4307_v7  ;;  %v4350_v7 = vld [vmem:[%s4793_s5 + $0x60] sm:$0xff]  }
 0x1b2   :  { %2638 = vmatpush2.bf16.msra.mxu1 %v4304_v8  ;;  %3749 = vmatprep.subr.bf16.mxu0 %v4308_v9  ;;  %v4365_v8 = vld [vmem:[%s4793_s5 + $0xa8] sm:$0xff]   ;;  %v4351_v9 = vld [vmem:[%s4793_s5 + $0x20] sm:$0xff]  }
 0x1b3   :  { %3757 = vmatprep.subr.bf16.mxu1 %v4310_v30  ;;  %v4366_v30 = vld [vmem:[%s4793_s5 + $0xe0] sm:$0xff]  }
 0x1b5   :  { %2640 = vmatmul.mubr.bf16.vlgmr.msra.gmra.mxu1 %v4599_v13  ;;  %3750 = vmatpush3.bf16.msra.mxu0 %v4309_v10  ;;  %v4352_v10 = vld [vmem:[%s4793_s5 + $0x58] sm:$0xff]  }
 0x1b6   :  { %3758 = vmatpush3.bf16.msra.mxu1 %v4311_v11  ;;  %2761 = vmatprep.mubr.bf16.mxu1 %v4574_v56  ;;  %v4323_v56 = vld [vmem:[#allocation5 + $0x330] ss:$20 sps:$4 sm:$0xff]  }
 0x1b7   :  { %3779 = vmatprep.subr.bf16.mxu0 %v4312_v12  ;;  %3759 = vmatprep.subr.bf16.mxu1 %v4313_v14  ;;  %v4367_v11 = vld [vmem:[%s4793_s5 + $0xa0] sm:$0xff]   ;;  %v4353_v12 = vld [vmem:[%s4793_s5 + $0x18] sm:$0xff]  }
 0x1b8   :  { %2722 = vmatmul.mubr.bf16.vlgmr.msra.gmra.mxu0 %v4576_v59  ;;  %v4326_v59 = vld [vmem:[#allocation5 + $0x5b0] ss:$20 sps:$4 sm:$0xff]  }
 0x1b9   :  { %3780 = vmatpush3.bf16.msra.mxu0 %v4314_v15  ;;  %2801 = vmatprep.mubr.bf16.mxu0 %v4591_v44  ;;  %v4327_v44 = vld [vmem:[#allocation5 + $0x308] ss:$20 sps:$4 sm:$0xff]  }
 0x1ba   :  { %3760 = vmatpush3.bf16.msra.mxu1 %v4315_v16  ;;  %3781 = vmatprep.subr.bf16.mxu0 %v4316_v17  ;;  %v4368_v14 = vld [vmem:[%s4793_s5 + $0xd8] sm:$0xff]   ;;  %v4354_v15 = vld [vmem:[%s4793_s5 + $0x50] sm:$0xff]  }
 0x1bb   :  { %3761 = vmatprep.subr.bf16.mxu1 %v4317_v18  ;;  %v4369_v16 = vld [vmem:[%s4793_s5 + $0x98] sm:$0xff]   ;;  %v4355_v17 = vld [vmem:[%s4793_s5 + $0x10] sm:$0xff]   ;;  %v4356_v18 = vld [vmem:[%s4793_s5 + $0x48] sm:$0xff]  }
 0x1bd   :  { %3782 = vmatpush3.bf16.msra.mxu0 %v4318_v19  ;;  %v4357_v19 = vld [vmem:[%s4793_s5 + $0x8] sm:$0xff]  }
 0x1be   :  { %3762 = vmatpush3.bf16.msra.mxu1 %v4319_v20  ;;  %3783 = vmatprep.subr.bf16.mxu0 %v4320_v21  ;;  %v4358_v20 = vld [vmem:[%s4793_s5 + $0x40] sm:$0xff]   ;;  %v4370_v21 = vld [vmem:[%s4793_s5 + $0xd0] sm:$0xff]  }
 0x1bf   :  { %3763 = vmatprep.subr.bf16.mxu1 %v4321_v22  ;;  %v4371_v22 = vld [vmem:[%s4793_s5 + $0x90] sm:$0xff]  }
 0x1c1   :  { %3784 = vmatpush3.bf16.msra.mxu0 %v4322_v23 }
 0x1c2   :  { %3764 = vmatpush3.bf16.msra.mxu1 %v4323_v56  ;;  %3785 = vmatprep.subr.bf16.mxu0 %v4324_v24  ;;  %v4359_v56 = vld [vmem:[%s4793_s5] sm:$0xff]  }
 0x1c3   :  { %3765 = vmatprep.subr.bf16.mxu1 %v4325_v25  ;;  %v4372_v25 = vld [vmem:[%s4793_s5 + $0xc8] sm:$0xff]  }
 0x1c5   :  { %3786 = vmatpush3.bf16.msra.mxu0 %v4326_v59  ;;  %v4373_v59 = vld [vmem:[%s4793_s5 + $0x88] sm:$0xff]  }
 0x1c6   :  { %3766 = vmatpush3.bf16.msra.mxu1 %v4327_v44  ;;  %3787 = vmatprep.subr.bf16.mxu0 %v4328_v26 }
 0x1c7   :  { %3767 = vmatprep.subr.bf16.mxu1 %v4329_v33  ;;  %v4374_v33 = vld [vmem:[%s4793_s5 + $0xc0] sm:$0xff]  }
 0x1c9   :  { %3788 = vmatpush3.bf16.msra.mxu0 %v4330_v34  ;;  %v4375_v34 = vld [vmem:[%s4793_s5 + $0x80] sm:$0xff]  }
 0x1ca   :  { %3768 = vmatpush3.bf16.msra.mxu1 %v4331_v35  ;;  %3789 = vmatprep.subr.bf16.mxu0 %v4332_v36  ;;  %v4730_v35 = vld [vmem:[%s4792_s4] sm:$0x1f] }
 0x1cb   :  { %3769 = vmatprep.subr.bf16.mxu1 %v4333_v38  ;;  %v1035_v36 = vrot.slane %v4730_v35, %v143_v28  ;;  %v1039_v38 = vrot.slane %v4730_v35, %v147_v31  ;;  %v4376_v31 = vld [vmem:[%s4793_s5 + $0x118] sm:$0xff]  }
 0x1cd   :  { %3790 = vmatpush3.bf16.msra.mxu0 %v4334_v39 }
 0x1ce   :  { %3770 = vmatpush3.bf16.msra.mxu1 %v4335_v40  ;;  %3791 = vmatprep.subr.bf16.mxu0 %v4336_v41 }
 0x1cf   :  { %3771 = vmatprep.subr.bf16.mxu1 %v4337_v42 }
 0x1d0   :  { %v4614_v55 = vpop.f32.mrf.mxu0  ;;  %v4616_v47 = vpop.f32.mrf.mxu1 }
 0x1d1   :  { %3792 = vmatpush3.bf16.msra.mxu0 %v4338_v43  ;;  %v2396_v39 = vadd.f32 %v4614_v55, %v1035_v36 }
 0x1d2   :  { %3772 = vmatpush3.bf16.msra.mxu1 %v4339_v45  ;;  %v4618_v49 = vpop.f32.mrf.mxu0  ;;  %v4620_v50 = vpop.f32.mrf.mxu1  ;;  %3793 = vmatprep.subr.bf16.mxu0 %v4340_v46 }
 0x1d3   :  { %3856 = vmatprep.subr.bf16.mxu1 %v4456_v53  ;;  %v2398_v40 = vadd.f32 %v4618_v49, %v1039_v38  ;;  %v2437_v41 = vadd.f32 %v4616_v47, %v2396_v39  ;;  %v4377_v47 = vld [vmem:[%s4793_s5 + $0x110] sm:$0xff]   ;;  %v4378_v49 = vld [vmem:[%s4793_s5 + $0x108] sm:$0xff]  }
 0x1d4   :  { %v2399_v58 = vpop.f32.mrf.mxu0  ;;  %v2440_v60 = vpop.f32.mrf.mxu1 }
 0x1d5   :  { %2762 = vmatmul.mubr.bf16.vlgmr.msra.gmra.mxu1 %v4570_v51  ;;  %3794 = vmatpush3.bf16.msra.mxu0 %v4341_v48  ;;  %v4345_v51 = vld [vmem:[%s4793_s5 + $0x38] sm:$0xff]   ;;  %v2439_v43 = vadd.f32 %v4620_v50, %v2398_v40  ;;  %v4379_v50 = vld [vmem:[%s4793_s5 + $0x100] sm:$0xff]  }
 0x1d6   :  { %3857 = vmatpush3.bf16.msra.mxu1 %v4342_v52  ;;  %v2400_v54 = vpop.f32.mrf.mxu0  ;;  %v2441_v61 = vpop.f32.mrf.mxu1  ;;  %3860 = vmatprep.mubr.msk.bf16.mxu1 %vm4457_vm4, %v4456_v53 }
 0x1d7   :  { %3858 = vmatprep.subr.bf16.mxu1 %v4456_v53 }
 0x1d8   :  { %2802 = vmatmul.mubr.bf16.vlgmr.msra.gmra.mxu0 %v4599_v13  ;;  %v4360_v13 = vld [vmem:[%s4793_s5 + $0xf8] sm:$0xff]  }
 0x1d9   :  { %3826 = vmatprep.subr.bf16.mxu0 %v4360_v13 }
 0x1da   :  { %3859 = vmatpush3.bf16.msra.mxu1 %v4343_v62  ;;  %3827 = vmatpush3.bf16.msra.mxu0 %v4361_v2 }
 0x1db   :  { %3804 = vmatprep.subr.bf16.mxu1 %v4344_v63  ;;  %3828 = vmatprep.subr.bf16.mxu0 %v4362_v3 }
 0x1dd   :  { %3861 = vmatmul.mubr.msk.bf16.vlgmr.msra.gmra.mxu1 %vm2357_vm3, %v4587_v37  ;;  %v4348_v37 = vld [vmem:[%s4793_s5 + $0x68] sm:$0xff]  }
 0x1de   :  { %3805 = vmatpush3.bf16.msra.mxu1 %v4345_v51  ;;  %3829 = vmatpush3.bf16.msra.mxu0 %v4363_v4 }
 0x1df   :  { %3806 = vmatprep.subr.bf16.mxu1 %v4346_v0  ;;  %3830 = vmatprep.subr.bf16.mxu0 %v4364_v6 }
 0x1e2   :  { %3807 = vmatpush3.bf16.msra.mxu1 %v4347_v1  ;;  %3831 = vmatpush3.bf16.msra.mxu0 %v4365_v8  ;;  %v1043_v8 = vrot.slane %v4730_v35, %v151_v29 }
 0x1e3   :  { %3808 = vmatprep.subr.bf16.mxu1 %v4348_v37  ;;  %3832 = vmatprep.subr.bf16.mxu0 %v4366_v30 }
 0x1e6   :  { %3809 = vmatpush3.bf16.msra.mxu1 %v4349_v5  ;;  %3833 = vmatpush3.bf16.msra.mxu0 %v4367_v11 }
 0x1e7   :  { %3810 = vmatprep.subr.bf16.mxu1 %v4350_v7  ;;  %3834 = vmatprep.subr.bf16.mxu0 %v4368_v14 }
 0x1ea   :  { %3811 = vmatpush3.bf16.msra.mxu1 %v4351_v9  ;;  %3835 = vmatpush3.bf16.msra.mxu0 %v4369_v16  ;;  %v1047_v9 = vrot.slane %v4730_v35, %v155_v32 }
 0x1eb   :  { %3812 = vmatprep.subr.bf16.mxu1 %v4352_v10  ;;  %3836 = vmatprep.subr.bf16.mxu0 %v4370_v21 }
 0x1ee   :  { %3813 = vmatpush3.bf16.msra.mxu1 %v4353_v12  ;;  %3837 = vmatpush3.bf16.msra.mxu0 %v4371_v22 }
 0x1ef   :  { %3814 = vmatprep.subr.bf16.mxu1 %v4354_v15  ;;  %3838 = vmatprep.subr.bf16.mxu0 %v4372_v25 }
 0x1f2   :  { %3815 = vmatpush3.bf16.msra.mxu1 %v4355_v17  ;;  %3839 = vmatpush3.bf16.msra.mxu0 %v4373_v59 }
 0x1f3   :  { %3816 = vmatprep.subr.bf16.mxu1 %v4356_v18  ;;  %3840 = vmatprep.subr.bf16.mxu0 %v4374_v33 }
 0x1f5   :  { %v2518_v23 = vpop.f32.mrf.mxu1 }
 0x1f6   :  { %3817 = vmatpush3.bf16.msra.mxu1 %v4357_v19  ;;  %3841 = vmatpush3.bf16.msra.mxu0 %v4375_v34 }
 0x1f7   :  { %v2520_v24 = vpop.f32.mrf.mxu1  ;;  %3818 = vmatprep.subr.bf16.mxu1 %v4358_v20 }
 0x1f9   :  { %v2522_v44 = vpop.f32.mrf.mxu1 }
 0x1fa   :  { %3819 = vmatpush3.bf16.msra.mxu1 %v4359_v56  ;;  %v1051_v44 = vrot.slane %v4730_v35, %v159_v57 }
 0x1fb   :  { %v2523_v26 = vpop.f32.mrf.mxu1  ;;  %3864 = vmatprep.subr.bf16.mxu1 %v4456_v53 }
 0x210   :  { %v2477_v42 = vpop.f32.mrf.mxu0 }
 0x211   :  { %v2478_v45 = vadd.f32 %v2477_v42, %v2437_v41 }
 0x212   :  { %v2479_v46 = vpop.f32.mrf.mxu0 }
 0x213   :  { %v2519_v48 = vadd.f32 %v2518_v23, %v2478_v45  ;;  %v2480_v52 = vadd.f32 %v2479_v46, %v2439_v43 }
 0x214   :  { %v2481_v58 = vpop.f32.mrf.mxu0 }
 0x215   :  { %v2521_v60 = vadd.f32 %v2520_v24, %v2480_v52  ;;  %v2849_v28 = vmax.f32 %v2519_v48, 0.0 }
 0x216   :  { %v2482_v54 = vpop.f32.mrf.mxu0 }
 0x217   :  { %v2850_v61 = vmax.f32 %v2521_v60, 0.0  ;;  %v2854_v55 = vpack.c.bf16 %v2849_v28, %v2849_v28 }
 0x219   :  { %v2855_v62 = vpack.c.bf16 %v2850_v61, %v2850_v61  ;;  %v4380_v61 = vld [vmem:[%s4795_s7 + $0x8] sm:$0xff]  }
 0x21b   :  { %3190 = vmatprep.mubr.bf16.mxu1 %v2855_v62 }
 0x21c   :  { %3191 = vmatmul.mubr.bf16.vlgmr.msra.gmra.mxu1 %v2854_v55 }
 0x21d   :  { %3865 = vmatpush3.bf16.msra.mxu1 %v4376_v31  ;;  %3872 = vmatprep.mubr.msk.bf16.mxu1 %vm4457_vm4, %v4456_v53 }
 0x21e   :  { %3866 = vmatprep.subr.bf16.mxu1 %v4456_v53 }
 0x221   :  { %3867 = vmatpush3.bf16.msra.mxu1 %v4377_v47 }
 0x222   :  { %3868 = vmatprep.subr.bf16.mxu1 %v4456_v53 }
 0x225   :  { %3869 = vmatpush3.bf16.msra.mxu1 %v4378_v49 }
 0x226   :  { %3870 = vmatprep.subr.bf16.mxu1 %v4456_v53 }
 0x229   :  { %3871 = vmatpush3.bf16.msra.mxu1 %v4379_v50  ;;  %v4381_v50 = vld [vmem:[%s4795_s7] sm:$0xff]  }
 0x22a   :  { %3876 = vmatprep.subr.bf16.mxu1 %v4456_v53 }
 0x235   :  { %v2559_v63 = vpop.f32.mrf.mxu1 }
 0x236   :  { %v2560_v30 = vadd.f32 %v2559_v63, %v1043_v8 }
 0x237   :  { %v2561_v51 = vpop.f32.mrf.mxu1 }
 0x238   :  { %v2562_v10 = vadd.f32 %v2561_v51, %v1047_v9 }
 0x239   :  { %v2563_v0 = vpop.f32.mrf.mxu1 }
 0x23b   :  { %v2564_v1 = vpop.f32.mrf.mxu1 }
 0x250   :  { %v2600_v13 = vpop.f32.mrf.mxu0 }
 0x251   :  { %v2601_v11 = vadd.f32 %v2600_v13, %v2560_v30  ;;  %v3693_v13 = vld [vmem:[%s4794_s6] ss:$0 sm:$0xff]  ;;  %s4422_s6 = scalar_lea.vmem %s3355_s28, 64 }
 0x252   :  { %v2602_v2 = vpop.f32.mrf.mxu0  ;;  %v3731_v30 = vld [vmem:[%s4796_s8] ss:$0 sm:$0xff]  ;;  %p4423_p10 = scmp.ne.s32.totalorder %s3355_s28, %s4422_s6  ;;  %p4428_p12 = scmp.lt.s32.totalorder %s4422_s6, %s4422_s6 }
 0x253   :  { %v2603_v14 = vadd.f32 %v2602_v2, %v2562_v10 }
 0x254   :  { %v2604_v3 = vpop.f32.mrf.mxu0  ;;  %p4429_p13 = por %p4428_p12, %p4427_p11 }
 0x256   :  { %v2605_v37 = vpop.f32.mrf.mxu0  ;;  %p4430_p0 = pnand %p4429_p13, %p4423_p10 }
 0x258   :  { %v2682_v4 = vpop.f32.mrf.mxu0 }
 0x25a   :  { %v2684_v5 = vpop.f32.mrf.mxu0 }
 0x25c   :  { %v2686_v6 = vpop.f32.mrf.mxu0 }
 0x25e   :  { %v2687_v7 = vpop.f32.mrf.mxu0 }
 0x275   :  { %v2641_v12 = vpop.f32.mrf.mxu1 }
 0x276   :  { %v2642_v15 = vadd.f32 %v2641_v12, %v2601_v11 }
 0x277   :  { %v2643_v16 = vpop.f32.mrf.mxu1 }
 0x278   :  { %v2683_v17 = vadd.f32 %v2682_v4, %v2642_v15  ;;  %v2644_v18 = vadd.f32 %v2643_v16, %v2603_v14  ;;  %v3751_v19 = vpop.f32.mrf.mxu0 }
 0x279   :  { %v2645_v20 = vpop.f32.mrf.mxu1 }
 0x27a   :  { %v2685_v21 = vadd.f32 %v2684_v5, %v2644_v18  ;;  %v3752_v22 = vpop.f32.mrf.mxu0  ;;  %v2851_v23 = vmax.f32 %v2683_v17, 0.0 }
 0x27b   :  { %v2646_v56 = vpop.f32.mrf.mxu1  ;;  %v3753_v26 = vadd.f32 %v3752_v22, %v3751_v19 }
 0x27c   :  { %v2852_v29 = vmax.f32 %v2685_v21, 0.0  ;;  %v3754_v24 = vpop.f32.mrf.mxu0  ;;  %v2856_v32 = vpack.c.bf16 %v2851_v23, %v2851_v23 }
 0x27d   :  { %v2724_v36 = vadd.f32 %v3753_v26, %v1051_v44 }
 0x27e   :  { %v2857_v25 = vpack.c.bf16 %v2852_v29, %v2852_v29  ;;  %v3755_v59 = vpop.f32.mrf.mxu0 }
 0x280   :  { %3230 = vmatprep.mubr.bf16.mxu0 %v2857_v25 }
 0x281   :  { %3231 = vmatmul.mubr.bf16.vlgmr.msra.gmra.mxu0 %v2856_v32 }
 0x295   :  { %v3773_v33 = vpop.f32.mrf.mxu1 }
 0x297   :  { %v3774_v34 = vpop.f32.mrf.mxu1 }
 0x298   :  { %v3775_v38 = vadd.f32 %v3774_v34, %v3773_v33  ;;  %v3795_v39 = vpop.f32.mrf.mxu0 }
 0x299   :  { %v3776_v40 = vpop.f32.mrf.mxu1 }
 0x29a   :  { %v2764_v41 = vadd.f32 %v3775_v38, %v2724_v36  ;;  %v3796_v42 = vpop.f32.mrf.mxu0 }
 0x29b   :  { %v3797_v43 = vadd.f32 %v3796_v42, %v3795_v39  ;;  %v3777_v45 = vpop.f32.mrf.mxu1 }
 0x29c   :  { %v3798_v46 = vpop.f32.mrf.mxu0 }
 0x29d   :  { %v2804_v48 = vadd.f32 %v3797_v43, %v2764_v41  ;;  %v2843_v52 = vpop.f32.mrf.mxu1 }
 0x29e   :  { %v3799_v58 = vpop.f32.mrf.mxu0 }
 0x29f   :  { %v2844_v60 = vadd.f32 %v2843_v52, %v2804_v48  ;;  %v3862_v28 = vpop.f32.mrf.mxu1 }
 0x2a1   :  { %v2853_v27 = vmax.f32 %v2844_v60, 0.0  ;;  %v2846_v54 = vpop.f32.mrf.mxu1 }
 0x2a3   :  { %v2858_v57 = vpack.c.bf16 %v2853_v27, %v2853_v27  ;;  %v3863_v35 = vpop.f32.mrf.mxu1 }
 0x2a5   :  { %3873 = vmatmul.mubr.msk.bf16.vlgmr.msra.gmra.mxu1 %vm3154_vm5, %v2858_v57 }
 0x2a6   :  { %3880 = vmatprep.mubr.msk.bf16.mxu1 %vm4457_vm4, %v4456_v53  ;;  %3877 = vmatpush3.bf16.msra.mxu1 %v4380_v61 }
 0x2a7   :  { %3878 = vmatprep.subr.bf16.mxu1 %v4456_v53 }
 0x2aa   :  { %3879 = vmatpush3.bf16.msra.mxu1 %v4381_v50 }
 0x2dc   :  { %v3820_v62 = vpop.f32.mrf.mxu1 }
 0x2de   :  { %v3821_v31 = vpop.f32.mrf.mxu1 }
 0x2df   :  { %v3822_v55 = vadd.f32 %v3821_v31, %v3820_v62 }
 0x2e0   :  { %v3823_v47 = vpop.f32.mrf.mxu1 }
 0x2e1   :  { %v3193_v53 = vadd.f32 %v3822_v55, %v3693_v13 }
 0x2e2   :  { %v3824_v49 = vpop.f32.mrf.mxu1 }
 0x341   :  { %v3842_v63 = vpop.f32.mrf.mxu0 }
 0x343   :  { %v3843_v51 = vpop.f32.mrf.mxu0 }
 0x344   :  { %v3844_v2 = vadd.f32 %v3843_v51, %v3842_v63 }
 0x345   :  { %v3845_v0 = vpop.f32.mrf.mxu0 }
 0x346   :  { %v3233_v3 = vadd.f32 %v3844_v2, %v3193_v53 }
 0x347   :  { %v3846_v1 = vpop.f32.mrf.mxu0 }
 0x365   :  { %v3272_v37 = vpop.f32.mrf.mxu1 }
 0x366   :  { %v3273_v4 = vadd.f32 %v3272_v37, %v3233_v3 }
 0x367   :  { %v3874_v5 = vpop.f32.mrf.mxu1 }
 0x368   :  { %v3278_v6 = vmax.f32 %v3273_v4, 0.0 }
 0x369   :  { %v3275_v7 = vpop.f32.mrf.mxu1 }
 0x36a   :  { %v3279_v8 = vpack.c.bf16 %v3278_v6, %v3278_v6 }
 0x36b   :  { %v3875_v9 = vpop.f32.mrf.mxu1 }
 0x36c   :  { %3881 = vmatmul.mubr.msk.bf16.vlgmr.msra.gmra.mxu1 %vm2357_vm3, %v3279_v8 }
 0x42c   :  { %v3340_v10 = vpop.f32.mrf.mxu1 }
 0x42d   :  { %v3341_v11 = vadd.f32 %v3731_v30, %v3340_v10 }
 0x42e   :  { %v3882_v12 = vpop.f32.mrf.mxu1 }
 0x42f   :  { %v3346_v14 = vpack.c.bf16 %v3341_v11, %v3341_v11 }
 0x430   :  { %v3343_v15 = vpop.f32.mrf.mxu1 }
 0x431   :  { %3347 = vst [vmem:[#allocation7] sm:$0xf] %v3346_v14 }
 0x432   :  { %v3883_v16 = vpop.f32.mrf.mxu1 }
 0x433   :  { %4433 = shalt.err (!%p4430_p0)
}
 0x434   :  { %3357 = dma.vmem_to_hbm [thread:$0]  %s3355_s28, 64, %s4797_s9, [#allocation4]  }
 0x435   :  { %4446 = dma.done.wait [#allocation4], 64  }
 0x436   :  { %4447 = vsyncadd [#allocation4], 4294967232 }
 0x437   :  { %3361 = vsyncpa [#allocation3], 1 }
 0x438   :  { %3362 = vsyncpa [#allocation6], 1 }
 0x439   :  { %3363 = vsyncpa [#allocation4], 1 }

</bundles_post_ra>
